<compile_context>
chip_gen: v7x
topology: tpu7x:2x2x1
jax: 0.10.0
libtpu: 0.0.40
codegen_flags: <defaults>
</compile_context>

<pallas_src>
import functools

import jax
import jax.numpy as jnp
import numpy as np
from jax.experimental import pallas as pl
from jax.experimental.pallas import tpu as pltpu


# Set to 2 on v7x to use both TensorCores (conv-output rows split across a
# size-2 "parallel" grid axis; the tiny gating is recomputed per tile).
# Keep 1 on v5e/v6e where a second grid step is pure overhead.
NUM_COUT_TILES = 1


# ----------------------------------------------------------------------------
# Fused kernel: shuffle-attention gate + (folded) channel shuffle + 1x1 conv
# ----------------------------------------------------------------------------
def _fused_block_kernel(tx_ref, vx_ref, pt_ref, pv_ref, wt_ref, wv_ref,
                        bias_ref, indm_ref, indt_ref, o_ref):
    """One level (all batch elements) per invocation.

    tx_ref / vx_ref : (Cb, N)       thermal / rgb halves of the concat input,
                                    N = B*HW (batch folded into the lane dim)
    pt_ref / pv_ref : (Cb, 8)       per-channel params,
                      cols = [branch_mask, cw, cb, sw, sb, gn_w, gn_b, pad]
    wt_ref / wv_ref : (Cout_t, Cb)  1x1-conv weight with channel_shuffle(g=2)
                                    folded into its columns, thermal/rgb halves
    bias_ref        : (Cout_t, 1)
    indm_ref        : (N, Bp)       per-batch-segment averaging matrix (1/HW)
    indt_ref        : (Bp, N)       per-batch-segment 0/1 broadcast matrix
    o_ref           : (Cout_t, N)
    """
    indm = indm_ref[...]
    indt = indt_ref[...]

    def gated(x, p):
        # x: (Cb, N), p: (Cb, 8)
        mask = p[:, 0:1]                      # 1.0 -> channel branch, 0.0 -> spatial
        cw, cb = p[:, 1:2], p[:, 2:3]
        sw, sb = p[:, 3:4], p[:, 4:5]
        gw, gb = p[:, 5:6], p[:, 6:7]

        # Per-(channel, batch) statistics via MXU dots against the block
        # indicator (batch segments are contiguous along the lane dim).
        mean = jnp.dot(x, indm, preferred_element_type=jnp.float32)       # (Cb, Bp)
        meansq = jnp.dot(x * x, indm, preferred_element_type=jnp.float32)  # (Cb, Bp)
        rstd = jax.lax.rsqrt(meansq - mean * mean + 1e-5)                 # (Cb, Bp)

        # Affine-gate coefficients at (Cb, Bp) resolution (tiny):
        #   spatial branch: sigmoid(sw*((x-mean)*rstd*gw + gb) + sb)
        #                 = sigmoid(a_sp*x + d_sp)
        #   channel branch: sigmoid(cw*mean + cb)  (a = 0)
        a_sp = sw * gw * rstd
        d_sp = sw * gb + sb - a_sp * mean
        d_ch = cw * mean + cb
        a = (1.0 - mask) * a_sp
        d = mask * d_ch + (1.0 - mask) * d_sp

        # Broadcast (Cb, Bp) -> (Cb, N) along the per-batch lane segments.
        a_full = jnp.dot(a, indt, preferred_element_type=jnp.float32)     # (Cb, N)
        d_full = jnp.dot(d, indt, preferred_element_type=jnp.float32)     # (Cb, N)
        return x * jax.nn.sigmoid(a_full * x + d_full)

    att_t = gated(tx_ref[...], pt_ref[...])                               # (Cb, N)
    att_v = gated(vx_ref[...], pv_ref[...])                               # (Cb, N)

    # 1x1 conv on the (virtually concatenated, shuffle-folded) channels:
    #   y = W_fold[:, :Cb] @ att_t + W_fold[:, Cb:] @ att_v + bias
    y = jnp.dot(wt_ref[...], att_t, preferred_element_type=jnp.float32)
    y = y + jnp.dot(wv_ref[...], att_v, preferred_element_type=jnp.float32)
    o_ref[...] = (y + bias_ref[...]).astype(o_ref.dtype)


# ----------------------------------------------------------------------------
# Wrapper: one fused pallas_call per level
# ----------------------------------------------------------------------------
@functools.partial(jax.jit, static_argnums=(3,))
def shuffle_attention_block_pallas(tx, vx, params, groups):
    """tx, vx: (B, Cb, H, W) NCHW features. Returns (B, C//2, H, W), C = 2*Cb."""
    b, cb, h, w_sp = tx.shape
    c = 2 * cb
    cs = c // (2 * groups)
    cout = c // 2
    hw = h * w_sp
    n = b * hw

    # (B, Cb, HW) -> (Cb, B*HW): batch folded into the lane dim (one XLA copy,
    # fused under jit), batch segments contiguous along lanes.
    tx2 = tx.astype(jnp.float32).reshape(b, cb, hw).transpose(1, 0, 2).reshape(cb, n)
    vx2 = vx.astype(jnp.float32).reshape(b, cb, hw).transpose(1, 0, 2).reshape(cb, n)

    # --- expand the per-group (cs, 6) table to a per-channel (C, 8) table
    # (concatenated channel order). Static, done once per level at trace time.
    pos = np.arange(c) % (2 * cs)
    branch_mask = jnp.asarray((pos < cs).astype(np.float32))[:, None]       # (C, 1)
    cols = jnp.take(params["sa_params"],
                    jnp.asarray((pos % cs).astype(np.int32)), axis=0)       # (C, 6)
    table = jnp.concatenate(
        [branch_mask, cols, jnp.zeros((c, 1), jnp.float32)], axis=1)        # (C, 8)
    pt, pv = table[:cb], table[cb:]

    # --- fold channel_shuffle(groups=2) into the conv-weight columns.
    # shuffled[k] = att[perm[k]] with perm[k] = (k % 2) * (C//2) + k // 2, so
    # W @ shuffled == W[:, argsort(perm)] @ att.
    perm = (np.arange(c) % 2) * (c // 2) + np.arange(c) // 2
    w_fold = params["conv_w"][:, jnp.asarray(np.argsort(perm).astype(np.int32))]
    wt, wv = w_fold[:, :cb], w_fold[:, cb:]

    # --- block-indicator matrices for per-batch statistics / broadcasts.
    # Batch dim padded to a multiple of 8 (MXU-friendly; padded cols are zero).
    bpad = ((b + 7) // 8) * 8
    seg = np.repeat(np.arange(b), hw)                                       # (N,)
    indm = jnp.asarray(
        (seg[:, None] == np.arange(bpad)[None, :]).astype(np.float32) / hw)  # (N, Bp)
    indt = jnp.asarray(
        (np.arange(bpad)[:, None] == seg[None, :]).astype(np.float32))       # (Bp, N)

    t = NUM_COUT_TILES
    if t > 1:
        assert cout % t == 0 and (cout // t) % 8 == 0, (cout, t)
    cout_t = cout // t

    out = pl.pallas_call(
        _fused_block_kernel,
        out_shape=jax.ShapeDtypeStruct((cout, n), jnp.float32),
        grid=(t,),
        in_specs=[
            pl.BlockSpec((cb, n), lambda i: (0, 0)),       # thermal acts
            pl.BlockSpec((cb, n), lambda i: (0, 0)),       # rgb acts
            pl.BlockSpec((cb, 8), lambda i: (0, 0)),       # params (thermal half)
            pl.BlockSpec((cb, 8), lambda i: (0, 0)),       # params (rgb half)
            pl.BlockSpec((cout_t, cb), lambda i: (i, 0)),  # W_fold[:, :Cb]
            pl.BlockSpec((cout_t, cb), lambda i: (i, 0)),  # W_fold[:, Cb:]
            pl.BlockSpec((cout_t, 1), lambda i: (i, 0)),   # bias
            pl.BlockSpec((n, bpad), lambda i: (0, 0)),     # mean indicator
            pl.BlockSpec((bpad, n), lambda i: (0, 0)),     # broadcast indicator
        ],
        out_specs=pl.BlockSpec((cout_t, n), lambda i: (i, 0)),
        compiler_params=pltpu.CompilerParams(dimension_semantics=("parallel",)),
    )(tx2, vx2, pt, pv, wt, wv, params["conv_b"], indm, indt)

    # (Cout, B*HW) -> (B, Cout, H, W)
    return out.reshape(cout, b, hw).transpose(1, 0, 2).reshape(b, cout, h, w_sp)


def shuffle_att_fusion_forward(data_pair, params_list, groups_list):
    """Fusion-branch forward of FusionNet (Pallas hot path).

    data_pair = (thermal_feats, rgb_feats): lists of per-level NCHW backbone
    feature maps (the EfficientDet backbones themselves are external).
    """
    thermal_x, rgb_x = data_pair
    # TODO(synk): EfficientDet thermal/rgb backbones are external effdet modules.
    feats = []
    for i, (tx, vx) in enumerate(zip(thermal_x, rgb_x)):
        # torch.cat((tx, vx), dim=1) is folded into the kernel (two inputs).
        feats.append(
            shuffle_attention_block_pallas(tx, vx, params_list[i], groups_list[i])
        )
    # TODO(synk): fusion BiFPN, class_net and box_net are external effdet modules.
    return feats


# ----------------------------------------------------------------------------
# Parameter init (shapes from the fusion block __init__)
# ----------------------------------------------------------------------------
def init_block_params(key, in_channels, groups):
    cs = in_channels // (2 * groups)
    cout = in_channels // 2
    k1, k2, k3 = jax.random.split(key, 3)
    # torch inits cweight/sweight to zeros (which would zero out the reductions);
    # use small deterministic random values instead so the kernel math is exercised.
    sa = jnp.stack(
        [
            0.1 * jax.random.normal(k1, (cs,)),   # cweight
            jnp.ones((cs,)),                      # cbias
            0.1 * jax.random.normal(k2, (cs,)),   # sweight
            jnp.ones((cs,)),                      # sbias
            jnp.ones((cs,)),                      # GroupNorm weight
            jnp.zeros((cs,)),                     # GroupNorm bias
        ],
        axis=1,
    ).astype(jnp.float32)                          # (cs, 6)
    bound = 1.0 / np.sqrt(in_channels)
    conv_w = jax.random.uniform(
        k3, (cout, in_channels), minval=-bound, maxval=bound
    ).astype(jnp.float32)
    conv_b = jnp.zeros((cout, 1), jnp.float32)
    return {"sa_params": sa, "conv_w": conv_w, "conv_b": conv_b}


# ----------------------------------------------------------------------------
# Pure-JAX reference (mirrors the PyTorch forward, incl. the explicit shuffle)
# ----------------------------------------------------------------------------
def shuffle_attention_block_ref(x, params, groups):
    b, c, h, w = x.shape
    cs = c // (2 * groups)
    xg = x.reshape(b * groups, 2 * cs, h, w)
    x0, x1 = xg[:, :cs], xg[:, cs:]
    sa = params["sa_params"]
    cw = sa[:, 0].reshape(1, cs, 1, 1)
    cb = sa[:, 1].reshape(1, cs, 1, 1)
    sw = sa[:, 2].reshape(1, cs, 1, 1)
    sb = sa[:, 3].reshape(1, cs, 1, 1)
    gw = sa[:, 4].reshape(1, cs, 1, 1)
    gb = sa[:, 5].reshape(1, cs, 1, 1)

    xn = jnp.mean(x0, axis=(2, 3), keepdims=True)
    xn = x0 * jax.nn.sigmoid(cw * xn + cb)

    mu = jnp.mean(x1, axis=(2, 3), keepdims=True)
    var = jnp.mean((x1 - mu) ** 2, axis=(2, 3), keepdims=True)
    xhat = (x1 - mu) * jax.lax.rsqrt(var + 1e-5) * gw + gb
    xs = x1 * jax.nn.sigmoid(sw * xhat + sb)

    out = jnp.concatenate([xn, xs], axis=1).reshape(b, c, h, w)
    # explicit channel_shuffle(groups=2) -- validates the folded weight perm
    out = out.reshape(b, 2, c // 2, h, w).transpose(0, 2, 1, 3, 4).reshape(b, c, h, w)
    out = (
        jnp.einsum("oc,bchw->bohw", params["conv_w"], out, precision="highest")
        + params["conv_b"].reshape(1, -1, 1, 1)
    )
    return out


# ----------------------------------------------------------------------------
if __name__ == "__main__":
    key = jax.random.PRNGKey(0)
    batch = 2
    # (backbone channels per modality, spatial size) -> concat channels 96/416/256
    level_cfg = [(48, 16), (208, 8), (128, 4)]
    groups_map = {96: 12, 416: 52, 256: 32}

    keys = jax.random.split(key, 3 * len(level_cfg))
    thermal_feats, rgb_feats, params_list, groups_list = [], [], [], []
    for i, (chs, sp) in enumerate(level_cfg):
        kt, kr, kp = keys[3 * i], keys[3 * i + 1], keys[3 * i + 2]
        thermal_feats.append(jax.random.normal(kt, (batch, chs, sp, sp), jnp.float32))
        rgb_feats.append(jax.random.normal(kr, (batch, chs, sp, sp), jnp.float32))
        in_ch = 2 * chs
        groups_list.append(groups_map[in_ch])
        params_list.append(init_block_params(kp, in_ch, groups_map[in_ch]))

    feats = shuffle_att_fusion_forward(
        (thermal_feats, rgb_feats), params_list, groups_list
    )
    feats = jax.block_until_ready(feats)

    # validate against pure-JAX reference (explicit concat + explicit shuffle)
    for i, (chs, sp) in enumerate(level_cfg):
        x = jnp.concatenate([thermal_feats[i], rgb_feats[i]], axis=1)
        ref = shuffle_attention_block_ref(x, params_list[i], groups_list[i])
        assert feats[i].shape == (batch, chs, sp, sp), feats[i].shape
        np.testing.assert_allclose(
            np.asarray(feats[i]), np.asarray(ref), rtol=2e-4, atol=2e-4
        )

    print("KERNEL_OK")
</pallas_src>

<mosaic_0001>
module attributes {stable_mosaic.version = 11 : i64} {
  func.func @_fused_block_kernel(%arg0: i32, %arg1: memref<48x512xf32, #tpu.memory_space<vmem>>, %arg2: memref<48x512xf32, #tpu.memory_space<vmem>>, %arg3: memref<48x8xf32, #tpu.memory_space<vmem>>, %arg4: memref<48x8xf32, #tpu.memory_space<vmem>>, %arg5: memref<48x48xf32, #tpu.memory_space<vmem>>, %arg6: memref<48x48xf32, #tpu.memory_space<vmem>>, %arg7: memref<48x1xf32, #tpu.memory_space<vmem>>, %arg8: memref<512x8xf32, #tpu.memory_space<vmem>>, %arg9: memref<8x512xf32, #tpu.memory_space<vmem>>, %arg10: memref<48x512xf32, #tpu.memory_space<vmem>>) attributes {dimension_semantics = [#tpu.dimension_semantics<parallel>], iteration_bounds = array<i64: 1>, scalar_prefetch = 0 : i64, scratch_operands = 0 : i64, tpu.core_type = #tpu.core_type<tc>, window_params = [{pipeline_mode = #tpu.pipeline_mode<synchronous>, transform_indices = @transform_0, window_bounds = array<i64: 48, 512>}, {pipeline_mode = #tpu.pipeline_mode<synchronous>, transform_indices = @transform_1, window_bounds = array<i64: 48, 512>}, {pipeline_mode = #tpu.pipeline_mode<synchronous>, transform_indices = @transform_2, window_bounds = array<i64: 48, 8>}, {pipeline_mode = #tpu.pipeline_mode<synchronous>, transform_indices = @transform_3, window_bounds = array<i64: 48, 8>}, {transform_indices = @transform_4, window_bounds = array<i64: 48, 48>}, {transform_indices = @transform_5, window_bounds = array<i64: 48, 48>}, {transform_indices = @transform_6, window_bounds = array<i64: 48, 1>}, {pipeline_mode = #tpu.pipeline_mode<synchronous>, transform_indices = @transform_7, window_bounds = array<i64: 512, 8>}, {pipeline_mode = #tpu.pipeline_mode<synchronous>, transform_indices = @transform_8, window_bounds = array<i64: 8, 512>}, {transform_indices = @transform_9, window_bounds = array<i64: 48, 512>}]} {
    %c0 = arith.constant 0 : index
    %c0_0 = arith.constant 0 : index
    %0 = vector.load %arg8[%c0, %c0_0] : memref<512x8xf32, #tpu.memory_space<vmem>>, vector<512x8xf32>
    %c0_1 = arith.constant 0 : index
    %c0_2 = arith.constant 0 : index
    %1 = vector.load %arg9[%c0_1, %c0_2] : memref<8x512xf32, #tpu.memory_space<vmem>>, vector<8x512xf32>
    %c0_3 = arith.constant 0 : index
    %c0_4 = arith.constant 0 : index
    %2 = vector.load %arg1[%c0_3, %c0_4] : memref<48x512xf32, #tpu.memory_space<vmem>>, vector<48x512xf32>
    %c0_5 = arith.constant 0 : index
    %c0_6 = arith.constant 0 : index
    %3 = vector.load %arg3[%c0_5, %c0_6] : memref<48x8xf32, #tpu.memory_space<vmem>>, vector<48x8xf32>
    %4 = vector.extract_strided_slice %3 {offsets = [0, 0], sizes = [48, 1], strides = [1, 1]} : vector<48x8xf32> to vector<48x1xf32>
    %5 = vector.extract_strided_slice %3 {offsets = [0, 1], sizes = [48, 1], strides = [1, 1]} : vector<48x8xf32> to vector<48x1xf32>
    %6 = vector.extract_strided_slice %3 {offsets = [0, 2], sizes = [48, 1], strides = [1, 1]} : vector<48x8xf32> to vector<48x1xf32>
    %7 = vector.extract_strided_slice %3 {offsets = [0, 3], sizes = [48, 1], strides = [1, 1]} : vector<48x8xf32> to vector<48x1xf32>
    %8 = vector.extract_strided_slice %3 {offsets = [0, 4], sizes = [48, 1], strides = [1, 1]} : vector<48x8xf32> to vector<48x1xf32>
    %9 = vector.extract_strided_slice %3 {offsets = [0, 5], sizes = [48, 1], strides = [1, 1]} : vector<48x8xf32> to vector<48x1xf32>
    %10 = vector.extract_strided_slice %3 {offsets = [0, 6], sizes = [48, 1], strides = [1, 1]} : vector<48x8xf32> to vector<48x1xf32>
    %cst = arith.constant dense<0.000000e+00> : vector<48x8xf32>
    %11 = tpu.matmul %2, %0, %cst {dimension_numbers = #tpu.dot_dimension_numbers<[1], [0], [0], [1], [0, 0, 1, 1], [], []>} : vector<48x512xf32>, vector<512x8xf32>, vector<48x8xf32> -> vector<48x8xf32>
    %12 = arith.mulf %2, %2 : vector<48x512xf32>
    %cst_7 = arith.constant dense<0.000000e+00> : vector<48x8xf32>
    %13 = tpu.matmul %12, %0, %cst_7 {dimension_numbers = #tpu.dot_dimension_numbers<[1], [0], [0], [1], [0, 0, 1, 1], [], []>} : vector<48x512xf32>, vector<512x8xf32>, vector<48x8xf32> -> vector<48x8xf32>
    %14 = arith.mulf %11, %11 : vector<48x8xf32>
    %15 = arith.subf %13, %14 : vector<48x8xf32>
    %cst_8 = arith.constant 9.99999974E-6 : f32
    %16 = vector.broadcast %cst_8 : f32 to vector<48x8xf32>
    %17 = arith.addf %15, %16 : vector<48x8xf32>
    %18 = math.rsqrt %17 : vector<48x8xf32>
    %19 = arith.mulf %7, %9 : vector<48x1xf32>
    %20 = vector.broadcast %19 : vector<48x1xf32> to vector<48x8xf32>
    %21 = arith.mulf %20, %18 : vector<48x8xf32>
    %22 = arith.mulf %7, %10 : vector<48x1xf32>
    %23 = arith.addf %22, %8 : vector<48x1xf32>
    %24 = arith.mulf %21, %11 : vector<48x8xf32>
    %25 = vector.broadcast %23 : vector<48x1xf32> to vector<48x8xf32>
    %26 = arith.subf %25, %24 : vector<48x8xf32>
    %27 = vector.broadcast %5 : vector<48x1xf32> to vector<48x8xf32>
    %28 = arith.mulf %27, %11 : vector<48x8xf32>
    %29 = vector.broadcast %6 : vector<48x1xf32> to vector<48x8xf32>
    %30 = arith.addf %28, %29 : vector<48x8xf32>
    %cst_9 = arith.constant 1.000000e+00 : f32
    %31 = vector.broadcast %cst_9 : f32 to vector<48x1xf32>
    %32 = arith.subf %31, %4 : vector<48x1xf32>
    %33 = vector.broadcast %32 : vector<48x1xf32> to vector<48x8xf32>
    %34 = arith.mulf %33, %21 : vector<48x8xf32>
    %35 = vector.broadcast %4 : vector<48x1xf32> to vector<48x8xf32>
    %36 = arith.mulf %35, %30 : vector<48x8xf32>
    %cst_10 = arith.constant 1.000000e+00 : f32
    %37 = vector.broadcast %cst_10 : f32 to vector<48x1xf32>
    %38 = arith.subf %37, %4 : vector<48x1xf32>
    %39 = vector.broadcast %38 : vector<48x1xf32> to vector<48x8xf32>
    %40 = arith.mulf %39, %26 : vector<48x8xf32>
    %41 = arith.addf %36, %40 : vector<48x8xf32>
    %cst_11 = arith.constant dense<0.000000e+00> : vector<48x512xf32>
    %42 = tpu.matmul %34, %1, %cst_11 {dimension_numbers = #tpu.dot_dimension_numbers<[1], [0], [0], [1], [0, 0, 1, 1], [], []>} : vector<48x8xf32>, vector<8x512xf32>, vector<48x512xf32> -> vector<48x512xf32>
    %cst_12 = arith.constant dense<0.000000e+00> : vector<48x512xf32>
    %43 = tpu.matmul %41, %1, %cst_12 {dimension_numbers = #tpu.dot_dimension_numbers<[1], [0], [0], [1], [0, 0, 1, 1], [], []>} : vector<48x8xf32>, vector<8x512xf32>, vector<48x512xf32> -> vector<48x512xf32>
    %44 = arith.mulf %42, %2 : vector<48x512xf32>
    %45 = arith.addf %44, %43 : vector<48x512xf32>
    %46 = arith.negf %45 : vector<48x512xf32>
    %47 = math.exp %46 : vector<48x512xf32>
    %cst_13 = arith.constant 1.000000e+00 : f32
    %48 = vector.broadcast %cst_13 : f32 to vector<48x512xf32>
    %49 = arith.addf %48, %47 : vector<48x512xf32>
    %50 = arith.divf %48, %49 : vector<48x512xf32>
    %51 = arith.mulf %2, %50 : vector<48x512xf32>
    %c0_14 = arith.constant 0 : index
    %c0_15 = arith.constant 0 : index
    %52 = vector.load %arg2[%c0_14, %c0_15] : memref<48x512xf32, #tpu.memory_space<vmem>>, vector<48x512xf32>
    %c0_16 = arith.constant 0 : index
    %c0_17 = arith.constant 0 : index
    %53 = vector.load %arg4[%c0_16, %c0_17] : memref<48x8xf32, #tpu.memory_space<vmem>>, vector<48x8xf32>
    %54 = vector.extract_strided_slice %53 {offsets = [0, 0], sizes = [48, 1], strides = [1, 1]} : vector<48x8xf32> to vector<48x1xf32>
    %55 = vector.extract_strided_slice %53 {offsets = [0, 1], sizes = [48, 1], strides = [1, 1]} : vector<48x8xf32> to vector<48x1xf32>
    %56 = vector.extract_strided_slice %53 {offsets = [0, 2], sizes = [48, 1], strides = [1, 1]} : vector<48x8xf32> to vector<48x1xf32>
    %57 = vector.extract_strided_slice %53 {offsets = [0, 3], sizes = [48, 1], strides = [1, 1]} : vector<48x8xf32> to vector<48x1xf32>
    %58 = vector.extract_strided_slice %53 {offsets = [0, 4], sizes = [48, 1], strides = [1, 1]} : vector<48x8xf32> to vector<48x1xf32>
    %59 = vector.extract_strided_slice %53 {offsets = [0, 5], sizes = [48, 1], strides = [1, 1]} : vector<48x8xf32> to vector<48x1xf32>
    %60 = vector.extract_strided_slice %53 {offsets = [0, 6], sizes = [48, 1], strides = [1, 1]} : vector<48x8xf32> to vector<48x1xf32>
    %cst_18 = arith.constant dense<0.000000e+00> : vector<48x8xf32>
    %61 = tpu.matmul %52, %0, %cst_18 {dimension_numbers = #tpu.dot_dimension_numbers<[1], [0], [0], [1], [0, 0, 1, 1], [], []>} : vector<48x512xf32>, vector<512x8xf32>, vector<48x8xf32> -> vector<48x8xf32>
    %62 = arith.mulf %52, %52 : vector<48x512xf32>
    %cst_19 = arith.constant dense<0.000000e+00> : vector<48x8xf32>
    %63 = tpu.matmul %62, %0, %cst_19 {dimension_numbers = #tpu.dot_dimension_numbers<[1], [0], [0], [1], [0, 0, 1, 1], [], []>} : vector<48x512xf32>, vector<512x8xf32>, vector<48x8xf32> -> vector<48x8xf32>
    %64 = arith.mulf %61, %61 : vector<48x8xf32>
    %65 = arith.subf %63, %64 : vector<48x8xf32>
    %cst_20 = arith.constant 9.99999974E-6 : f32
    %66 = vector.broadcast %cst_20 : f32 to vector<48x8xf32>
    %67 = arith.addf %65, %66 : vector<48x8xf32>
    %68 = math.rsqrt %67 : vector<48x8xf32>
    %69 = arith.mulf %57, %59 : vector<48x1xf32>
    %70 = vector.broadcast %69 : vector<48x1xf32> to vector<48x8xf32>
    %71 = arith.mulf %70, %68 : vector<48x8xf32>
    %72 = arith.mulf %57, %60 : vector<48x1xf32>
    %73 = arith.addf %72, %58 : vector<48x1xf32>
    %74 = arith.mulf %71, %61 : vector<48x8xf32>
    %75 = vector.broadcast %73 : vector<48x1xf32> to vector<48x8xf32>
    %76 = arith.subf %75, %74 : vector<48x8xf32>
    %77 = vector.broadcast %55 : vector<48x1xf32> to vector<48x8xf32>
    %78 = arith.mulf %77, %61 : vector<48x8xf32>
    %79 = vector.broadcast %56 : vector<48x1xf32> to vector<48x8xf32>
    %80 = arith.addf %78, %79 : vector<48x8xf32>
    %cst_21 = arith.constant 1.000000e+00 : f32
    %81 = vector.broadcast %cst_21 : f32 to vector<48x1xf32>
    %82 = arith.subf %81, %54 : vector<48x1xf32>
    %83 = vector.broadcast %82 : vector<48x1xf32> to vector<48x8xf32>
    %84 = arith.mulf %83, %71 : vector<48x8xf32>
    %85 = vector.broadcast %54 : vector<48x1xf32> to vector<48x8xf32>
    %86 = arith.mulf %85, %80 : vector<48x8xf32>
    %cst_22 = arith.constant 1.000000e+00 : f32
    %87 = vector.broadcast %cst_22 : f32 to vector<48x1xf32>
    %88 = arith.subf %87, %54 : vector<48x1xf32>
    %89 = vector.broadcast %88 : vector<48x1xf32> to vector<48x8xf32>
    %90 = arith.mulf %89, %76 : vector<48x8xf32>
    %91 = arith.addf %86, %90 : vector<48x8xf32>
    %cst_23 = arith.constant dense<0.000000e+00> : vector<48x512xf32>
    %92 = tpu.matmul %84, %1, %cst_23 {dimension_numbers = #tpu.dot_dimension_numbers<[1], [0], [0], [1], [0, 0, 1, 1], [], []>} : vector<48x8xf32>, vector<8x512xf32>, vector<48x512xf32> -> vector<48x512xf32>
    %cst_24 = arith.constant dense<0.000000e+00> : vector<48x512xf32>
    %93 = tpu.matmul %91, %1, %cst_24 {dimension_numbers = #tpu.dot_dimension_numbers<[1], [0], [0], [1], [0, 0, 1, 1], [], []>} : vector<48x8xf32>, vector<8x512xf32>, vector<48x512xf32> -> vector<48x512xf32>
    %94 = arith.mulf %92, %52 : vector<48x512xf32>
    %95 = arith.addf %94, %93 : vector<48x512xf32>
    %96 = arith.negf %95 : vector<48x512xf32>
    %97 = math.exp %96 : vector<48x512xf32>
    %cst_25 = arith.constant 1.000000e+00 : f32
    %98 = vector.broadcast %cst_25 : f32 to vector<48x512xf32>
    %99 = arith.addf %98, %97 : vector<48x512xf32>
    %100 = arith.divf %98, %99 : vector<48x512xf32>
    %101 = arith.mulf %52, %100 : vector<48x512xf32>
    %c0_26 = arith.constant 0 : index
    %c0_27 = arith.constant 0 : index
    %102 = vector.load %arg5[%c0_26, %c0_27] : memref<48x48xf32, #tpu.memory_space<vmem>>, vector<48x48xf32>
    %cst_28 = arith.constant dense<0.000000e+00> : vector<48x512xf32>
    %103 = tpu.matmul %102, %51, %cst_28 {dimension_numbers = #tpu.dot_dimension_numbers<[1], [0], [0], [1], [0, 0, 1, 1], [], []>} : vector<48x48xf32>, vector<48x512xf32>, vector<48x512xf32> -> vector<48x512xf32>
    %c0_29 = arith.constant 0 : index
    %c0_30 = arith.constant 0 : index
    %104 = vector.load %arg6[%c0_29, %c0_30] : memref<48x48xf32, #tpu.memory_space<vmem>>, vector<48x48xf32>
    %cst_31 = arith.constant dense<0.000000e+00> : vector<48x512xf32>
    %105 = tpu.matmul %104, %101, %cst_31 {dimension_numbers = #tpu.dot_dimension_numbers<[1], [0], [0], [1], [0, 0, 1, 1], [], []>} : vector<48x48xf32>, vector<48x512xf32>, vector<48x512xf32> -> vector<48x512xf32>
    %106 = arith.addf %103, %105 : vector<48x512xf32>
    %c0_32 = arith.constant 0 : index
    %c0_33 = arith.constant 0 : index
    %107 = vector.load %arg7[%c0_32, %c0_33] : memref<48x1xf32, #tpu.memory_space<vmem>>, vector<48x1xf32>
    %108 = vector.broadcast %107 : vector<48x1xf32> to vector<48x512xf32>
    %109 = arith.addf %106, %108 : vector<48x512xf32>
    %c0_34 = arith.constant 0 : index
    %c0_35 = arith.constant 0 : index
    %110 = vector.load %arg10[%c0_34, %c0_35] : memref<48x512xf32, #tpu.memory_space<vmem>>, vector<48x512xf32>
    tpu.vector_store %arg10[%c0_34, %c0_35], %109 {strides = array<i32>} : memref<48x512xf32, #tpu.memory_space<vmem>>, vector<48x512xf32>,
    return
  }
  func.func @transform_0(%arg0: i32) -> (i32, i32) {
    %c0_i32 = arith.constant 0 : i32
    %c0_i32_0 = arith.constant 0 : i32
    %c0_i32_1 = arith.constant 0 : i32
    return %c0_i32, %c0_i32_0 : i32, i32
  }
  func.func @transform_1(%arg0: i32) -> (i32, i32) {
    %c0_i32 = arith.constant 0 : i32
    %c0_i32_0 = arith.constant 0 : i32
    %c0_i32_1 = arith.constant 0 : i32
    return %c0_i32, %c0_i32_0 : i32, i32
  }
  func.func @transform_2(%arg0: i32) -> (i32, i32) {
    %c0_i32 = arith.constant 0 : i32
    %c0_i32_0 = arith.constant 0 : i32
    %c0_i32_1 = arith.constant 0 : i32
    return %c0_i32, %c0_i32_0 : i32, i32
  }
  func.func @transform_3(%arg0: i32) -> (i32, i32) {
    %c0_i32 = arith.constant 0 : i32
    %c0_i32_0 = arith.constant 0 : i32
    %c0_i32_1 = arith.constant 0 : i32
    return %c0_i32, %c0_i32_0 : i32, i32
  }
  func.func @transform_4(%arg0: i32) -> (i32, i32) {
    %c0_i32 = arith.constant 0 : i32
    %c0_i32_0 = arith.constant 0 : i32
    return %arg0, %c0_i32 : i32, i32
  }
  func.func @transform_5(%arg0: i32) -> (i32, i32) {
    %c0_i32 = arith.constant 0 : i32
    %c0_i32_0 = arith.constant 0 : i32
    return %arg0, %c0_i32 : i32, i32
  }
  func.func @transform_6(%arg0: i32) -> (i32, i32) {
    %c0_i32 = arith.constant 0 : i32
    %c0_i32_0 = arith.constant 0 : i32
    return %arg0, %c0_i32 : i32, i32
  }
  func.func @transform_7(%arg0: i32) -> (i32, i32) {
    %c0_i32 = arith.constant 0 : i32
    %c0_i32_0 = arith.constant 0 : i32
    %c0_i32_1 = arith.constant 0 : i32
    return %c0_i32, %c0_i32_0 : i32, i32
  }
  func.func @transform_8(%arg0: i32) -> (i32, i32) {
    %c0_i32 = arith.constant 0 : i32
    %c0_i32_0 = arith.constant 0 : i32
    %c0_i32_1 = arith.constant 0 : i32
    return %c0_i32, %c0_i32_0 : i32, i32
  }
  func.func @transform_9(%arg0: i32) -> (i32, i32) {
    %c0_i32 = arith.constant 0 : i32
    %c0_i32_0 = arith.constant 0 : i32
    return %arg0, %c0_i32 : i32, i32
  }
}

</mosaic_0001>

<bundles_post_ra>
// kernel: shuffle_attention_block_pallas.1
= control target key start
LH: loop header
LB: loop body
LE: loop exit
PB: predicated region body
PF: predicated region fallthrough
CT: control target
= control target key end

     0   :  { %v6888_v3 = vmov 0   ;;  %s4646_s15 = smov 126   ;;  %s4647_s16 = smov 125   ;;  %vm858_vm0 = vcmask 64512   ;;  %vm2941_vm1 = vcmask 392192   ;;  %s6878_s2 = inlined_call_operand.vmem [shape: f32[48,8], index: 2, kind: input, shape index: {}]   ;;  %s6879_s7 = inlined_call_operand.vmem [shape: f32[512,8], index: 7, kind: input, shape index: {}]   ;;  %s6880_s0 = inlined_call_operand.vmem [shape: f32[48,512], index: 0, kind: input, shape index: {}]   ;;  %s6881_s3 = inlined_call_operand.vmem [shape: f32[48,8], index: 3, kind: input, shape index: {}]   ;;  %s6882_s8 = inlined_call_operand.vmem [shape: f32[8,512], index: 8, kind: input, shape index: {}]   ;;  %s6883_s1 = inlined_call_operand.vmem [shape: f32[48,512], index: 1, kind: input, shape index: {}]   ;;  %s6884_s6 = inlined_call_operand.vmem [shape: f32[48,1], index: 6, kind: input, shape index: {}]   ;;  %s6885_s5 = inlined_call_operand.vmem [shape: f32[48,48], index: 5, kind: input, shape index: {}]   ;;  %s6886_s4 = inlined_call_operand.vmem [shape: f32[48,48], index: 4, kind: input, shape index: {}]   ;;  %s6887_s9 = inlined_call_operand.vmem [shape: f32[48,512], index: 9, kind: output, shape index: {}]  }
   0x1   :  { %v4706_v0 = vld [vmem:[%s6878_s2 + $0x10] sm:$0xff]  ;;  %v4711_v1 = vld [vmem:[%s6878_s2] sm:$0xff]  ;;  %4326 = vset.pattern.permute.xlu1 %v6888_v3  ;;  %4327 = vset.pattern.permute.xlu0 %v6888_v3  ;;  %v49_v4 = vld [vmem:[%s6879_s7 + $0x88] sm:$0xff]  ;;  %s4648_s23 = smov 127  }
   0x2   :  { %v48_v2 = vld [vmem:[%s6879_s7 + $0x80] sm:$0xff]  ;;  %568 = vrot.lane.b32.xlu1 %v4706_v0, %s4646_s15  ;;  %564 = vrot.lane.b32.xlu0 %v4711_v1, %s4646_s15  ;;  %v81_v7 = vld [vmem:[%s6879_s7 + $0x188] sm:$0xff] }
   0x3   :  { %v80_v5 = vld [vmem:[%s6879_s7 + $0x180] sm:$0xff]  ;;  %v4728_v6 = vpack.c.bf16 %v49_v4, %v48_v2  ;;  %v33_v9 = vld [vmem:[%s6879_s7 + $0x8] sm:$0xff]  ;;  %v4752_v14 = vld [vmem:[%s6878_s2 + $0x18] sm:$0xff] }
   0x4   :  { %v32_v8 = vld [vmem:[%s6879_s7] sm:$0xff]  ;;  %v4739_v10 = vpack.c.bf16 %v81_v7, %v80_v5  ;;  %v65_v13 = vld [vmem:[%s6879_s7 + $0x108] sm:$0xff]  ;;  %v50_v17 = vld [vmem:[%s6879_s7 + $0x90] sm:$0xff] }
   0x5   :  { %v4741_v11 = vpack.c.bf16 %v33_v9, %v32_v8  ;;  %v64_v12 = vld [vmem:[%s6879_s7 + $0x100] sm:$0xff]  ;;  %3991 = vmatprep.subr.bf16.mxu0 %v4728_v6  ;;  %v4760_v16 = vld [vmem:[%s6878_s2 + $0x8] sm:$0xff]  ;;  %v51_v18 = vld [vmem:[%s6879_s7 + $0x98] sm:$0xff] }
   0x6   :  { %v4755_v15 = vpack.c.bf16 %v65_v13, %v64_v12  ;;  %4023 = vmatprep.subr.bf16.mxu1 %v4739_v10  ;;  %v4770_v19 = vpack.c.bf16 %v51_v18, %v50_v17  ;;  %v82_v20 = vld [vmem:[%s6879_s7 + $0x190] sm:$0xff]  ;;  %v83_v21 = vld [vmem:[%s6879_s7 + $0x198] sm:$0xff]  ;;  %570 = vrot.lane.b32.xlu1 %v4752_v14, %s4646_s15  ;;  %v4805_v29 = vld [vmem:[%s6878_s2 + $0x20] sm:$0xff] }
   0x7   :  { %3993 = vmatpush3.bf16.msra.mxu0 %v4741_v11  ;;  %v34_v22 = vld [vmem:[%s6879_s7 + $0x10] sm:$0xff]  ;;  %v4784_v23 = vpack.c.bf16 %v83_v21, %v82_v20  ;;  %v35_v24 = vld [vmem:[%s6879_s7 + $0x18] sm:$0xff]  ;;  %566 = vrot.lane.b32.xlu0 %v4760_v16, %s4646_s15  ;;  %v52_v30 = vld [vmem:[%s6879_s7 + $0xa0] sm:$0xff] }
   0x8   :  { %6977 = vst [vmem:[#allocation2_spill] sm:$0xff] %v4755_v15  ;;  %6978 = vst [vmem:[#allocation3_spill] sm:$0xff] %v4770_v19  ;;  %4025 = vmatpush3.bf16.msra.mxu1 %v4755_v15  ;;  %v66_v25 = vld [vmem:[%s6879_s7 + $0x110] sm:$0xff]  ;;  %v67_v26 = vld [vmem:[%s6879_s7 + $0x118] sm:$0xff]  ;;  %3995 = vmatprep.subr.bf16.mxu0 %v4770_v19  ;;  %v4798_v27 = vpack.c.bf16 %v35_v24, %v34_v22 }
   0x9   :  { %6979 = vst [vmem:[#allocation4_spill] sm:$0xff] %v4784_v23  ;;  %v4800_v28 = vpack.c.bf16 %v67_v26, %v66_v25  ;;  %v53_v31 = vld [vmem:[%s6879_s7 + $0xa8] sm:$0xff]  ;;  %4027 = vmatprep.subr.bf16.mxu1 %v4784_v23  ;;  %v84_v33 = vld [vmem:[%s6879_s7 + $0x1a0] sm:$0xff]  ;;  %v54_v42 = vld [vmem:[%s6879_s7 + $0xb0] sm:$0xff] }
   0xa   :  { %6980 = vst [vmem:[#allocation5_spill] sm:$0xff] %v4798_v27  ;;  %v4814_v32 = vpack.c.bf16 %v53_v31, %v52_v30  ;;  %v85_v34 = vld [vmem:[%s6879_s7 + $0x1a8] sm:$0xff]  ;;  %v36_v37 = vld [vmem:[%s6879_s7 + $0x20] sm:$0xff]  ;;  %v55_v43 = vld [vmem:[%s6879_s7 + $0xb8] sm:$0xff] }
   0xb   :  { %6981 = vst [vmem:[#allocation6_spill] sm:$0xff] %v4800_v28  ;;  %v4825_v35 = vld [vmem:[%s6878_s2 + $0x28] sm:$0xff]  ;;  %3997 = vmatpush3.bf16.msra.mxu0 %v4798_v27  ;;  %v4828_v36 = vpack.c.bf16 %v85_v34, %v84_v33  ;;  %v68_v39 = vld [vmem:[%s6879_s7 + $0x120] sm:$0xff]  ;;  %572 = vrot.lane.b32.xlu0 %v4805_v29, %s4646_s15  ;;  %v4857_v45 = vpack.c.bf16 %v55_v43, %v54_v42  ;;  %v86_v46 = vld [vmem:[%s6879_s7 + $0x1b0] sm:$0xff] }
   0xc   :  { %6982 = vst [vmem:[#allocation7_spill] sm:$0xff] %v4814_v32  ;;  %v37_v38 = vld [vmem:[%s6879_s7 + $0x28] sm:$0xff]  ;;  %4029 = vmatpush3.bf16.msra.mxu1 %v4800_v28  ;;  %3999 = vmatprep.subr.bf16.mxu0 %v4814_v32  ;;  %v87_v47 = vld [vmem:[%s6879_s7 + $0x1b8] sm:$0xff]  ;;  %v38_v48 = vld [vmem:[%s6879_s7 + $0x30] sm:$0xff] }
   0xd   :  { %6983 = vst [vmem:[#allocation8_spill] sm:$0xff] %v4828_v36  ;;  %v4841_v40 = vpack.c.bf16 %v37_v38, %v36_v37  ;;  %v69_v41 = vld [vmem:[%s6879_s7 + $0x128] sm:$0xff]  ;;  %4031 = vmatprep.subr.bf16.mxu1 %v4828_v36  ;;  %6986 = vst [vmem:[#allocation11_spill] sm:$0xff] %v4857_v45  ;;  %574 = vrot.lane.b32.xlu1 %v4825_v35, %s4646_s15  ;;  %v4870_v49 = vpack.c.bf16 %v87_v47, %v86_v46  ;;  %v39_v50 = vld [vmem:[%s6879_s7 + $0x38] sm:$0xff] }
   0xe   :  { %v4855_v44 = vpack.c.bf16 %v69_v41, %v68_v39  ;;  %v70_v51 = vld [vmem:[%s6879_s7 + $0x130] sm:$0xff]  ;;  %v71_v52 = vld [vmem:[%s6879_s7 + $0x138] sm:$0xff]  ;;  %v4882_v53 = vpack.c.bf16 %v39_v50, %v38_v48  ;;  %v56_v54 = vld [vmem:[%s6879_s7 + $0xc0] sm:$0xff] }
   0xf   :  { %6984 = vst [vmem:[#allocation9_spill] sm:$0xff] %v4841_v40  ;;  %6987 = vst [vmem:[#allocation12_spill] sm:$0xff] %v4870_v49  ;;  %4001 = vmatpush3.bf16.msra.mxu0 %v4841_v40  ;;  %v57_v55 = vld [vmem:[%s6879_s7 + $0xc8] sm:$0xff]  ;;  %v88_v56 = vld [vmem:[%s6879_s7 + $0x1c0] sm:$0xff]  ;;  %v4895_v57 = vpack.c.bf16 %v71_v52, %v70_v51  ;;  %624 = vrot.lane.b32.xlu0 %v4711_v1, %s4647_s16 }
  0x10   :  { %6985 = vst [vmem:[#allocation10_spill] sm:$0xff] %v4855_v44  ;;  %6988 = vst [vmem:[#allocation13_spill] sm:$0xff] %v4882_v53  ;;  %4033 = vmatpush3.bf16.msra.mxu1 %v4855_v44  ;;  %4003 = vmatprep.subr.bf16.mxu0 %v4857_v45  ;;  %v4897_v58 = vpack.c.bf16 %v57_v55, %v56_v54  ;;  %v89_v59 = vld [vmem:[%s6879_s7 + $0x1c8] sm:$0xff]  ;;  %v40_v60 = vld [vmem:[%s6879_s7 + $0x40] sm:$0xff] }
  0x11   :  { %6989 = vst [vmem:[#allocation14_spill] sm:$0xff] %v4895_v57  ;;  %v41_v61 = vld [vmem:[%s6879_s7 + $0x48] sm:$0xff]  ;;  %4035 = vmatprep.subr.bf16.mxu1 %v4870_v49  ;;  %v4911_v62 = vpack.c.bf16 %v89_v59, %v88_v56  ;;  %v72_v63 = vld [vmem:[%s6879_s7 + $0x140] sm:$0xff]  ;;  %v58_v4 = vld [vmem:[%s6879_s7 + $0xd0] sm:$0xff]  ;;  %648 = vrot.lane.b32.xlu1 %v4711_v1, %s4648_s23 }
  0x12   :  { %6990 = vst [vmem:[#allocation15_spill] sm:$0xff] %v4897_v58  ;;  %v73_v2 = vld [vmem:[%s6879_s7 + $0x148] sm:$0xff]  ;;  %v59_v5 = vld [vmem:[%s6879_s7 + $0xd8] sm:$0xff]  ;;  %v90_v7 = vld [vmem:[%s6879_s7 + $0x1d0] sm:$0xff]  ;;  %v4934_v9 = vpack.c.bf16 %v41_v61, %v40_v60 }
  0x13   :  { %6991 = vst [vmem:[#allocation16_spill] sm:$0xff] %v4911_v62  ;;  %v91_v8 = vld [vmem:[%s6879_s7 + $0x1d8] sm:$0xff]  ;;  %4005 = vmatpush3.bf16.msra.mxu0 %v4882_v53  ;;  %v4938_v12 = vpack.c.bf16 %v73_v2, %v72_v63  ;;  %v4940_v13 = vpack.c.bf16 %v59_v5, %v58_v4  ;;  %v42_v17 = vld [vmem:[%s6879_s7 + $0x50] sm:$0xff]  ;;  %626 = vrot.lane.b32.xlu0 %v4760_v16, %s4647_s16  ;;  %v60_v24 = vld [vmem:[%s6879_s7 + $0xe0] sm:$0xff] }
  0x14   :  { %6992 = vst [vmem:[#allocation17_spill] sm:$0xff] %v4934_v9  ;;  %4037 = vmatpush3.bf16.msra.mxu1 %v4895_v57  ;;  %4007 = vmatprep.subr.bf16.mxu0 %v4897_v58  ;;  %v43_v18 = vld [vmem:[%s6879_s7 + $0x58] sm:$0xff]  ;;  %v74_v20 = vld [vmem:[%s6879_s7 + $0x150] sm:$0xff]  ;;  %v4954_v21 = vpack.c.bf16 %v91_v8, %v90_v7  ;;  %v61_v25 = vld [vmem:[%s6879_s7 + $0xe8] sm:$0xff] }
  0x15   :  { %6993 = vst [vmem:[#allocation18_spill] sm:$0xff] %v4938_v12  ;;  %6994 = vst [vmem:[#allocation19_spill] sm:$0xff] %v4940_v13  ;;  %4039 = vmatprep.subr.bf16.mxu1 %v4911_v62  ;;  %v75_v22 = vld [vmem:[%s6879_s7 + $0x158] sm:$0xff]  ;;  %650 = vrot.lane.b32.xlu1 %v4760_v16, %s4648_s23  ;;  %v92_v26 = vld [vmem:[%s6879_s7 + $0x1e0] sm:$0xff]  ;;  %v4974_v31 = vpack.c.bf16 %v43_v18, %v42_v17  ;;  %v4983_v37 = vpack.c.bf16 %v61_v25, %v60_v24 }
  0x16   :  { %6995 = vst [vmem:[#allocation20_spill] sm:$0xff] %v4954_v21  ;;  %v93_v30 = vld [vmem:[%s6879_s7 + $0x1e8] sm:$0xff]  ;;  %v44_v33 = vld [vmem:[%s6879_s7 + $0x60] sm:$0xff]  ;;  %v4981_v34 = vpack.c.bf16 %v75_v22, %v74_v20  ;;  %v62_v43 = vld [vmem:[%s6879_s7 + $0xf0] sm:$0xff] }
  0x17   :  { %4009 = vmatpush3.bf16.msra.mxu0 %v4934_v9  ;;  %6996 = vst [vmem:[#allocation21_spill] sm:$0xff] %v4974_v31  ;;  %6998 = vst [vmem:[#allocation23_spill] sm:$0xff] %v4983_v37  ;;  %v45_v38 = vld [vmem:[%s6879_s7 + $0x68] sm:$0xff]  ;;  %v76_v39 = vld [vmem:[%s6879_s7 + $0x160] sm:$0xff]  ;;  %628 = vrot.lane.b32.xlu0 %v4706_v0, %s4647_s16  ;;  %v4997_v42 = vpack.c.bf16 %v93_v30, %v92_v26 }
  0x18   :  { %4041 = vmatpush3.bf16.msra.mxu1 %v4938_v12  ;;  %4011 = vmatprep.subr.bf16.mxu0 %v4940_v13  ;;  %6997 = vst [vmem:[#allocation22_spill] sm:$0xff] %v4981_v34  ;;  %v77_v41 = vld [vmem:[%s6879_s7 + $0x168] sm:$0xff]  ;;  %v63_v46 = vld [vmem:[%s6879_s7 + $0xf8] sm:$0xff]  ;;  %v94_v48 = vld [vmem:[%s6879_s7 + $0x1f0] sm:$0xff]  ;;  %v5025_v52 = vpack.c.bf16 %v45_v38, %v44_v33 }
  0x19   :  { %4043 = vmatprep.subr.bf16.mxu1 %v4954_v21  ;;  %6999 = vst [vmem:[#allocation24_spill] sm:$0xff] %v4997_v42  ;;  %v5008_v47 = vld [vmem:[%s6880_s0 + $0x8] sm:$0xff]  ;;  %652 = vrot.lane.b32.xlu1 %v4706_v0, %s4648_s23  ;;  %v95_v50 = vld [vmem:[%s6879_s7 + $0x1f8] sm:$0xff]  ;;  %v5030_v54 = vpack.c.bf16 %v77_v41, %v76_v39  ;;  %v5032_v55 = vpack.c.bf16 %v63_v46, %v62_v43  ;;  %v46_v56 = vld [vmem:[%s6879_s7 + $0x70] sm:$0xff] }
  0x1a   :  { %194 = vmatprep.mubr.f32.mxu0 %v5008_v47  ;;  %v5022_v51 = vld [vmem:[%s6880_s0 + $0x18] sm:$0xff]  ;;  %7000 = vst [vmem:[#allocation25_spill] sm:$0xff] %v5025_v52  ;;  %v5043_v60 = vpack.c.bf16 %v95_v50, %v94_v48  ;;  %v78_v61 = vld [vmem:[%s6879_s7 + $0x170] sm:$0xff]  ;;  %v5069_v5 = vld [vmem:[%s6880_s0] sm:$0xff] }
  0x1b   :  { %4013 = vmatpush3.bf16.msra.mxu0 %v4974_v31  ;;  %289 = vmatprep.mubr.f32.mxu1 %v5022_v51  ;;  %7001 = vst [vmem:[#allocation26_spill] sm:$0xff] %v5030_v54  ;;  %7002 = vst [vmem:[#allocation27_spill] sm:$0xff] %v5032_v55  ;;  %v47_v59 = vld [vmem:[%s6879_s7 + $0x78] sm:$0xff]  ;;  %v5076_v7 = vld [vmem:[%s6880_s0 + $0x10] sm:$0xff]  ;;  %v323_v3 = vmul.f32 %v5022_v51, %v5022_v51  ;;  %v778_v51 = vsub.f32 1.0, %v4805_v29 }
  0x1c   :  { %4045 = vmatpush3.bf16.msra.mxu1 %v4981_v34  ;;  %4015 = vmatprep.subr.bf16.mxu0 %v4983_v37  ;;  %7003 = vst [vmem:[#allocation28_spill] sm:$0xff] %v5043_v60  ;;  %v79_v63 = vld [vmem:[%s6879_s7 + $0x178] sm:$0xff]  ;;  %v5054_v2 = vpack.c.bf16 %v47_v59, %v46_v56  ;;  %v5087_v8 = vld [vmem:[%s6880_s0 + $0x28] sm:$0xff]  ;;  %v5099_v18 = vld [vmem:[%s6880_s0 + $0x20] sm:$0xff] }
  0x1d   :  { %630 = vrot.lane.b32.xlu0 %v4752_v14, %s4647_s16  ;;  %4047 = vmatprep.subr.bf16.mxu1 %v4997_v42  ;;  %v5058_v4 = vpack.c.bf16 %v79_v63, %v78_v61  ;;  %v5094_v17 = vld [vmem:[%s6880_s0 + $0x38] sm:$0xff]  ;;  %v5106_v20 = vld [vmem:[%s6880_s0 + $0x30] sm:$0xff]  ;;  %v5115_v22 = vld [vmem:[%s6880_s0 + $0x48] sm:$0xff]  ;;  %v321_v63 = vmul.f32 %v5008_v47, %v5008_v47  ;;  %v776_v47 = vsub.f32 1.0, %v4706_v0 }
  0x1e   :  { %654 = vrot.lane.b32.xlu1 %v4752_v14, %s4648_s23  ;;  %7004 = vst [vmem:[#allocation29_spill] sm:$0xff] %v5054_v2  ;;  %v5122_v24 = vld [vmem:[%s6880_s0 + $0x58] sm:$0xff]  ;;  %v5127_v25 = vld [vmem:[%s6880_s0 + $0x40] sm:$0xff]  ;;  %v5134_v26 = vld [vmem:[%s6880_s0 + $0x50] sm:$0xff] }
  0x1f   :  { %4017 = vmatpush3.bf16.msra.mxu0 %v5025_v52  ;;  %7005 = vst [vmem:[#allocation30_spill] sm:$0xff] %v5058_v4  ;;  %v5143_v30 = vld [vmem:[%s6880_s0 + $0x68] sm:$0xff]  ;;  %v5150_v33 = vld [vmem:[%s6880_s0 + $0x78] sm:$0xff]  ;;  %v5155_v38 = vld [vmem:[%s6880_s0 + $0x60] sm:$0xff] }
  0x20   :  { %4049 = vmatpush3.bf16.msra.mxu1 %v5030_v54  ;;  %4019 = vmatprep.subr.bf16.mxu0 %v5032_v55  ;;  %v5162_v39 = vld [vmem:[%s6880_s0 + $0x70] sm:$0xff]  ;;  %v5171_v41 = vld [vmem:[%s6880_s0 + $0x88] sm:$0xff]  ;;  %v5178_v43 = vld [vmem:[%s6880_s0 + $0x98] sm:$0xff] }
  0x21   :  { %632 = vrot.lane.b32.xlu0 %v4805_v29, %s4647_s16  ;;  %4051 = vmatprep.subr.bf16.mxu1 %v5043_v60  ;;  %v5183_v46 = vld [vmem:[%s6880_s0 + $0x80] sm:$0xff]  ;;  %v5190_v48 = vld [vmem:[%s6880_s0 + $0x90] sm:$0xff]  ;;  %v5199_v50 = vld [vmem:[%s6880_s0 + $0xa8] sm:$0xff] }
  0x22   :  { %656 = vrot.lane.b32.xlu1 %v4805_v29, %s4648_s23  ;;  %v5206_v56 = vld [vmem:[%s6880_s0 + $0xb8] sm:$0xff]  ;;  %v5211_v59 = vld [vmem:[%s6880_s0 + $0xa0] sm:$0xff]  ;;  %v5218_v61 = vld [vmem:[%s6880_s0 + $0xb0] sm:$0xff] }
  0x23   :  { %4021 = vmatpush3.bf16.msra.mxu0 %v5054_v2 }
  0x24   :  { %4053 = vmatpush3.bf16.msra.mxu1 %v5058_v4  ;;  %4055 = vmatprep.subr.bf16.mxu0 %v4728_v6 }
  0x25   :  { %634 = vrot.lane.b32.xlu0 %v4825_v35, %s4647_s16  ;;  %4087 = vmatprep.subr.bf16.mxu1 %v4739_v10 }
  0x26   :  { %658 = vrot.lane.b32.xlu1 %v4825_v35, %s4648_s23  ;;  %195 = vmatmul.mubr.f32.vlgmr.msra.gmra.mrb[0].mxu0 %v5069_v5 }
  0x27   :  { %290 = vmatmul.mubr.f32.vlgmr.msra.gmra.mrb[0].mxu1 %v5076_v7  ;;  %4057 = vmatpush3.bf16.msra.mxu0 %v4741_v11 }
  0x28   :  { %4089 = vmatpush3.bf16.msra.mxu1 %v4755_v15  ;;  %4059 = vmatprep.subr.bf16.mxu0 %v4770_v19 }
  0x29   :  { %4091 = vmatprep.subr.bf16.mxu1 %v4784_v23  ;;  %199 = vmatprep.mubr.f32.mxu0 %v5087_v8 }
  0x2a   :  { %294 = vmatprep.mubr.f32.mxu1 %v5094_v17  ;;  %200 = vmatmul.mubr.f32.gmra.mrb[2].mxu0 %v5099_v18 }
  0x2b   :  { %4061 = vmatpush3.bf16.msra.mxu0 %v4798_v27  ;;  %295 = vmatmul.mubr.f32.gmra.mrb[2].mxu1 %v5106_v20 }
  0x2c   :  { %4093 = vmatpush3.bf16.msra.mxu1 %v4800_v28  ;;  %4063 = vmatprep.subr.bf16.mxu0 %v4814_v32 }
  0x2d   :  { %4095 = vmatprep.subr.bf16.mxu1 %v4828_v36  ;;  %204 = vmatprep.mubr.f32.mxu0 %v5115_v22 }
  0x2e   :  { %299 = vmatprep.mubr.f32.mxu1 %v5122_v24  ;;  %205 = vmatmul.mubr.f32.gmra.mrb[4].mxu0 %v5127_v25 }
  0x2f   :  { %4065 = vmatpush3.bf16.msra.mxu0 %v4841_v40  ;;  %300 = vmatmul.mubr.f32.gmra.mrb[4].mxu1 %v5134_v26 }
  0x30   :  { %4097 = vmatpush3.bf16.msra.mxu1 %v4855_v44  ;;  %4067 = vmatprep.subr.bf16.mxu0 %v4857_v45 }
  0x31   :  { %4099 = vmatprep.subr.bf16.mxu1 %v4870_v49  ;;  %209 = vmatprep.mubr.f32.mxu0 %v5143_v30 }
  0x32   :  { %304 = vmatprep.mubr.f32.mxu1 %v5150_v33  ;;  %210 = vmatmul.mubr.f32.gmra.mrb[6].mxu0 %v5155_v38 }
  0x33   :  { %4069 = vmatpush3.bf16.msra.mxu0 %v4882_v53  ;;  %305 = vmatmul.mubr.f32.gmra.mrb[6].mxu1 %v5162_v39 }
  0x34   :  { %4101 = vmatpush3.bf16.msra.mxu1 %v4895_v57  ;;  %4071 = vmatprep.subr.bf16.mxu0 %v4897_v58 }
  0x35   :  { %4103 = vmatprep.subr.bf16.mxu1 %v4911_v62  ;;  %214 = vmatprep.mubr.f32.mxu0 %v5171_v41 }
  0x36   :  { %309 = vmatprep.mubr.f32.mxu1 %v5178_v43  ;;  %215 = vmatmul.mubr.f32.gmra.mrb[8].mxu0 %v5183_v46 }
  0x37   :  { %4073 = vmatpush3.bf16.msra.mxu0 %v4934_v9  ;;  %310 = vmatmul.mubr.f32.gmra.mrb[8].mxu1 %v5190_v48 }
  0x38   :  { %4105 = vmatpush3.bf16.msra.mxu1 %v4938_v12  ;;  %4075 = vmatprep.subr.bf16.mxu0 %v4940_v13  ;;  %v774_v13 = vsub.f32 1.0, %v4711_v1 }
  0x39   :  { %4107 = vmatprep.subr.bf16.mxu1 %v4954_v21  ;;  %219 = vmatprep.mubr.f32.mxu0 %v5199_v50  ;;  %v775_v21 = vsub.f32 1.0, %v4760_v16 }
  0x3a   :  { %314 = vmatprep.mubr.f32.mxu1 %v5206_v56  ;;  %220 = vmatmul.mubr.f32.gmra.mrb[10].mxu0 %v5211_v59 }
  0x3b   :  { %4077 = vmatpush3.bf16.msra.mxu0 %v4974_v31  ;;  %315 = vmatmul.mubr.f32.gmra.mrb[10].mxu1 %v5218_v61 }
  0x3c   :  { %4109 = vmatpush3.bf16.msra.mxu1 %v4981_v34  ;;  %4079 = vmatprep.subr.bf16.mxu0 %v4983_v37  ;;  %v320_v37 = vmul.f32 %v5069_v5, %v5069_v5  ;;  %v324_v5 = vmul.f32 %v5099_v18, %v5099_v18  ;;  %v330_v18 = vmul.f32 %v5134_v26, %v5134_v26 }
  0x3d   :  { %4111 = vmatprep.subr.bf16.mxu1 %v4997_v42  ;;  %408 = vmatprep.mubr.f32.mxu0 %v321_v63  ;;  %v327_v63 = vmul.f32 %v5094_v17, %v5094_v17  ;;  %v6902_v17 = vmov 1   ;;  %v334_v26 = vmul.f32 %v5162_v39, %v5162_v39  ;;  %v338_v39 = vmul.f32 %v5190_v48, %v5190_v48 }
  0x3e   :  { %503 = vmatprep.mubr.f32.mxu1 %v323_v3  ;;  %782 = vperm.xlu1 %4326, %v774_v13   ;;  %v777_v3 = vsub.f32 1.0, %v4752_v14  ;;  %v322_v13 = vmul.f32 %v5076_v7, %v5076_v7  ;;  %v326_v7 = vmul.f32 %v5106_v20, %v5106_v20  ;;  %v333_v20 = vmul.f32 %v5143_v30, %v5143_v30 }
  0x3f   :  { %4081 = vmatpush3.bf16.msra.mxu0 %v5025_v52  ;;  %787 = vperm.xlu0 %4327, %v775_v21   ;;  %v325_v21 = vmul.f32 %v5087_v8, %v5087_v8  ;;  %v331_v8 = vmul.f32 %v5122_v24, %v5122_v24  ;;  %v6912_v24 = vmov 2   ;;  %v337_v30 = vmul.f32 %v5171_v41, %v5171_v41 }
  0x40   :  { %4113 = vmatpush3.bf16.msra.mxu1 %v5030_v54  ;;  %4083 = vmatprep.subr.bf16.mxu0 %v5032_v55  ;;  %v341_v41 = vmul.f32 %v5199_v50, %v5199_v50 }
  0x41   :  { %4115 = vmatprep.subr.bf16.mxu1 %v5043_v60 }
  0x42   :  { %792 = vperm.xlu1 %4326, %v776_v47   ;;  %v329_v47 = vmul.f32 %v5115_v22, %v5115_v22  ;;  %v335_v22 = vmul.f32 %v5150_v33, %v5150_v33  ;;  %v339_v33 = vmul.f32 %v5178_v43, %v5178_v43  ;;  %v343_v43 = vmul.f32 %v5206_v56, %v5206_v56 }
  0x43   :  { %4085 = vmatpush3.bf16.msra.mxu0 %v5054_v2  ;;  %802 = vperm.xlu0 %4327, %v778_v51   ;;  %v779_v51 = vsub.f32 1.0, %v4825_v35 }
  0x44   :  { %4117 = vmatpush3.bf16.msra.mxu1 %v5058_v4  ;;  %v7009_v4 = vmov 1  }
  0x46   :  { %409 = vmatmul.mubr.f32.vlgmr.msra.gmra.mrb[12].mxu0 %v320_v37  ;;  %797 = vperm.xlu1 %4326, %v777_v3   ;;  %v328_v37 = vmul.f32 %v5127_v25, %v5127_v25  ;;  %v332_v25 = vmul.f32 %v5155_v38, %v5155_v38  ;;  %v336_v38 = vmul.f32 %v5183_v46, %v5183_v46  ;;  %v6898_v3 = vmov 3  }
  0x47   :  { %504 = vmatmul.mubr.f32.vlgmr.msra.gmra.mrb[12].mxu1 %v322_v13  ;;  %413 = vmatprep.mubr.f32.mxu0 %v325_v21  ;;  %v7006_v13 = vmov 0   ;;  %v340_v46 = vmul.f32 %v5211_v59, %v5211_v59  ;;  %v342_v21 = vmul.f32 %v5218_v61, %v5218_v61 }
  0x48   :  { %508 = vmatprep.mubr.f32.mxu1 %v327_v63  ;;  %817 = vperm.xlu0 %4327, %v4711_v1  }
  0x4a   :  { %414 = vmatmul.mubr.f32.gmra.mrb[14].mxu0 %v324_v5  ;;  %4328 = vset.pattern.permute.xlu1 %v6902_v17 }
  0x4b   :  { %509 = vmatmul.mubr.f32.gmra.mrb[14].mxu1 %v326_v7  ;;  %418 = vmatprep.mubr.f32.mxu0 %v329_v47 }
  0x4c   :  { %513 = vmatprep.mubr.f32.mxu1 %v331_v8  ;;  %715 = vperm.xlu1 %4328, %v4711_v1  }
  0x4d   :  { %4332 = vset.pattern.permute.xlu0 %v6912_v24 }
  0x4e   :  { %419 = vmatmul.mubr.f32.gmra.mrb[16].mxu0 %v328_v37  ;;  %749 = vperm.xlu0 %4332, %v4760_v16  }
  0x4f   :  { %514 = vmatmul.mubr.f32.gmra.mrb[16].mxu1 %v330_v18  ;;  %423 = vmatprep.mubr.f32.mxu0 %v333_v20 }
  0x50   :  { %518 = vmatprep.mubr.f32.mxu1 %v335_v22  ;;  %4329 = vset.pattern.permute.xlu1 %v6912_v24 }
  0x51   :  { %745 = vperm.xlu1 %4329, %v4711_v1  }
  0x52   :  { %424 = vmatmul.mubr.f32.gmra.mrb[18].mxu0 %v332_v25  ;;  %4336 = vset.pattern.permute.xlu0 %v6898_v3 }
  0x53   :  { %519 = vmatmul.mubr.f32.gmra.mrb[18].mxu1 %v334_v26  ;;  %428 = vmatprep.mubr.f32.mxu0 %v337_v30 }
  0x54   :  { %523 = vmatprep.mubr.f32.mxu1 %v339_v33 }
  0x55   :  { %4330 = vset.pattern.permute.xlu1 %v7006_v13 }
  0x56   :  { %429 = vmatmul.mubr.f32.gmra.mrb[20].mxu0 %v336_v38  ;;  %807 = vperm.xlu1 %4330, %v779_v51  }
  0x57   :  { %524 = vmatmul.mubr.f32.gmra.mrb[20].mxu1 %v338_v39  ;;  %433 = vmatprep.mubr.f32.mxu0 %v341_v41 }
  0x58   :  { %528 = vmatprep.mubr.f32.mxu1 %v343_v43 }
  0x5a   :  { %434 = vmatmul.mubr.f32.gmra.mrb[22].mxu0 %v340_v46  ;;  %4331 = vset.pattern.permute.xlu1 %v6902_v17 }
  0x5b   :  { %529 = vmatmul.mubr.f32.gmra.mrb[22].mxu1 %v342_v21  ;;  %719 = vperm.xlu1 %4331, %v4760_v16  }
  0x5f   :  { %723 = vperm.xlu1 %4331, %v4706_v0  }
  0x63   :  { %4333 = vset.pattern.permute.xlu1 %v7006_v13 }
  0x64   :  { %821 = vperm.xlu1 %4333, %v4760_v16  }
  0x68   :  { %4334 = vset.pattern.permute.xlu1 %v6912_v24 }
  0x69   :  { %753 = vperm.xlu1 %4334, %v4706_v0  }
  0x6d   :  { %4335 = vset.pattern.permute.xlu1 %v6902_v17 }
  0x6e   :  { %727 = vperm.xlu1 %4335, %v4752_v14  }
  0x72   :  { %4337 = vset.pattern.permute.xlu1 %v6898_v3 }
  0x74   :  { %v569_v48 = vpop.permute.xlu1 %568  ;;  %v565_v50 = vpop.permute.xlu0 %564 }
  0x75   :  { %v582_v56 = vmul.f32 %v565_v50, %v4711_v1  ;;  %v584_v7 = vmul.f32 %v569_v48, %v4706_v0 }
  0x77   :  { %590 = vperm.xlu0 %4336, %v582_v56  }
  0x78   :  { %v571_v59 = vpop.permute.xlu1 %570 }
  0x79   :  { %v585_v61 = vmul.f32 %v571_v59, %v4752_v14  ;;  %v567_v63 = vpop.permute.xlu0 %566 }
  0x7a   :  { %v583_v5 = vmul.f32 %v567_v63, %v4760_v16 }
  0x7b   :  { %605 = vperm.xlu0 %4336, %v585_v61  }
  0x7c   :  { %595 = vperm.xlu1 %4337, %v583_v5   ;;  %v5346_v5 = vld [vmem:[%s6881_s3 + $0x10] sm:$0xff] }
  0x7d   :  { %v573_v47 = vpop.permute.xlu0 %572 }
  0x7e   :  { %v586_v26 = vmul.f32 %v573_v47, %v4805_v29 }
  0x7f   :  { %v575_v8 = vpop.permute.xlu1 %574  ;;  %4338 = vset.pattern.permute.xlu0 %v7006_v13 }
  0x80   :  { %600 = vperm.xlu1 %4337, %v584_v7   ;;  %825 = vperm.xlu0 %4338, %v4706_v0   ;;  %v587_v38 = vmul.f32 %v575_v8, %v4825_v35  ;;  %v5356_v8 = vld [vmem:[%s6881_s3 + $0x20] sm:$0xff] }
  0x81   :  { %v625_v37 = vpop.permute.xlu0 %624 }
  0x82   :  { %v642_v18 = vmul.f32 %v625_v37, %v4711_v1  ;;  %v5374_v37 = vld [vmem:[%s6882_s8 + $0x8] sm:$0xff] }
  0x83   :  { %v649_v20 = vpop.permute.xlu1 %648  ;;  %7007 = vst [vmem:[#allocation31_spill] sm:$0xff] %v5374_v37  ;;  %877 = vmatprep.subr.mxu0 %v5374_v37 }
  0x84   :  { %v666_v22 = vadd.f32 %v649_v20, %v642_v18  ;;  %4339 = vset.pattern.permute.xlu1 %v6912_v24  ;;  %4341 = vset.pattern.permute.xlu0 %v6898_v3  ;;  %v5379_v18 = vld [vmem:[%s6882_s8 + $0x18] sm:$0xff]  ;;  %v5386_v20 = vld [vmem:[%s6882_s8] sm:$0xff] }
  0x85   :  { %v627_v25 = vpop.permute.xlu0 %626  ;;  %757 = vperm.xlu1 %4339, %v4752_v14   ;;  %7008 = vst [vmem:[#allocation32_spill] sm:$0xff] %v5379_v18  ;;  %978 = vmatprep.subr.mxu1 %v5379_v18 }
  0x86   :  { %680 = vperm.xlu0 %4341, %v666_v22   ;;  %v643_v46 = vmul.f32 %v627_v25, %v4760_v16  ;;  %v5336_v16 = vld [vmem:[%s6881_s3] sm:$0xff]  ;;  %v5391_v22 = vld [vmem:[%s6882_s8 + $0x10] sm:$0xff]  ;;  %878 = vmatpush1.msra.mxu0 %v5386_v20  ;;  %v6896_v25 = vmov 0.0  }
  0x87   :  { %v651_v30 = vpop.permute.xlu1 %650  ;;  %979 = vmatpush1.msra.mxu1 %v5391_v22  ;;  %941 = vmatprep.mubr.f32.mxu0 %v6896_v25 }
  0x88   :  { %1042 = vmatprep.mubr.f32.mxu1 %v6896_v25  ;;  %1097 = vmatprep.subr.mxu0 %v5374_v37 }
  0x89   :  { %v629_v33 = vpop.permute.xlu0 %628  ;;  %4340 = vset.pattern.permute.xlu1 %v6898_v3  ;;  %1198 = vmatprep.subr.mxu1 %v5379_v18 }
  0x8a   :  { %v644_v1 = vmul.f32 %v629_v33, %v4706_v0  ;;  %4342 = vset.pattern.permute.xlu0 %v6902_v17  ;;  %610 = vperm.xlu1 %4340, %v586_v26   ;;  %v667_v0 = vadd.f32 %v651_v30, %v643_v46  ;;  %v5406_v26 = vld [vmem:[%s6881_s3 + $0x18] sm:$0xff] }
  0x8b   :  { %v653_v51 = vpop.permute.xlu1 %652  ;;  %731 = vperm.xlu0 %4342, %v4805_v29  }
  0x8c   :  { %v668_v39 = vadd.f32 %v653_v51, %v644_v1 }
  0x8e   :  { %615 = vperm.xlu1 %4340, %v587_v38  }
  0x8f   :  { %v631_v41 = vpop.permute.xlu0 %630  ;;  %4345 = vset.pattern.permute.xlu0 %v6898_v3 }
  0x90   :  { %v655_v43 = vpop.permute.xlu1 %654  ;;  %690 = vperm.xlu0 %4345, %v668_v39   ;;  %v645_v63 = vmul.f32 %v631_v41, %v4752_v14  ;;  %v2189_v41 = vsub.f32 1.0, %v5336_v16 }
  0x92   :  { %4343 = vset.pattern.permute.xlu1 %v7006_v13  ;;  %v669_v7 = vadd.f32 %v655_v43, %v645_v63 }
  0x93   :  { %v633_v21 = vpop.permute.xlu0 %632  ;;  %829 = vperm.xlu1 %4343, %v4752_v14  }
  0x94   :  { %v657_v48 = vpop.permute.xlu1 %656  ;;  %4346 = vset.pattern.permute.xlu0 %v6912_v24  ;;  %v646_v47 = vmul.f32 %v633_v21, %v4805_v29 }
  0x95   :  { %761 = vperm.xlu0 %4346, %v4805_v29  }
  0x96   :  { %v670_v14 = vadd.f32 %v657_v48, %v646_v47  ;;  %v2191_v48 = vsub.f32 1.0, %v5346_v5 }
  0x97   :  { %v635_v50 = vpop.permute.xlu0 %634  ;;  %4344 = vset.pattern.permute.xlu1 %v6898_v3 }
  0x98   :  { %v647_v56 = vmul.f32 %v635_v50, %v4825_v35  ;;  %v659_v59 = vpop.permute.xlu1 %658  ;;  %685 = vperm.xlu1 %4344, %v667_v0  }
  0x99   :  { %4350 = vset.pattern.permute.xlu0 %v6898_v3 }
  0x9a   :  { %v671_v61 = vadd.f32 %v659_v59, %v647_v56  ;;  %v2192_v56 = vsub.f32 1.0, %v5406_v26  ;;  %v2193_v59 = vsub.f32 1.0, %v5356_v8 }
  0x9c   :  { %705 = vperm.xlu0 %4350, %v671_v61   ;;  %4347 = vset.pattern.permute.xlu1 %v6902_v17 }
  0x9d   :  { %735 = vperm.xlu1 %4347, %v4825_v35  }
  0xa0   :  { %1979 = vrot.lane.b32.xlu0 %v5336_v16, %s4646_s15 }
  0xa1   :  { %4348 = vset.pattern.permute.xlu1 %v7006_v13 }
  0xa2   :  { %833 = vperm.xlu1 %4348, %v4805_v29   ;;  %v5366_v29 = vld [vmem:[%s6881_s3 + $0x8] sm:$0xff] }
  0xa3   :  { %v2190_v43 = vsub.f32 1.0, %v5366_v29 }
  0xa4   :  { %1983 = vrot.lane.b32.xlu0 %v5346_v5, %s4646_s15 }
  0xa6   :  { %4349 = vset.pattern.permute.xlu1 %v6898_v3 }
  0xa7   :  { %695 = vperm.xlu1 %4349, %v669_v7  }
  0xa8   :  { %1987 = vrot.lane.b32.xlu0 %v5356_v8, %s4646_s15 }
  0xab   :  { %700 = vperm.xlu1 %4349, %v670_v14  }
  0xac   :  { %2039 = vrot.lane.b32.xlu0 %v5336_v16, %s4647_s16 }
  0xaf   :  { %4351 = vset.pattern.permute.xlu1 %v6912_v24 }
  0xb0   :  { %2041 = vrot.lane.b32.xlu0 %v5366_v29, %s4647_s16  ;;  %765 = vperm.xlu1 %4351, %v4825_v35  }
  0xb4   :  { %2043 = vrot.lane.b32.xlu0 %v5346_v5, %s4647_s16  ;;  %4352 = vset.pattern.permute.xlu1 %v7006_v13 }
  0xb5   :  { %837 = vperm.xlu1 %4352, %v4825_v35   ;;  %v5422_v35 = vld [vmem:[%s6881_s3 + $0x28] sm:$0xff] }
  0xb8   :  { %2045 = vrot.lane.b32.xlu0 %v5406_v26, %s4647_s16 }
  0xb9   :  { %1981 = vrot.lane.b32.xlu1 %v5366_v29, %s4646_s15 }
  0xbc   :  { %2047 = vrot.lane.b32.xlu0 %v5356_v8, %s4647_s16 }
  0xbd   :  { %v5415_v30 = vpop.permute.xlu1 %782  ;;  %1985 = vrot.lane.b32.xlu1 %v5406_v26, %s4646_s15 }
  0xbe   :  { %v5448_v21 = vpop.permute.xlu0 %787 }
  0xc0   :  { %2049 = vrot.lane.b32.xlu0 %v5422_v35, %s4647_s16 }
  0xc1   :  { %v5426_v33 = vpop.permute.xlu1 %792  ;;  %1989 = vrot.lane.b32.xlu1 %v5422_v35, %s4646_s15 }
  0xc2   :  { %v5451_v50 = vpop.permute.xlu0 %802 }
  0xc5   :  { %2063 = vrot.lane.b32.xlu1 %v5336_v16, %s4648_s23  ;;  %v5432_v38 = vpop.permute.xlu1 %797 }
  0xc7   :  { %v818_v63 = vpop.permute.xlu0 %817 }
  0xc9   :  { %2065 = vrot.lane.b32.xlu1 %v5366_v29, %s4648_s23 }
  0xcb   :  { %v716_v1 = vpop.permute.xlu1 %715 }
  0xcd   :  { %2067 = vrot.lane.b32.xlu1 %v5346_v5, %s4648_s23  ;;  %v750_v47 = vpop.permute.xlu0 %749 }
  0xd0   :  { %v746_v51 = vpop.permute.xlu1 %745 }
  0xd1   :  { %2069 = vrot.lane.b32.xlu1 %v5406_v26, %s4648_s23 }
  0xd5   :  { %2071 = vrot.lane.b32.xlu1 %v5356_v8, %s4648_s23  ;;  %v5442_v39 = vpop.permute.xlu1 %807 }
  0xd9   :  { %2073 = vrot.lane.b32.xlu1 %v5422_v35, %s4648_s23 }
  0xda   :  { %v720_v46 = vpop.permute.xlu1 %719 }
  0xdd   :  { %2197 = vperm.xlu1 %4352, %v2189_v41  }
  0xde   :  { %v724_v0 = vpop.permute.xlu1 %723 }
  0xe1   :  { %2202 = vperm.xlu1 %4352, %v2190_v43  }
  0xe3   :  { %v822_v61 = vpop.permute.xlu1 %821 }
  0xe5   :  { %2207 = vperm.xlu1 %4352, %v2191_v48  }
  0xe8   :  { %v754_v7 = vpop.permute.xlu1 %753 }
  0xe9   :  { %2212 = vperm.xlu1 %4352, %v2192_v56  }
  0xed   :  { %2217 = vperm.xlu1 %4352, %v2193_v59   ;;  %v5457_v14 = vpop.permute.xlu1 %727 }
  0xf1   :  { %4353 = vset.pattern.permute.xlu1 %v6902_v17 }
  0xf2   :  { %2130 = vperm.xlu1 %4353, %v5336_v16  }
  0xf6   :  { %v5459_v41 = vpop.permute.xlu0 %590  ;;  %4354 = vset.pattern.permute.xlu1 %v6912_v24 }
  0xf7   :  { %2160 = vperm.xlu1 %4354, %v5336_v16  }
  0xf9   :  { %v3622_v43 = vpop.f32.mrb[0].mxu0 }
  0xfa   :  { %v3672_v48 = vpop.f32.mrb[0].mxu1  ;;  %v3623_v56 = vpop.f32.mrb[1].mxu0 }
  0xfb   :  { %v3624_v25 = vadd.f32 %v3623_v56, %v3622_v43  ;;  %v3673_v3 = vpop.f32.mrb[1].mxu1  ;;  %v5463_v18 = vpop.permute.xlu0 %605  ;;  %4355 = vset.pattern.permute.xlu1 %v7009_v4 }
  0xfc   :  { %v3674_v59 = vadd.f32 %v3673_v3, %v3672_v48  ;;  %v5465_v37 = vpop.permute.xlu1 %595  ;;  %2134 = vperm.xlu1 %4355, %v5366_v29  }
  0xfd   :  { %v3625_v17 = vpop.f32.mrb[2].mxu0 }
  0xfe   :  { %v5468_v2 = vadd.f32 %v3674_v59, %v3624_v25  ;;  %v3675_v60 = vpop.f32.mrb[2].mxu1  ;;  %v3626_v55 = vpop.f32.mrb[3].mxu0 }
  0xff   :  { %v3627_v24 = vadd.f32 %v3626_v55, %v3625_v17  ;;  %v3676_v54 = vpop.f32.mrb[3].mxu1  ;;  %v826_v3 = vpop.permute.xlu0 %825 }
 0x100   :  { %v738_v52 = vmul.f32 %v716_v1, %v5468_v2  ;;  %v3677_v43 = vadd.f32 %v3676_v54, %v3675_v60  ;;  %v5472_v56 = vpop.permute.xlu1 %600  ;;  %4356 = vset.pattern.permute.xlu1 %v7006_v13  ;;  %v7010_v13 = vmov 2  }
 0x101   :  { %v3628_v34 = vpop.f32.mrb[4].mxu0  ;;  %2232 = vperm.xlu1 %4356, %v5336_v16  }
 0x102   :  { %v768_v48 = vadd.f32 %v746_v51, %v738_v52  ;;  %v5474_v42 = vadd.f32 %v3677_v43, %v3627_v24  ;;  %v3678_v31 = vpop.f32.mrb[4].mxu1  ;;  %v3629_v25 = vpop.f32.mrb[5].mxu0 }
 0x103   :  { %v3679_v59 = vpop.f32.mrb[5].mxu1  ;;  %v3630_v17 = vadd.f32 %v3629_v25, %v3628_v34 }
 0x104   :  { %v5478_v12 = vmul.f32 %v818_v63, %v768_v48  ;;  %v739_v55 = vmul.f32 %v720_v46, %v5474_v42  ;;  %v3680_v54 = vadd.f32 %v3679_v59, %v3678_v31  ;;  %v758_v9 = vpop.permute.xlu1 %757 }
 0x105   :  { %v3631_v60 = vpop.f32.mrb[6].mxu0  ;;  %v5483_v51 = vpop.permute.xlu0 %680  ;;  %4358 = vset.pattern.permute.xlu1 %v7010_v13 }
 0x106   :  { %v769_v1 = vadd.f32 %v750_v47, %v739_v55  ;;  %v5481_v52 = vadd.f32 %v3680_v54, %v3630_v17  ;;  %v3681_v24 = vpop.f32.mrb[6].mxu1  ;;  %v3632_v43 = vpop.f32.mrb[7].mxu0  ;;  %2164 = vperm.xlu1 %4358, %v5366_v29  }
 0x107   :  { %v3633_v58 = vadd.f32 %v3632_v43, %v3631_v60  ;;  %v3682_v63 = vpop.f32.mrb[7].mxu1 }
 0x108   :  { %v740_v62 = vmul.f32 %v724_v0, %v5481_v52  ;;  %v5487_v48 = vmul.f32 %v822_v61, %v769_v1  ;;  %v3683_v31 = vadd.f32 %v3682_v63, %v3681_v24 }
 0x109   :  { %v3634_v34 = vpop.f32.mrb[8].mxu0  ;;  %v5490_v59 = vpop.permute.xlu1 %610 }
 0x10a   :  { %v770_v46 = vadd.f32 %v754_v7, %v740_v62  ;;  %v3684_v47 = vpop.f32.mrb[8].mxu1  ;;  %v3635_v25 = vpop.f32.mrb[9].mxu0  ;;  %v5492_v55 = vadd.f32 %v3683_v31, %v3633_v58  ;;  %4359 = vset.pattern.permute.xlu1 %v7009_v4 }
 0x10b   :  { %v3636_v17 = vadd.f32 %v3635_v25, %v3634_v34  ;;  %v3685_v54 = vpop.f32.mrb[9].mxu1  ;;  %v732_v13 = vpop.permute.xlu0 %731  ;;  %2138 = vperm.xlu1 %4359, %v5346_v5  }
 0x10c   :  { %v3686_v57 = vadd.f32 %v3685_v54, %v3684_v47  ;;  %v5494_v0 = vmul.f32 %v826_v3, %v770_v46  ;;  %v741_v60 = vmul.f32 %v5457_v14, %v5492_v55  ;;  %v7011_v46 = vmov 3  }
 0x10d   :  { %v3637_v61 = vpop.f32.mrb[10].mxu0  ;;  %v5502_v58 = vpop.permute.xlu1 %615 }
 0x10e   :  { %v5500_v62 = vadd.f32 %v3686_v57, %v3636_v17  ;;  %v3687_v7 = vpop.f32.mrb[10].mxu1  ;;  %v3638_v1 = vpop.f32.mrb[11].mxu0  ;;  %v5504_v24 = vadd.f32 %v758_v9, %v741_v60 }
 0x10f   :  { %v3639_v43 = vadd.f32 %v3638_v1, %v3637_v61  ;;  %v3688_v63 = vpop.f32.mrb[11].mxu1  ;;  %v5509_v34 = vpop.permute.xlu0 %690  ;;  %4360 = vset.pattern.permute.xlu1 %v7011_v46 }
 0x110   :  { %v3689_v3 = vadd.f32 %v3688_v63, %v3687_v7  ;;  %v5507_v31 = vmul.f32 %v732_v13, %v5500_v62 }
 0x112   :  { %v5512_v14 = vadd.f32 %v3689_v3, %v3639_v43  ;;  %v5514_v57 = vpop.permute.xlu1 %829  ;;  %v534_v43 = vmul.f32 %v5468_v2, %v5468_v2 }
 0x114   :  { %v5516_v47 = vpop.permute.xlu0 %761 }
 0x117   :  { %v5518_v25 = vpop.permute.xlu1 %685 }
 0x119   :  { %v3722_v9 = vpop.f32.mrb[12].mxu0 }
 0x11a   :  { %v3772_v17 = vpop.f32.mrb[12].mxu1  ;;  %v3723_v54 = vpop.f32.mrb[13].mxu0 }
 0x11b   :  { %v5520_v61 = vpop.permute.xlu0 %705  ;;  %v3724_v60 = vadd.f32 %v3723_v54, %v3722_v9  ;;  %v3773_v13 = vpop.f32.mrb[13].mxu1 }
 0x11c   :  { %v3774_v7 = vadd.f32 %v3773_v13, %v3772_v17  ;;  %v5524_v3 = vpop.permute.xlu1 %735  ;;  %v535_v13 = vmul.f32 %v5474_v42, %v5474_v42 }
 0x11d   :  { %v3725_v1 = vpop.f32.mrb[14].mxu0 }
 0x11e   :  { %v506_v63 = vadd.f32 %v3774_v7, %v3724_v60  ;;  %v3775_v46 = vpop.f32.mrb[14].mxu1  ;;  %v3726_v53 = vpop.f32.mrb[15].mxu0 }
 0x11f   :  { %v1980_v4 = vpop.permute.xlu0 %1979  ;;  %v3727_v44 = vadd.f32 %v3726_v53, %v3725_v1  ;;  %v3776_v40 = vpop.f32.mrb[15].mxu1 }
 0x120   :  { %v540_v49 = vsub.f32 %v506_v63, %v534_v43  ;;  %v1997_v45 = vmul.f32 %v1980_v4, %v5336_v16  ;;  %v3777_v36 = vadd.f32 %v3776_v40, %v3775_v46  ;;  %v536_v40 = vmul.f32 %v5481_v52, %v5481_v52 }
 0x121   :  { %v3728_v32 = vpop.f32.mrb[16].mxu0  ;;  %v5529_v27 = vpop.permute.xlu1 %833 }
 0x122   :  { %v546_v9 = vadd.f32 1e-05, %v540_v49  ;;  %2005 = vperm.xlu0 %4350, %v1997_v45   ;;  %v3778_v17 = vpop.f32.mrb[16].mxu1  ;;  %v3729_v54 = vpop.f32.mrb[17].mxu0  ;;  %v511_v60 = vadd.f32 %v3777_v36, %v3727_v44 }
 0x123   :  { %v3730_v7 = vadd.f32 %v3729_v54, %v3728_v32  ;;  %v3779_v28 = vpop.f32.mrb[17].mxu1 }
 0x124   :  { %4375 = vrsqrt.f32 %v546_v9  ;;  %v3780_v63 = vadd.f32 %v3779_v28, %v3778_v17  ;;  %v541_v43 = vsub.f32 %v511_v60, %v535_v13  ;;  %v537_v28 = vmul.f32 %v5492_v55, %v5492_v55 }
 0x125   :  { %v3731_v4 = vpop.f32.mrb[18].mxu0 }
 0x126   :  { %v516_v53 = vadd.f32 %v3780_v63, %v3730_v7  ;;  %v3781_v49 = vpop.f32.mrb[18].mxu1  ;;  %v3732_v45 = vpop.f32.mrb[19].mxu0  ;;  %v547_v46 = vadd.f32 1e-05, %v541_v43 }
 0x127   :  { %v3733_v1 = vadd.f32 %v3732_v45, %v3731_v4  ;;  %v3782_v36 = vpop.f32.mrb[19].mxu1  ;;  %v5533_v19 = vpop.permute.xlu1 %695 }
 0x128   :  { %v542_v44 = vsub.f32 %v516_v53, %v536_v40  ;;  %v3783_v23 = vadd.f32 %v3782_v36, %v3781_v49  ;;  %4377 = vrsqrt.f32 %v547_v46  ;;  %v538_v46 = vmul.f32 %v5500_v62, %v5500_v62 }
 0x129   :  { %v3734_v32 = vpop.f32.mrb[20].mxu0 }
 0x12a   :  { %v548_v9 = vadd.f32 1e-05, %v542_v44  ;;  %v521_v54 = vadd.f32 %v3783_v23, %v3733_v1  ;;  %v3784_v17 = vpop.f32.mrb[20].mxu1  ;;  %v3735_v60 = vpop.f32.mrb[21].mxu0 }
 0x12b   :  { %v3736_v13 = vadd.f32 %v3735_v60, %v3734_v32  ;;  %v3785_v7 = vpop.f32.mrb[21].mxu1  ;;  %v5537_v4 = vpop.permute.xlu1 %700 }
 0x12c   :  { %4379 = vrsqrt.f32 %v548_v9  ;;  %v543_v63 = vsub.f32 %v521_v54, %v537_v28  ;;  %v3786_v43 = vadd.f32 %v3785_v7, %v3784_v17  ;;  %v539_v7 = vmul.f32 %v5512_v14, %v5512_v14 }
 0x12d   :  { %v3737_v53 = vpop.f32.mrb[22].mxu0 }
 0x12e   :  { %v4376_v40 = vpop.eup %4375  ;;  %v549_v49 = vadd.f32 1e-05, %v543_v63  ;;  %v526_v45 = vadd.f32 %v3786_v43, %v3736_v13  ;;  %v3787_v23 = vpop.f32.mrb[22].mxu1  ;;  %v7012_v43 = vmov 0.0  }
 0x12f   :  { %v3738_v1 = vpop.f32.mrb[23].mxu0  ;;  %v618_v36 = vmul.f32 %v4376_v40, %v5459_v41  ;;  %v3788_v15 = vpop.f32.mrb[23].mxu1 }
 0x130   :  { %v3739_v44 = vadd.f32 %v3738_v1, %v3737_v53  ;;  %4381 = vrsqrt.f32 %v549_v49  ;;  %v544_v32 = vsub.f32 %v526_v45, %v538_v46  ;;  %v3789_v9 = vadd.f32 %v3788_v15, %v3787_v23  ;;  %v5543_v28 = vpop.permute.xlu1 %765 }
 0x131   :  { %v672_v54 = vmul.f32 %v618_v36, %v5468_v2  ;;  %v810_v17 = vmul.f32 %v5415_v30, %v618_v36  ;;  %v1984_v36 = vpop.permute.xlu0 %1983 }
 0x132   :  { %v550_v60 = vadd.f32 1e-05, %v544_v32  ;;  %v531_v13 = vadd.f32 %v3789_v9, %v3739_v44  ;;  %v4378_v63 = vpop.eup %4377 }
 0x133   :  { %v708_v41 = vsub.f32 %v5483_v51, %v672_v54  ;;  %3470 = vmatmul.mubr.msk.f32.vlgmr.msra.gmra.mrb[24].mxu0 %vm858_vm0, %v810_v17  ;;  %3476 = vmatmul.mubr.msk.f32.vlgmr.msra.gmra.mrb[24].mxu1 %vm858_vm0, %v810_v17  ;;  %v619_v2 = vmul.f32 %v4378_v63, %v5465_v37 }
 0x134   :  { %4383 = vrsqrt.f32 %v550_v60  ;;  %v545_v15 = vsub.f32 %v531_v13, %v539_v7  ;;  %947 = vmatprep.mubr.f32.mxu0 %v7012_v43  ;;  %1048 = vmatprep.mubr.f32.mxu1 %v7012_v43  ;;  %v5557_v49 = vpop.permute.xlu1 %837 }
 0x135   :  { %1098 = vmatpush1.msra.mxu0 %v5386_v20  ;;  %1199 = vmatpush1.msra.mxu1 %v5391_v22  ;;  %v846_v53 = vmul.f32 %v5415_v30, %v708_v41  ;;  %v673_v45 = vmul.f32 %v619_v2, %v5474_v42  ;;  %v811_v46 = vmul.f32 %v5448_v21, %v619_v2 }
 0x136   :  { %v4380_v40 = vpop.eup %4379  ;;  %v551_v51 = vadd.f32 1e-05, %v545_v15  ;;  %4119 = vmatprep.subr.bf16.mxu0 %v4728_v6  ;;  %4151 = vmatprep.subr.bf16.mxu1 %v4739_v10 }
 0x137   :  { %v620_v37 = vmul.f32 %v4380_v40, %v5472_v56  ;;  %v5565_v23 = vadd.f32 %v846_v53, %v5478_v12  ;;  %3471 = vmatmul.mubr.msk.f32.gmra.mrb[26].mxu0 %vm858_vm0, %v811_v46  ;;  %3477 = vmatmul.mubr.msk.f32.gmra.mrb[26].mxu1 %vm858_vm0, %v811_v46  ;;  %v709_v30 = vsub.f32 %v5518_v25, %v673_v45 }
 0x138   :  { %4385 = vrsqrt.f32 %v551_v51  ;;  %953 = vmatprep.mubr.f32.mxu0 %v7012_v43  ;;  %1054 = vmatprep.mubr.f32.mxu1 %v7012_v43  ;;  %v1982_v44 = vpop.permute.xlu1 %1981  ;;  %v1999_v25 = vmul.f32 %v1984_v36, %v5346_v5  ;;  %v7017_v36 = vld [vmem:[#allocation6_spill] sm:$0xff] }
 0x139   :  { %v674_v42 = vmul.f32 %v620_v37, %v5481_v52  ;;  %v812_v1 = vmul.f32 %v5426_v33, %v620_v37  ;;  %v847_v12 = vmul.f32 %v5448_v21, %v709_v30  ;;  %v1998_v9 = vmul.f32 %v1982_v44, %v5366_v29  ;;  %v7018_v44 = vld [vmem:[#allocation7_spill] sm:$0xff] }
 0x13a   :  { %v4382_v56 = vpop.eup %4381 }
 0x13b   :  { %v621_v32 = vmul.f32 %v4382_v56, %v5463_v18  ;;  %v710_v54 = vsub.f32 %v5509_v34, %v674_v42  ;;  %3472 = vmatmul.mubr.msk.f32.gmra.mrb[28].mxu0 %vm858_vm0, %v812_v1  ;;  %3478 = vmatmul.mubr.msk.f32.gmra.mrb[28].mxu1 %vm858_vm0, %v812_v1  ;;  %v5582_v52 = vadd.f32 %v847_v12, %v5487_v48  ;;  %v7015_v42 = vld [vmem:[#allocation4_spill] sm:$0xff] }
 0x13c   :  { %2010 = vperm.xlu0 %4350, %v1998_v9   ;;  %959 = vmatprep.mubr.f32.mxu0 %v7012_v43  ;;  %v1986_v7 = vpop.permute.xlu1 %1985  ;;  %v7019_v12 = vld [vmem:[#allocation8_spill] sm:$0xff]  ;;  %v7021_v9 = vld [vmem:[#allocation10_spill] sm:$0xff] }
 0x13d   :  { %v675_v17 = vmul.f32 %v621_v32, %v5492_v55  ;;  %v813_v60 = vmul.f32 %v5432_v38, %v621_v32  ;;  %v848_v18 = vmul.f32 %v5426_v33, %v710_v54  ;;  %1060 = vmatprep.mubr.f32.mxu1 %v7012_v43  ;;  %v843_v55 = vmul.f32 %v5514_v57, %v5504_v24  ;;  %v7020_v32 = vld [vmem:[#allocation9_spill] sm:$0xff]  ;;  %v7022_v54 = vld [vmem:[#allocation11_spill] sm:$0xff] }
 0x13e   :  { %v4384_v21 = vpop.eup %4383  ;;  %v2000_v63 = vmul.f32 %v1986_v7, %v5406_v26  ;;  %v772_v24 = vadd.f32 %v5516_v47, %v5507_v31  ;;  %v7029_v7 = vld [vmem:[#allocation18_spill] sm:$0xff] }
 0x13f   :  { %v711_v34 = vsub.f32 %v5533_v19, %v675_v17  ;;  %v622_v13 = vmul.f32 %v4384_v21, %v5490_v59  ;;  %v5592_v48 = vadd.f32 %v848_v18, %v5494_v0  ;;  %3473 = vmatmul.mubr.msk.f32.gmra.mrb[30].mxu0 %vm858_vm0, %v813_v60  ;;  %3479 = vmatmul.mubr.msk.f32.gmra.mrb[30].mxu1 %vm858_vm0, %v813_v60  ;;  %v1988_v59 = vpop.permute.xlu0 %1987  ;;  %v7025_v17 = vld [vmem:[#allocation14_spill] sm:$0xff]  ;;  %v7026_v60 = vld [vmem:[#allocation15_spill] sm:$0xff]  ;;  %v7027_v21 = vld [vmem:[#allocation16_spill] sm:$0xff] }
 0x140   :  { %2015 = vperm.xlu0 %4350, %v1999_v25   ;;  %965 = vmatprep.mubr.f32.mxu0 %v7012_v43  ;;  %v844_v2 = vmul.f32 %v5529_v27, %v772_v24  ;;  %v2001_v53 = vmul.f32 %v1988_v59, %v5356_v8  ;;  %v7023_v25 = vld [vmem:[#allocation12_spill] sm:$0xff]  ;;  %v5692_v59 = vld [vmem:[%s6883_s1 + $0x18] sm:$0xff]  ;;  %v7034_v24 = vld [vmem:[#allocation23_spill] sm:$0xff] }
 0x141   :  { %v849_v33 = vmul.f32 %v5432_v38, %v711_v34  ;;  %v676_v41 = vmul.f32 %v622_v13, %v5500_v62  ;;  %v814_v19 = vmul.f32 %v5451_v50, %v622_v13  ;;  %1066 = vmatprep.mubr.f32.mxu1 %v7012_v43  ;;  %v743_v62 = vmul.f32 %v5524_v3, %v5512_v14  ;;  %v7028_v13 = vld [vmem:[#allocation17_spill] sm:$0xff] }
 0x142   :  { %v4386_v0 = vpop.eup %4385 }
 0x143   :  { %v5606_v57 = vadd.f32 %v849_v33, %v843_v55  ;;  %v712_v15 = vsub.f32 %v5537_v4, %v676_v41  ;;  %v623_v38 = vmul.f32 %v4386_v0, %v5502_v58  ;;  %3474 = vmatmul.mubr.msk.f32.gmra.mrb[32].mxu0 %vm858_vm0, %v814_v19  ;;  %3480 = vmatmul.mubr.msk.f32.gmra.mrb[32].mxu1 %vm858_vm0, %v814_v19  ;;  %v1990_v4 = vpop.permute.xlu1 %1989  ;;  %v2040_v3 = vpop.permute.xlu0 %2039  ;;  %v7030_v55 = vld [vmem:[#allocation19_spill] sm:$0xff]  ;;  %v7032_v19 = vld [vmem:[#allocation21_spill] sm:$0xff]  ;;  %v7033_v0 = vld [vmem:[#allocation22_spill] sm:$0xff] }
 0x144   :  { %2020 = vperm.xlu0 %4350, %v2000_v63   ;;  %971 = vmatprep.mubr.f32.mxu0 %v7012_v43  ;;  %v773_v40 = vadd.f32 %v5543_v28, %v743_v62  ;;  %v2002_v45 = vmul.f32 %v1990_v4, %v5422_v35  ;;  %v2057_v46 = vmul.f32 %v2040_v3, %v5336_v16  ;;  %v7014_v16 = vld [vmem:[#allocation3_spill] sm:$0xff]  ;;  %v7031_v63 = vld [vmem:[#allocation20_spill] sm:$0xff]  ;;  %v7037_v62 = vmov 0   ;;  %v5710_v4 = vld [vmem:[%s6883_s1] sm:$0xff] }
 0x145   :  { %v850_v31 = vmul.f32 %v5451_v50, %v712_v15  ;;  %v677_v47 = vmul.f32 %v623_v38, %v5512_v14  ;;  %v815_v58 = vmul.f32 %v5442_v39, %v623_v38  ;;  %1072 = vmatprep.mubr.f32.mxu1 %v7012_v43  ;;  %v5685_v33 = vld [vmem:[%s6883_s1 + $0x8] sm:$0xff]  ;;  %v2194_v15 = vsub.f32 1.0, %v5422_v35  ;;  %v7036_v38 = vld [vmem:[#allocation25_spill] sm:$0xff]  ;;  %v7043_v3 = vld [vmem:[#allocation30_spill] sm:$0xff] }
 0x146   :  { %v845_v50 = vmul.f32 %v5557_v49, %v773_v40  ;;  %v5726_v40 = vld [vmem:[%s6883_s1 + $0x28] sm:$0xff] }
 0x147   :  { %v856_v27 = vadd.f32 %v850_v31, %v844_v2  ;;  %v713_v51 = vsub.f32 %v5520_v61, %v677_v47  ;;  %3475 = vmatmul.mubr.msk.f32.gmra.mrb[34].mxu0 %vm858_vm0, %v815_v58  ;;  %3481 = vmatmul.mubr.msk.f32.gmra.mrb[34].mxu1 %vm858_vm0, %v815_v58  ;;  %v2064_v37 = vpop.permute.xlu1 %2063  ;;  %v2042_v61 = vpop.permute.xlu0 %2041  ;;  %v7038_v2 = vld [vmem:[#allocation26_spill] sm:$0xff]  ;;  %v7040_v31 = vld [vmem:[#allocation28_spill] sm:$0xff]  ;;  %v7041_v47 = vmov 2   ;;  %v7042_v58 = vld [vmem:[#allocation29_spill] sm:$0xff] }
 0x148   :  { %2025 = vperm.xlu0 %4350, %v2001_v53   ;;  %1161 = vmatprep.mubr.f32.mxu0 %v7012_v43  ;;  %v2081_v49 = vadd.f32 %v2064_v37, %v2057_v46  ;;  %v2058_v30 = vmul.f32 %v2042_v61, %v5366_v29  ;;  %v7039_v53 = vld [vmem:[#allocation27_spill] sm:$0xff]  ;;  %v5789_v46 = vld [vmem:[%s6883_s1 + $0x78] sm:$0xff]  ;;  %v5801_v37 = vld [vmem:[%s6883_s1 + $0x70] sm:$0xff] }
 0x149   :  { %v851_v14 = vmul.f32 %v5442_v39, %v713_v51  ;;  %1262 = vmatprep.mubr.f32.mxu1 %v7012_v43  ;;  %v7013_v39 = vld [vmem:[#allocation2_spill] sm:$0xff]  ;;  %v5733_v51 = vld [vmem:[%s6883_s1 + $0x38] sm:$0xff]  ;;  %v5810_v61 = vld [vmem:[%s6883_s1 + $0x88] sm:$0xff] }
 0x14b   :  { %v857_v28 = vadd.f32 %v851_v14, %v845_v50  ;;  %3482 = vmatmul.mubr.msk.f32.vlgmr.msra.gmra.mrb[36].mxu0 %vm858_vm0, %v5565_v23  ;;  %3488 = vmatmul.mubr.msk.f32.vlgmr.msra.gmra.mrb[36].mxu1 %vm858_vm0, %v5565_v23  ;;  %v7016_v23 = vld [vmem:[#allocation5_spill] sm:$0xff]  ;;  %v2066_v1 = vpop.permute.xlu1 %2065  ;;  %v2044_v18 = vpop.permute.xlu0 %2043  ;;  %v5766_v50 = vld [vmem:[%s6883_s1 + $0x40] sm:$0xff]  ;;  %v5773_v14 = vld [vmem:[%s6883_s1 + $0x50] sm:$0xff] }
 0x14c   :  { %4121 = vmatpush3.bf16.msra.mxu0 %v4741_v11  ;;  %4153 = vmatpush3.bf16.msra.mxu1 %v7013_v39  ;;  %v2082_v56 = vadd.f32 %v2066_v1, %v2058_v30  ;;  %v2059_v34 = vmul.f32 %v2044_v18, %v5346_v5  ;;  %v5838_v30 = vld [vmem:[%s6883_s1 + $0xa8] sm:$0xff]  ;;  %v5857_v1 = vld [vmem:[%s6883_s1 + $0xb0] sm:$0xff] }
 0x14d   :  { %2030 = vperm.xlu0 %4350, %v2002_v45   ;;  %1167 = vmatprep.mubr.f32.mxu0 %v7012_v43  ;;  %v5782_v45 = vld [vmem:[%s6883_s1 + $0x68] sm:$0xff] }
 0x14e   :  { %1268 = vmatprep.mubr.f32.mxu1 %v7012_v43  ;;  %4123 = vmatprep.subr.bf16.mxu0 %v7014_v16  ;;  %v7046_v18 = vld [vmem:[#allocation31_spill] sm:$0xff] }
 0x14f   :  { %4155 = vmatprep.subr.bf16.mxu1 %v7015_v42  ;;  %3483 = vmatmul.mubr.msk.f32.gmra.mrb[38].mxu0 %vm858_vm0, %v5582_v52 }
 0x150   :  { %3489 = vmatmul.mubr.msk.f32.gmra.mrb[38].mxu1 %vm858_vm0, %v5582_v52  ;;  %4125 = vmatpush3.bf16.msra.mxu0 %v7016_v23  ;;  %v7024_v52 = vld [vmem:[#allocation13_spill] sm:$0xff] }
 0x151   :  { %4157 = vmatpush3.bf16.msra.mxu1 %v7017_v36  ;;  %2095 = vperm.xlu0 %4350, %v2081_v49   ;;  %v5822_v49 = vld [vmem:[%s6883_s1 + $0x80] sm:$0xff] }
 0x152   :  { %1173 = vmatprep.mubr.f32.mxu0 %v7012_v43  ;;  %1274 = vmatprep.mubr.f32.mxu1 %v7012_v43 }
 0x153   :  { %4127 = vmatprep.subr.bf16.mxu0 %v7018_v44  ;;  %4159 = vmatprep.subr.bf16.mxu1 %v7019_v12 }
 0x154   :  { %3484 = vmatmul.mubr.msk.f32.gmra.mrb[40].mxu0 %vm858_vm0, %v5592_v48  ;;  %3490 = vmatmul.mubr.msk.f32.gmra.mrb[40].mxu1 %vm858_vm0, %v5592_v48  ;;  %v2068_v48 = vpop.permute.xlu1 %2067 }
 0x155   :  { %4129 = vmatpush3.bf16.msra.mxu0 %v7020_v32  ;;  %4161 = vmatpush3.bf16.msra.mxu1 %v7021_v9  ;;  %v2083_v41 = vadd.f32 %v2068_v48, %v2059_v34 }
 0x156   :  { %2100 = vperm.xlu0 %4350, %v2082_v56   ;;  %1179 = vmatprep.mubr.f32.mxu0 %v7012_v43  ;;  %v1738_v56 = vmul.f32 %v5692_v59, %v5692_v59 }
 0x157   :  { %1280 = vmatprep.mubr.f32.mxu1 %v7012_v43  ;;  %4131 = vmatprep.subr.bf16.mxu0 %v7022_v54 }
 0x158   :  { %4163 = vmatprep.subr.bf16.mxu1 %v7023_v25  ;;  %3485 = vmatmul.mubr.msk.f32.gmra.mrb[42].mxu0 %vm858_vm0, %v5606_v57 }
 0x159   :  { %3491 = vmatmul.mubr.msk.f32.gmra.mrb[42].mxu1 %vm858_vm0, %v5606_v57  ;;  %4133 = vmatpush3.bf16.msra.mxu0 %v7024_v52  ;;  %v7035_v57 = vld [vmem:[#allocation24_spill] sm:$0xff] }
 0x15a   :  { %4165 = vmatpush3.bf16.msra.mxu1 %v7025_v17  ;;  %1185 = vmatprep.mubr.f32.mxu0 %v7012_v43 }
 0x15b   :  { %1286 = vmatprep.mubr.f32.mxu1 %v7012_v43  ;;  %4135 = vmatprep.subr.bf16.mxu0 %v7026_v60 }
 0x15c   :  { %4167 = vmatprep.subr.bf16.mxu1 %v7027_v21  ;;  %3486 = vmatmul.mubr.msk.f32.gmra.mrb[44].mxu0 %vm858_vm0, %v856_v27 }
 0x15d   :  { %3492 = vmatmul.mubr.msk.f32.gmra.mrb[44].mxu1 %vm858_vm0, %v856_v27  ;;  %4137 = vmatpush3.bf16.msra.mxu0 %v7028_v13  ;;  %v5717_v27 = vld [vmem:[%s6883_s1 + $0x10] sm:$0xff] }
 0x15e   :  { %4169 = vmatpush3.bf16.msra.mxu1 %v7029_v7  ;;  %1191 = vmatprep.mubr.f32.mxu0 %v7012_v43 }
 0x15f   :  { %1292 = vmatprep.mubr.f32.mxu1 %v7012_v43  ;;  %4139 = vmatprep.subr.bf16.mxu0 %v7030_v55 }
 0x160   :  { %4171 = vmatprep.subr.bf16.mxu1 %v7031_v63  ;;  %3487 = vmatmul.mubr.msk.f32.gmra.mrb[46].mxu0 %vm858_vm0, %v857_v28 }
 0x161   :  { %3493 = vmatmul.mubr.msk.f32.gmra.mrb[46].mxu1 %vm858_vm0, %v857_v28  ;;  %4141 = vmatpush3.bf16.msra.mxu0 %v7032_v19  ;;  %v5794_v28 = vld [vmem:[%s6883_s1 + $0x60] sm:$0xff] }
 0x162   :  { %4173 = vmatpush3.bf16.msra.mxu1 %v7033_v0  ;;  %4143 = vmatprep.subr.bf16.mxu0 %v7034_v24 }
 0x163   :  { %4175 = vmatprep.subr.bf16.mxu1 %v7035_v57  ;;  %1609 = vmatprep.mubr.f32.mxu0 %v5685_v33 }
 0x164   :  { %1704 = vmatprep.mubr.f32.mxu1 %v5692_v59  ;;  %2105 = vperm.xlu1 %4360, %v2083_v41   ;;  %v1748_v59 = vmul.f32 %v5782_v45, %v5782_v45 }
 0x165   :  { %4145 = vmatpush3.bf16.msra.mxu0 %v7036_v38  ;;  %4357 = vset.pattern.permute.xlu0 %v7037_v62 }
 0x166   :  { %4177 = vmatpush3.bf16.msra.mxu1 %v7038_v2  ;;  %4147 = vmatprep.subr.bf16.mxu0 %v7039_v53 }
 0x167   :  { %4179 = vmatprep.subr.bf16.mxu1 %v7040_v31  ;;  %2222 = vperm.xlu0 %4357, %v2194_v15   ;;  %v4591_v15 = vld [vmem:[%s6882_s8 + $0x8] sm:$0xff] }
 0x168   :  { %4361 = vset.pattern.permute.xlu1 %v7041_v47 }
 0x169   :  { %4149 = vmatpush3.bf16.msra.mxu0 %v7042_v58  ;;  %2168 = vperm.xlu1 %4361, %v5346_v5  }
 0x16a   :  { %4181 = vmatpush3.bf16.msra.mxu1 %v7043_v3  ;;  %4183 = vmatprep.subr.bf16.mxu0 %v4728_v6  ;;  %v5738_v6 = vld [vmem:[%s6883_s1 + $0x20] sm:$0xff] }
 0x16b   :  { %4215 = vmatprep.subr.bf16.mxu1 %v4739_v10  ;;  %2236 = vperm.xlu0 %4357, %v5366_v29   ;;  %v5745_v10 = vld [vmem:[%s6883_s1 + $0x30] sm:$0xff]  ;;  %v5761_v29 = vld [vmem:[%s6883_s1 + $0x58] sm:$0xff]  ;;  %v1739_v34 = vmul.f32 %v5738_v6, %v5738_v6 }
 0x16c   :  { %1610 = vmatmul.mubr.f32.vlgmr.msra.gmra.mrb[48].mxu0 %v5710_v4 }
 0x16d   :  { %1705 = vmatmul.mubr.f32.vlgmr.msra.gmra.mrb[48].mxu1 %v5717_v27  ;;  %4185 = vmatpush3.bf16.msra.mxu0 %v4741_v11  ;;  %v5754_v11 = vld [vmem:[%s6883_s1 + $0x48] sm:$0xff] }
 0x16e   :  { %4217 = vmatpush3.bf16.msra.mxu1 %v7013_v39  ;;  %4187 = vmatprep.subr.bf16.mxu0 %v7014_v16  ;;  %v5817_v39 = vld [vmem:[%s6883_s1 + $0x98] sm:$0xff]  ;;  %v5829_v16 = vld [vmem:[%s6883_s1 + $0x90] sm:$0xff] }
 0x16f   :  { %4219 = vmatprep.subr.bf16.mxu1 %v7015_v42  ;;  %1614 = vmatprep.mubr.f32.mxu0 %v5726_v40  ;;  %v5845_v42 = vld [vmem:[%s6883_s1 + $0xb8] sm:$0xff] }
 0x170   :  { %1709 = vmatprep.mubr.f32.mxu1 %v5733_v51  ;;  %1615 = vmatmul.mubr.f32.gmra.mrb[50].mxu0 %v5738_v6  ;;  %v4594_v6 = vld [vmem:[%s6881_s3 + $0x28] sm:$0xff] }
 0x171   :  { %4189 = vmatpush3.bf16.msra.mxu0 %v7016_v23  ;;  %1710 = vmatmul.mubr.f32.gmra.mrb[50].mxu1 %v5745_v10  ;;  %v5850_v23 = vld [vmem:[%s6883_s1 + $0xa0] sm:$0xff] }
 0x172   :  { %4221 = vmatpush3.bf16.msra.mxu1 %v7017_v36  ;;  %4191 = vmatprep.subr.bf16.mxu0 %v7018_v44  ;;  %v1736_v36 = vmul.f32 %v5685_v33, %v5685_v33  ;;  %v2046_v44 = vpop.permute.xlu0 %2045  ;;  %v1743_v33 = vmul.f32 %v5766_v50, %v5766_v50 }
 0x173   :  { %4223 = vmatprep.subr.bf16.mxu1 %v7019_v12  ;;  %1619 = vmatprep.mubr.f32.mxu0 %v5754_v11  ;;  %v2060_v12 = vmul.f32 %v2046_v44, %v5406_v26 }
 0x174   :  { %1714 = vmatprep.mubr.f32.mxu1 %v5761_v29  ;;  %1620 = vmatmul.mubr.f32.gmra.mrb[52].mxu0 %v5766_v50 }
 0x175   :  { %4193 = vmatpush3.bf16.msra.mxu0 %v7020_v32  ;;  %1715 = vmatmul.mubr.f32.gmra.mrb[52].mxu1 %v5773_v14  ;;  %v2070_v32 = vpop.permute.xlu1 %2069 }
 0x176   :  { %4225 = vmatpush3.bf16.msra.mxu1 %v7021_v9  ;;  %4195 = vmatprep.subr.bf16.mxu0 %v7022_v54  ;;  %v2084_v9 = vadd.f32 %v2070_v32, %v2060_v12  ;;  %v7044_v54 = vmov 1   ;;  %v2048_v48 = vpop.permute.xlu0 %2047 }
 0x177   :  { %4227 = vmatprep.subr.bf16.mxu1 %v7023_v25  ;;  %1624 = vmatprep.mubr.f32.mxu0 %v5782_v45  ;;  %v1735_v25 = vmul.f32 %v5710_v4, %v5710_v4 }
 0x178   :  { %1719 = vmatprep.mubr.f32.mxu1 %v5789_v46  ;;  %1625 = vmatmul.mubr.f32.gmra.mrb[54].mxu0 %v5794_v28 }
 0x179   :  { %4197 = vmatpush3.bf16.msra.mxu0 %v7024_v52  ;;  %1720 = vmatmul.mubr.f32.gmra.mrb[54].mxu1 %v5801_v37  ;;  %v1737_v52 = vmul.f32 %v5717_v27, %v5717_v27  ;;  %v2072_v41 = vpop.permute.xlu1 %2071  ;;  %v1755_v27 = vmul.f32 %v5850_v23, %v5850_v23 }
 0x17a   :  { %4229 = vmatpush3.bf16.msra.mxu1 %v7025_v17  ;;  %4199 = vmatprep.subr.bf16.mxu0 %v7026_v60  ;;  %v7045_v17 = vmov 3   ;;  %v1742_v60 = vmul.f32 %v5733_v51, %v5733_v51  ;;  %v2050_v4 = vpop.permute.xlu0 %2049 }
 0x17b   :  { %4231 = vmatprep.subr.bf16.mxu1 %v7027_v21  ;;  %1629 = vmatprep.mubr.f32.mxu0 %v5810_v61  ;;  %v7047_v21 = vld [vmem:[#allocation32_spill] sm:$0xff] }
 0x17c   :  { %1724 = vmatprep.mubr.f32.mxu1 %v5817_v39  ;;  %1630 = vmatmul.mubr.f32.gmra.mrb[56].mxu0 %v5822_v49 }
 0x17d   :  { %4201 = vmatpush3.bf16.msra.mxu0 %v7028_v13  ;;  %1725 = vmatmul.mubr.f32.gmra.mrb[56].mxu1 %v5829_v16  ;;  %v1741_v13 = vmul.f32 %v5745_v10, %v5745_v10  ;;  %v2074_v51 = vpop.permute.xlu1 %2073 }
 0x17e   :  { %4233 = vmatpush3.bf16.msra.mxu1 %v7029_v7  ;;  %4203 = vmatprep.subr.bf16.mxu0 %v7030_v55  ;;  %v1744_v7 = vmul.f32 %v5754_v11, %v5754_v11  ;;  %v1746_v55 = vmul.f32 %v5761_v29, %v5761_v29  ;;  %v3385_v11 = vld [vmem:[%s6884_s6 + $0x18] sm:$0xff]  ;;  %v3387_v29 = vld [vmem:[%s6884_s6 + $0x28] sm:$0xff] }
 0x17f   :  { %4235 = vmatprep.subr.bf16.mxu1 %v7031_v63  ;;  %1634 = vmatprep.mubr.f32.mxu0 %v5838_v30  ;;  %v2061_v63 = vmul.f32 %v2048_v48, %v5356_v8  ;;  %v6025_v48 = vld [vmem:[%s6880_s0 + $0x18] sm:$0xff] }
 0x180   :  { %1729 = vmatprep.mubr.f32.mxu1 %v5845_v42  ;;  %1635 = vmatmul.mubr.f32.gmra.mrb[58].mxu0 %v5850_v23 }
 0x181   :  { %4205 = vmatpush3.bf16.msra.mxu0 %v7032_v19  ;;  %1730 = vmatmul.mubr.f32.gmra.mrb[58].mxu1 %v5857_v1  ;;  %v1745_v19 = vmul.f32 %v5773_v14, %v5773_v14 }
 0x182   :  { %4237 = vmatpush3.bf16.msra.mxu1 %v7033_v0  ;;  %4207 = vmatprep.subr.bf16.mxu0 %v7034_v24  ;;  %v2085_v0 = vadd.f32 %v2072_v41, %v2061_v63  ;;  %v1749_v24 = vmul.f32 %v5801_v37, %v5801_v37 }
 0x183   :  { %4239 = vmatprep.subr.bf16.mxu1 %v7035_v57  ;;  %1823 = vmatprep.mubr.f32.mxu0 %v1736_v36  ;;  %v1752_v57 = vmul.f32 %v5810_v61, %v5810_v61 }
 0x184   :  { %1918 = vmatprep.mubr.f32.mxu1 %v1738_v56  ;;  %4363 = vset.pattern.permute.xlu1 %v7037_v62 }
 0x185   :  { %4209 = vmatpush3.bf16.msra.mxu0 %v7036_v38  ;;  %2240 = vperm.xlu1 %4363, %v5346_v5   ;;  %v1740_v5 = vmul.f32 %v5726_v40, %v5726_v40  ;;  %v1751_v38 = vmul.f32 %v5822_v49, %v5822_v49  ;;  %v1757_v40 = vmul.f32 %v5857_v1, %v5857_v1  ;;  %v5970_v49 = vpop.permute.xlu1 %2197 }
 0x186   :  { %4241 = vmatpush3.bf16.msra.mxu1 %v7038_v2  ;;  %4211 = vmatprep.subr.bf16.mxu0 %v7039_v53  ;;  %v1753_v2 = vmul.f32 %v5829_v16, %v5829_v16  ;;  %v1756_v53 = vmul.f32 %v5838_v30, %v5838_v30 }
 0x187   :  { %4243 = vmatprep.subr.bf16.mxu1 %v7040_v31  ;;  %4362 = vset.pattern.permute.xlu0 %v7044_v54  ;;  %v1758_v31 = vmul.f32 %v5845_v42, %v5845_v42 }
 0x188   :  { %2142 = vperm.xlu0 %4362, %v5406_v26  }
 0x189   :  { %4213 = vmatpush3.bf16.msra.mxu0 %v7042_v58  ;;  %4364 = vset.pattern.permute.xlu1 %v7045_v17  ;;  %v4593_v58 = vld [vmem:[%s6881_s3 + $0x20] sm:$0xff]  ;;  %v5984_v56 = vpop.permute.xlu1 %2202 }
 0x18a   :  { %4245 = vmatpush3.bf16.msra.mxu1 %v7043_v3  ;;  %2110 = vperm.xlu1 %4364, %v2084_v9   ;;  %v2062_v3 = vmul.f32 %v2050_v4, %v5422_v35  ;;  %v3383_v35 = vld [vmem:[%s6884_s6 + $0x8] sm:$0xff] }
 0x18b   :  { %2291 = vmatprep.subr.mxu0 %v7046_v18  ;;  %2392 = vmatprep.subr.mxu1 %v7047_v21  ;;  %v6013_v21 = vld [vmem:[%s6880_s0 + $0x10] sm:$0xff] }
 0x18c   :  { %1824 = vmatmul.mubr.f32.vlgmr.msra.gmra.mrb[60].mxu0 %v1735_v25  ;;  %4365 = vset.pattern.permute.xlu0 %v7041_v47  ;;  %v2086_v10 = vadd.f32 %v2074_v51, %v2062_v3 }
 0x18d   :  { %1919 = vmatmul.mubr.f32.vlgmr.msra.gmra.mrb[60].mxu1 %v1737_v52  ;;  %1828 = vmatprep.mubr.f32.mxu0 %v1740_v5 }
 0x18e   :  { %1923 = vmatprep.mubr.f32.mxu1 %v1742_v60  ;;  %4366 = vset.pattern.permute.xlu1 %v7044_v54  ;;  %v6007_v60 = vld [vmem:[%s6880_s0] sm:$0xff] }
 0x18f   :  { %2146 = vperm.xlu1 %4366, %v5356_v8   ;;  %2172 = vperm.xlu0 %4365, %v5406_v26   ;;  %v1750_v8 = vmul.f32 %v5789_v46, %v5789_v46 }
 0x190   :  { %1829 = vmatmul.mubr.f32.gmra.mrb[62].mxu0 %v1739_v34  ;;  %2393 = vmatpush1.msra.mxu1 %v5391_v22  ;;  %v1747_v22 = vmul.f32 %v5794_v28, %v5794_v28 }
 0x191   :  { %1924 = vmatmul.mubr.f32.gmra.mrb[62].mxu1 %v1741_v13  ;;  %1833 = vmatprep.mubr.f32.mxu0 %v1744_v7  ;;  %v6019_v13 = vld [vmem:[%s6880_s0 + $0x8] sm:$0xff] }
 0x192   :  { %1928 = vmatprep.mubr.f32.mxu1 %v1746_v55  ;;  %2292 = vmatpush1.msra.mxu0 %v5386_v20  ;;  %v1754_v20 = vmul.f32 %v5817_v39, %v5817_v39 }
 0x193   :  { %4367 = vset.pattern.permute.xlu1 %v7037_v62  ;;  %4368 = vset.pattern.permute.xlu0 %v7045_v17 }
 0x194   :  { %1834 = vmatmul.mubr.f32.gmra.mrb[64].mxu0 %v1743_v33  ;;  %2244 = vperm.xlu1 %4367, %v5406_v26   ;;  %v4592_v26 = vld [vmem:[%s6882_s8 + $0x18] sm:$0xff] }
 0x195   :  { %1929 = vmatmul.mubr.f32.gmra.mrb[64].mxu1 %v1745_v19  ;;  %1838 = vmatprep.mubr.f32.mxu0 %v1748_v59 }
 0x196   :  { %1933 = vmatprep.mubr.f32.mxu1 %v1750_v8  ;;  %2115 = vperm.xlu0 %4368, %v2085_v0  }
 0x197   :  { %2511 = vmatprep.subr.mxu0 %v4591_v15  ;;  %2612 = vmatprep.subr.mxu1 %v4592_v26 }
 0x198   :  { %1839 = vmatmul.mubr.f32.gmra.mrb[66].mxu0 %v1747_v22  ;;  %4369 = vset.pattern.permute.xlu1 %v7041_v47 }
 0x199   :  { %1934 = vmatmul.mubr.f32.gmra.mrb[66].mxu1 %v1749_v24  ;;  %1843 = vmatprep.mubr.f32.mxu0 %v1752_v57  ;;  %v6031_v24 = vld [vmem:[%s6880_s0 + $0x20] sm:$0xff] }
 0x19a   :  { %1938 = vmatprep.mubr.f32.mxu1 %v1754_v20  ;;  %2176 = vperm.xlu1 %4369, %v4593_v58  }
 0x19b   :  { %4371 = vset.pattern.permute.xlu0 %v7037_v62 }
 0x19c   :  { %1844 = vmatmul.mubr.f32.gmra.mrb[68].mxu0 %v1751_v38  ;;  %2248 = vperm.xlu0 %4371, %v4593_v58   ;;  %v6039_v38 = vld [vmem:[%s6880_s0 + $0x30] sm:$0xff] }
 0x19d   :  { %1939 = vmatmul.mubr.f32.gmra.mrb[68].mxu1 %v1753_v2  ;;  %1848 = vmatprep.mubr.f32.mxu0 %v1756_v53  ;;  %v6045_v53 = vld [vmem:[%s6880_s0 + $0x28] sm:$0xff] }
 0x19e   :  { %1943 = vmatprep.mubr.f32.mxu1 %v1758_v31  ;;  %4370 = vset.pattern.permute.xlu1 %v7044_v54 }
 0x19f   :  { %2150 = vperm.xlu1 %4370, %v4594_v6  }
 0x1a0   :  { %1849 = vmatmul.mubr.f32.gmra.mrb[70].mxu0 %v1755_v27  ;;  %2252 = vperm.xlu0 %4371, %v4594_v6   ;;  %v6051_v27 = vld [vmem:[%s6880_s0 + $0x38] sm:$0xff] }
 0x1a1   :  { %1944 = vmatmul.mubr.f32.gmra.mrb[70].mxu1 %v1757_v40  ;;  %2355 = vmatprep.mubr.f32.mxu0 %v7012_v43 }
 0x1a2   :  { %2456 = vmatprep.mubr.f32.mxu1 %v7012_v43 }
 0x1a3   :  { %4372 = vset.pattern.permute.xlu1 %v7045_v17  ;;  %v6002_v17 = vpop.permute.xlu1 %2207 }
 0x1a4   :  { %2120 = vperm.xlu1 %4372, %v2086_v10   ;;  %3395 = vperm.xlu0 %4371, %v3383_v35  }
 0x1a7   :  { %v6034_v26 = vpop.permute.xlu1 %2212 }
 0x1a8   :  { %4373 = vset.pattern.permute.xlu1 %v7041_v47  ;;  %3405 = vperm.xlu0 %4371, %v3385_v11  }
 0x1a9   :  { %2180 = vperm.xlu1 %4373, %v4594_v6  }
 0x1ac   :  { %3415 = vperm.xlu0 %4371, %v3387_v29  }
 0x1ad   :  { %4374 = vset.pattern.permute.xlu1 %v7037_v62 }
 0x206   :  { %v943_v50 = vpop.f32.mrb[24].mxu0  ;;  %v1044_v14 = vpop.f32.mrb[24].mxu1 }
 0x207   :  { %v945_v45 = vpop.f32.mrb[25].mxu0  ;;  %v1046_v46 = vpop.f32.mrb[25].mxu1  ;;  %v1299_v18 = vmul.f32 %v6007_v60, %v943_v50  ;;  %v1301_v34 = vmul.f32 %v6013_v21, %v1044_v14  ;;  %v6057_v50 = vld [vmem:[%s6880_s0 + $0x40] sm:$0xff] }
 0x208   :  { %v1300_v7 = vmul.f32 %v6019_v13, %v945_v45  ;;  %v1302_v55 = vmul.f32 %v6025_v48, %v1046_v46 }
 0x20a   :  { %v949_v28 = vpop.f32.mrb[26].mxu0  ;;  %v1050_v37 = vpop.f32.mrb[26].mxu1 }
 0x20b   :  { %v951_v61 = vpop.f32.mrb[27].mxu0  ;;  %v1052_v39 = vpop.f32.mrb[27].mxu1  ;;  %v1303_v57 = vmul.f32 %v6031_v24, %v949_v28  ;;  %v1305_v2 = vmul.f32 %v6039_v38, %v1050_v37  ;;  %v6063_v28 = vld [vmem:[%s6880_s0 + $0x50] sm:$0xff] }
 0x20c   :  { %v1304_v31 = vmul.f32 %v6045_v53, %v951_v61  ;;  %v1306_v40 = vmul.f32 %v6051_v27, %v1052_v39 }
 0x20e   :  { %v955_v47 = vpop.f32.mrb[28].mxu0  ;;  %v1056_v16 = vpop.f32.mrb[28].mxu1 }
 0x20f   :  { %v5972_v30 = vpop.f32.mrb[29].mxu0  ;;  %v5974_v42 = vpop.f32.mrb[29].mxu1  ;;  %v1307_v14 = vmul.f32 %v6057_v50, %v955_v47  ;;  %v1309_v37 = vmul.f32 %v6063_v28, %v1056_v16 }
 0x212   :  { %v5976_v23 = vpop.f32.mrb[30].mxu0  ;;  %v5978_v1 = vpop.f32.mrb[30].mxu1 }
 0x213   :  { %v5980_v62 = vpop.f32.mrb[31].mxu0  ;;  %v5982_v36 = vpop.f32.mrb[31].mxu1 }
 0x216   :  { %v5986_v44 = vpop.f32.mrb[32].mxu0  ;;  %v5988_v12 = vpop.f32.mrb[32].mxu1 }
 0x217   :  { %v5990_v32 = vpop.f32.mrb[33].mxu0  ;;  %v5992_v9 = vpop.f32.mrb[33].mxu1 }
 0x21a   :  { %v5994_v54 = vpop.f32.mrb[34].mxu0  ;;  %v5996_v25 = vpop.f32.mrb[34].mxu1 }
 0x21b   :  { %v5998_v52 = vpop.f32.mrb[35].mxu0  ;;  %v6000_v5 = vpop.f32.mrb[35].mxu1 }
 0x21e   :  { %v1163_v63 = vpop.f32.mrb[36].mxu0  ;;  %v1264_v33 = vpop.f32.mrb[36].mxu1 }
 0x21f   :  { %v1323_v41 = vadd.f32 %v1299_v18, %v1163_v63  ;;  %v1325_v19 = vadd.f32 %v1301_v34, %v1264_v33  ;;  %v1165_v59 = vpop.f32.mrb[37].mxu0  ;;  %v1266_v8 = vpop.f32.mrb[37].mxu1  ;;  %v6069_v18 = vld [vmem:[%s6880_s0 + $0x48] sm:$0xff]  ;;  %v6076_v34 = vld [vmem:[%s6880_s0 + $0x58] sm:$0xff] }
 0x220   :  { %v1324_v0 = vadd.f32 %v1300_v7, %v1165_v59  ;;  %v1326_v22 = vadd.f32 %v1302_v55, %v1266_v8  ;;  %v1308_v47 = vmul.f32 %v6069_v18, %v5972_v30  ;;  %v1310_v7 = vmul.f32 %v6076_v34, %v5974_v42  ;;  %v6080_v8 = vpop.permute.xlu1 %2217 }
 0x221   :  { %v3494_v20 = vmul.f32 -1.442695, %v1323_v41  ;;  %v3496_v15 = vmul.f32 -1.442695, %v1325_v19 }
 0x222   :  { %v3495_v58 = vmul.f32 -1.442695, %v1324_v0  ;;  %v3497_v4 = vmul.f32 -1.442695, %v1326_v22  ;;  %v1169_v3 = vpop.f32.mrb[38].mxu0  ;;  %v6085_v22 = vld [vmem:[%s6880_s0 + $0x60] sm:$0xff] }
 0x223   :  { %4387 = vpow2.f32 %v3494_v20  ;;  %v1327_v51 = vadd.f32 %v1303_v57, %v1169_v3  ;;  %v1270_v6 = vpop.f32.mrb[38].mxu1  ;;  %v1171_v10 = vpop.f32.mrb[39].mxu0  ;;  %v1311_v42 = vmul.f32 %v6085_v22, %v5976_v23 }
 0x224   :  { %4389 = vpow2.f32 %v3496_v15  ;;  %v1329_v35 = vadd.f32 %v1305_v2, %v1270_v6  ;;  %v1328_v11 = vadd.f32 %v1304_v31, %v1171_v10  ;;  %v1272_v29 = vpop.f32.mrb[39].mxu1  ;;  %v6092_v15 = vld [vmem:[%s6880_s0 + $0x70] sm:$0xff]  ;;  %v6099_v31 = vld [vmem:[%s6880_s0 + $0x68] sm:$0xff] }
 0x225   :  { %4391 = vpow2.f32 %v3495_v58  ;;  %v3498_v45 = vmul.f32 -1.442695, %v1327_v51  ;;  %v1330_v46 = vadd.f32 %v1306_v40, %v1272_v29  ;;  %v1313_v2 = vmul.f32 %v6092_v15, %v5978_v1  ;;  %v6106_v40 = vld [vmem:[%s6880_s0 + $0x78] sm:$0xff]  ;;  %v6117_v29 = vpop.permute.xlu1 %2130 }
 0x226   :  { %4393 = vpow2.f32 %v3497_v4  ;;  %v3500_v61 = vmul.f32 -1.442695, %v1329_v35  ;;  %v3499_v39 = vmul.f32 -1.442695, %v1328_v11  ;;  %v1312_v58 = vmul.f32 %v6099_v31, %v5980_v62  ;;  %v6113_v62 = vld [vmem:[%s6880_s0 + $0x80] sm:$0xff] }
 0x227   :  { %4395 = vpow2.f32 %v3498_v45  ;;  %v3501_v16 = vmul.f32 -1.442695, %v1330_v46  ;;  %v1175_v55 = vpop.f32.mrb[40].mxu0  ;;  %v1276_v63 = vpop.f32.mrb[40].mxu1  ;;  %v1314_v51 = vmul.f32 %v6106_v40, %v5982_v36  ;;  %v1315_v11 = vmul.f32 %v6113_v62, %v5986_v44 }
 0x228   :  { %4397 = vpow2.f32 %v3500_v61  ;;  %v1331_v33 = vadd.f32 %v1307_v14, %v1175_v55  ;;  %v1333_v41 = vadd.f32 %v1309_v37, %v1276_v63  ;;  %v1177_v19 = vpop.f32.mrb[41].mxu0  ;;  %v1278_v59 = vpop.f32.mrb[41].mxu1  ;;  %v6126_v37 = vld [vmem:[%s6880_s0 + $0x90] sm:$0xff]  ;;  %v6142_v55 = vld [vmem:[%s6880_s0 + $0x98] sm:$0xff] }
 0x229   :  { %4399 = vpow2.f32 %v3499_v39  ;;  %v1332_v30 = vadd.f32 %v1308_v47, %v1177_v19  ;;  %v1334_v0 = vadd.f32 %v1310_v7, %v1278_v59  ;;  %v1317_v61 = vmul.f32 %v6126_v37, %v5988_v12  ;;  %v6135_v7 = vld [vmem:[%s6880_s0 + $0x88] sm:$0xff]  ;;  %v6149_v19 = vld [vmem:[%s6880_s0 + $0xa0] sm:$0xff] }
 0x22a   :  { %4401 = vpow2.f32 %v3501_v16  ;;  %v3502_v57 = vmul.f32 -1.442695, %v1331_v33  ;;  %v3504_v20 = vmul.f32 -1.442695, %v1333_v41  ;;  %v1316_v16 = vmul.f32 %v6135_v7, %v5990_v32 }
 0x22b   :  { %v3503_v23 = vmul.f32 -1.442695, %v1332_v30  ;;  %v3505_v4 = vmul.f32 -1.442695, %v1334_v0  ;;  %v1181_v3 = vpop.f32.mrb[42].mxu0  ;;  %v1318_v12 = vmul.f32 %v6142_v55, %v5992_v9  ;;  %v1319_v32 = vmul.f32 %v6149_v19, %v5994_v54 }
 0x22c   :  { %4403 = vpow2.f32 %v3502_v57  ;;  %v1335_v1 = vadd.f32 %v1311_v42, %v1181_v3  ;;  %v1282_v6 = vpop.f32.mrb[42].mxu1  ;;  %v1183_v10 = vpop.f32.mrb[43].mxu0 }
 0x22d   :  { %v4388_v35 = vpop.eup %4387  ;;  %4405 = vpow2.f32 %v3504_v20  ;;  %v6119_v14 = vadd.f32 %v1313_v2, %v1282_v6  ;;  %v6121_v45 = vadd.f32 %v1312_v58, %v1183_v10  ;;  %v1284_v36 = vpop.f32.mrb[43].mxu1  ;;  %v6163_v10 = vld [vmem:[%s6880_s0 + $0xa8] sm:$0xff] }
 0x22e   :  { %v4390_v46 = vpop.eup %4389  ;;  %v1419_v39 = vadd.f32 1.0, %v4388_v35  ;;  %4407 = vpow2.f32 %v3503_v23  ;;  %v6130_v44 = vadd.f32 %v1314_v51, %v1284_v36  ;;  %v1320_v35 = vmul.f32 %v6163_v10, %v5998_v52 }
 0x22f   :  { %v4392_v47 = vpop.eup %4391  ;;  %v1421_v63 = vadd.f32 1.0, %v4390_v46  ;;  %4409 = vpow2.f32 %v3505_v4  ;;  %v1187_v33 = vpop.f32.mrb[44].mxu0  ;;  %v6156_v4 = vld [vmem:[%s6880_s0 + $0xb0] sm:$0xff] }
 0x230   :  { %v4394_v41 = vpop.eup %4393  ;;  %4411 = vrcp.f32 %v1419_v39  ;;  %v1420_v59 = vadd.f32 1.0, %v4392_v47  ;;  %v1339_v30 = vadd.f32 %v1315_v11, %v1187_v33  ;;  %v1288_v0 = vpop.f32.mrb[44].mxu1  ;;  %v1321_v54 = vmul.f32 %v6156_v4, %v5996_v25  ;;  %v6170_v11 = vld [vmem:[%s6880_s0 + $0xb8] sm:$0xff] }
 0x231   :  { %v1189_v42 = vpop.f32.mrb[45].mxu0  ;;  %v4396_v57 = vpop.eup %4395  ;;  %4413 = vrcp.f32 %v1421_v63  ;;  %v1422_v9 = vadd.f32 1.0, %v4394_v41  ;;  %v1341_v20 = vadd.f32 %v1317_v61, %v1288_v0  ;;  %v1322_v25 = vmul.f32 %v6170_v11, %v6000_v5 }
 0x232   :  { %v1340_v2 = vadd.f32 %v1316_v16, %v1189_v42  ;;  %v1290_v58 = vpop.f32.mrb[45].mxu1  ;;  %v4398_v23 = vpop.eup %4397  ;;  %4415 = vrcp.f32 %v1420_v59  ;;  %v1423_v3 = vadd.f32 1.0, %v4396_v57  ;;  %v3506_v16 = vmul.f32 -1.442695, %v1335_v1 }
 0x233   :  { %v1342_v51 = vadd.f32 %v1318_v12, %v1290_v58  ;;  %v4400_v6 = vpop.eup %4399  ;;  %4417 = vrcp.f32 %v1422_v9  ;;  %v1425_v36 = vadd.f32 1.0, %v4398_v23  ;;  %v6174_v46 = vpop.permute.xlu1 %2160 }
 0x234   :  { %v1193_v61 = vpop.f32.mrb[46].mxu0  ;;  %v4402_v39 = vpop.eup %4401  ;;  %4419 = vrcp.f32 %v1423_v3  ;;  %v1424_v47 = vadd.f32 1.0, %v4400_v6  ;;  %v3508_v6 = vmul.f32 -1.442695, %v6119_v14 }
 0x235   :  { %v1343_v12 = vadd.f32 %v1319_v32, %v1193_v61  ;;  %v1294_v63 = vpop.f32.mrb[46].mxu1  ;;  %v1195_v52 = vpop.f32.mrb[47].mxu0  ;;  %4421 = vrcp.f32 %v1425_v36  ;;  %v1426_v33 = vadd.f32 1.0, %v4402_v39  ;;  %v3509_v61 = vmul.f32 -1.442695, %v6130_v44 }
 0x236   :  { %v1345_v41 = vadd.f32 %v1321_v54, %v1294_v63  ;;  %v1344_v59 = vadd.f32 %v1320_v35, %v1195_v52  ;;  %v1296_v0 = vpop.f32.mrb[47].mxu1  ;;  %v4404_v42 = vpop.eup %4403  ;;  %4423 = vrcp.f32 %v1424_v47  ;;  %v3507_v35 = vmul.f32 -1.442695, %v6121_v45 }
 0x237   :  { %v6176_v5 = vadd.f32 %v1322_v25, %v1296_v0  ;;  %v4406_v57 = vpop.eup %4405  ;;  %4425 = vrcp.f32 %v1426_v33  ;;  %v1427_v9 = vadd.f32 1.0, %v4404_v42  ;;  %v6178_v1 = vpop.permute.xlu0 %2005  ;;  %v3510_v47 = vmul.f32 -1.442695, %v1339_v30 }
 0x238   :  { %v4408_v58 = vpop.eup %4407  ;;  %v1429_v23 = vadd.f32 1.0, %v4406_v57  ;;  %4427 = vpow2.f32 %v3506_v16  ;;  %v6181_v36 = vpop.permute.xlu1 %2134  ;;  %v3512_v52 = vmul.f32 -1.442695, %v1341_v20  ;;  %v3511_v33 = vmul.f32 -1.442695, %v1340_v2 }
 0x239   :  { %v4410_v3 = vpop.eup %4409  ;;  %v1428_v32 = vadd.f32 1.0, %v4408_v58  ;;  %4429 = vrcp.f32 %v1427_v9  ;;  %v3513_v0 = vmul.f32 -1.442695, %v1342_v51  ;;  %v3514_v42 = vmul.f32 -1.442695, %v1343_v12 }
 0x23a   :  { %v4412_v54 = vpop.eup %4411  ;;  %4431 = vrcp.f32 %v1429_v23  ;;  %v3516_v57 = vmul.f32 -1.442695, %v1345_v41 }
 0x23b   :  { %v4414_v25 = vpop.eup %4413  ;;  %4433 = vrcp.f32 %v1428_v32  ;;  %v6185_v63 = vpop.permute.xlu0 %2010  ;;  %v6190_v44 = vmul.f32 %v6007_v60, %v4412_v54 }
 0x23c   :  { %v4416_v39 = vpop.eup %4415  ;;  %4435 = vpow2.f32 %v3508_v6  ;;  %v6187_v45 = vpop.permute.xlu1 %2232  ;;  %v6196_v23 = vmul.f32 %v6013_v21, %v4414_v25 }
 0x23d   :  { %v4418_v16 = vpop.eup %4417  ;;  %4437 = vpow2.f32 %v3507_v35  ;;  %7048 = vst [vmem:[#allocation2_spill] sm:$0xff] %v6190_v44  ;;  %v6199_v12 = vmul.f32 %v6019_v13, %v4416_v39  ;;  %v3515_v39 = vmul.f32 -1.442695, %v1344_v59 }
 0x23e   :  { %v4420_v14 = vpop.eup %4419  ;;  %4439 = vpow2.f32 %v3509_v61  ;;  %7050 = vst [vmem:[#allocation4_spill] sm:$0xff] %v6196_v23  ;;  %v6202_v41 = vmul.f32 %v6025_v48, %v4418_v16 }
 0x23f   :  { %v4422_v9 = vpop.eup %4421  ;;  %v3822_v58 = vpop.f32.mrb[48].mxu0  ;;  %v6193_v30 = vmul.f32 %v6031_v24, %v4420_v14  ;;  %4441 = vpow2.f32 %v3510_v47 }
 0x240   :  { %v4424_v20 = vpop.eup %4423  ;;  %v3872_v2 = vpop.f32.mrb[48].mxu1  ;;  %v6205_v32 = vmul.f32 %v6039_v38, %v4422_v9  ;;  %4443 = vpow2.f32 %v3512_v52  ;;  %v3517_v52 = vmul.f32 -1.442695, %v6176_v5 }
 0x241   :  { %7049 = vst [vmem:[#allocation3_spill] sm:$0xff] %v6193_v30  ;;  %v3823_v51 = vpop.f32.mrb[49].mxu0  ;;  %v4426_v60 = vpop.eup %4425  ;;  %v6208_v21 = vmul.f32 %v6045_v53, %v4424_v20  ;;  %4445 = vpow2.f32 %v3511_v33 }
 0x242   :  { %7051 = vst [vmem:[#allocation5_spill] sm:$0xff] %v6205_v32  ;;  %v3824_v24 = vadd.f32 %v3823_v51, %v3822_v58  ;;  %v3873_v6 = vpop.f32.mrb[49].mxu1  ;;  %v4428_v35 = vpop.eup %4427  ;;  %v6213_v25 = vmul.f32 %v6051_v27, %v4426_v60  ;;  %4447 = vpow2.f32 %v3513_v0  ;;  %v1430_v0 = vadd.f32 1.0, %v4410_v3 }
 0x243   :  { %v3874_v13 = vadd.f32 %v3873_v6, %v3872_v2  ;;  %v6217_v38 = vpop.permute.xlu0 %2015  ;;  %v1431_v61 = vadd.f32 1.0, %v4428_v35  ;;  %v3825_v47 = vpop.f32.mrb[50].mxu0  ;;  %4449 = vpow2.f32 %v3514_v42 }
 0x244   :  { %v6221_v16 = vpop.eup %4429  ;;  %v3875_v27 = vpop.f32.mrb[50].mxu1 }
 0x245   :  { %v6224_v33 = vadd.f32 %v3874_v13, %v3824_v24  ;;  %v3826_v14 = vpop.f32.mrb[51].mxu0  ;;  %v6228_v58 = vpop.eup %4431  ;;  %4451 = vrcp.f32 %v1431_v61 }
 0x246   :  { %v6230_v59 = vpop.permute.xlu1 %2164  ;;  %v3827_v20 = vadd.f32 %v3826_v14, %v3825_v47  ;;  %v3876_v2 = vpop.f32.mrb[51].mxu1  ;;  %4453 = vpow2.f32 %v3516_v57 }
 0x247   :  { %v6232_v51 = vpop.eup %4433  ;;  %v3877_v42 = vadd.f32 %v3876_v2, %v3875_v27  ;;  %4455 = vpow2.f32 %v3515_v39  ;;  %v3828_v60 = vpop.f32.mrb[52].mxu0 }
 0x248   :  { %v4436_v5 = vpop.eup %4435  ;;  %4457 = vpow2.f32 %v3517_v52  ;;  %v3878_v13 = vpop.f32.mrb[52].mxu1 }
 0x249   :  { %v4438_v24 = vpop.eup %4437  ;;  %v1433_v6 = vadd.f32 1.0, %v4436_v5  ;;  %v6234_v35 = vadd.f32 %v3877_v42, %v3827_v20  ;;  %v3829_v48 = vpop.f32.mrb[53].mxu0  ;;  %4459 = vrcp.f32 %v1430_v0 }
 0x24a   :  { %v4440_v3 = vpop.eup %4439  ;;  %v6236_v61 = vpop.permute.xlu0 %2020  ;;  %v1432_v47 = vadd.f32 1.0, %v4438_v24  ;;  %v3830_v14 = vadd.f32 %v3829_v48, %v3828_v60 }
 0x24b   :  { %v3879_v54 = vpop.f32.mrb[53].mxu1  ;;  %v4442_v9 = vpop.eup %4441  ;;  %4461 = vrcp.f32 %v1433_v6  ;;  %v1434_v57 = vadd.f32 1.0, %v4440_v3 }
 0x24c   :  { %v4444_v27 = vpop.eup %4443  ;;  %4463 = vrcp.f32 %v1432_v47  ;;  %v1435_v39 = vadd.f32 1.0, %v4442_v9  ;;  %v6238_v2 = vpop.permute.xlu1 %2138  ;;  %v3880_v52 = vadd.f32 %v3879_v54, %v3878_v13 }
 0x24d   :  { %v3831_v20 = vpop.f32.mrb[54].mxu0  ;;  %v4446_v42 = vpop.eup %4445  ;;  %4465 = vrcp.f32 %v1434_v57  ;;  %v1437_v5 = vadd.f32 1.0, %v4444_v27 }
 0x24e   :  { %v3881_v53 = vpop.f32.mrb[54].mxu1  ;;  %v3832_v23 = vpop.f32.mrb[55].mxu0  ;;  %v1436_v0 = vadd.f32 1.0, %v4446_v42  ;;  %v6240_v24 = vadd.f32 %v3880_v52, %v3830_v14  ;;  %4467 = vrcp.f32 %v1435_v39 }
 0x24f   :  { %v4448_v32 = vpop.eup %4447  ;;  %v3833_v48 = vadd.f32 %v3832_v23, %v3831_v20  ;;  %v3882_v60 = vpop.f32.mrb[55].mxu1  ;;  %4469 = vrcp.f32 %v1437_v5  ;;  %v6253_v20 = vmul.f32 %v6057_v50, %v6221_v16 }
 0x250   :  { %v4450_v6 = vpop.eup %4449  ;;  %v1438_v3 = vadd.f32 1.0, %v4448_v32  ;;  %v3883_v47 = vadd.f32 %v3882_v60, %v3881_v53  ;;  %v6242_v44 = vpop.permute.xlu0 %2025  ;;  %4471 = vrcp.f32 %v1436_v0 }
 0x251   :  { %v4452_v9 = vpop.eup %4451  ;;  %v1439_v54 = vadd.f32 1.0, %v4450_v6  ;;  %v3834_v13 = vpop.f32.mrb[56].mxu0  ;;  %7053 = vst [vmem:[#allocation7_spill] sm:$0xff] %v6253_v20 }
 0x252   :  { %v4454_v57 = vpop.eup %4453  ;;  %v6244_v27 = vadd.f32 %v3883_v47, %v3833_v48  ;;  %v3884_v30 = vpop.f32.mrb[56].mxu1  ;;  %v6247_v14 = vmul.f32 %v6085_v22, %v4452_v9 }
 0x253   :  { %v3835_v42 = vpop.f32.mrb[57].mxu0  ;;  %v4456_v23 = vpop.eup %4455  ;;  %4473 = vrcp.f32 %v1439_v54  ;;  %v1441_v39 = vadd.f32 1.0, %v4454_v57 }
 0x254   :  { %7052 = vst [vmem:[#allocation6_spill] sm:$0xff] %v6247_v14  ;;  %v6249_v32 = vpop.permute.xlu1 %2105  ;;  %v3836_v53 = vadd.f32 %v3835_v42, %v3834_v13  ;;  %v3885_v52 = vpop.f32.mrb[57].mxu1  ;;  %4475 = vrcp.f32 %v1438_v3  ;;  %v1440_v0 = vadd.f32 1.0, %v4456_v23 }
 0x255   :  { %v4458_v5 = vpop.eup %4457  ;;  %v3886_v48 = vadd.f32 %v3885_v52, %v3884_v30  ;;  %4477 = vrcp.f32 %v1441_v39  ;;  %v3837_v22 = vpop.f32.mrb[58].mxu0  ;;  %v6261_v30 = vmul.f32 %v6063_v28, %v6228_v58 }
 0x256   :  { %v4460_v60 = vpop.eup %4459  ;;  %v1442_v6 = vadd.f32 1.0, %v4458_v5  ;;  %4479 = vrcp.f32 %v1440_v0  ;;  %v3887_v13 = vpop.f32.mrb[58].mxu1 }
 0x257   :  { %v4462_v9 = vpop.eup %4461  ;;  %v6257_v54 = vadd.f32 %v3886_v48, %v3836_v53  ;;  %v3838_v57 = vpop.f32.mrb[59].mxu0  ;;  %7054 = vst [vmem:[#allocation8_spill] sm:$0xff] %v6261_v30  ;;  %v6270_v53 = vmul.f32 %v6069_v18, %v6232_v51  ;;  %v6278_v48 = vmul.f32 %v6076_v34, %v4460_v60 }
 0x258   :  { %v4464_v42 = vpop.eup %4463  ;;  %4481 = vrcp.f32 %v1442_v6  ;;  %v3839_v50 = vadd.f32 %v3838_v57, %v3837_v22  ;;  %v3888_v16 = vpop.f32.mrb[59].mxu1  ;;  %v6264_v3 = vmul.f32 %v6092_v15, %v4462_v9 }
 0x259   :  { %v4466_v23 = vpop.eup %4465  ;;  %v6266_v39 = vpop.permute.xlu0 %2030  ;;  %v3889_v52 = vadd.f32 %v3888_v16, %v3887_v13  ;;  %v6275_v0 = vmul.f32 %v6099_v31, %v4464_v42 }
 0x25a   :  { %7055 = vst [vmem:[#allocation9_spill] sm:$0xff] %v6264_v3  ;;  %v6272_v5 = vpop.permute.xlu1 %2168  ;;  %v6281_v28 = vmul.f32 %v6106_v40, %v4466_v23  ;;  %v4468_v58 = vpop.eup %4467 }
 0x25b   :  { %v6285_v6 = vadd.f32 %v3889_v52, %v3839_v50  ;;  %v4470_v22 = vpop.eup %4469  ;;  %v6294_v40 = vmul.f32 %v6113_v62, %v4468_v58 }
 0x25c   :  { %v4472_v51 = vpop.eup %4471  ;;  %v6304_v23 = vmul.f32 %v6126_v37, %v4470_v22 }
 0x25d   :  { %v4474_v9 = vpop.eup %4473  ;;  %v6291_v60 = vpop.permute.xlu0 %2095  ;;  %7056 = vst [vmem:[#allocation10_spill] sm:$0xff] %v6294_v40  ;;  %v6310_v62 = vmul.f32 %v6135_v7, %v4472_v51 }
 0x25e   :  { %v4476_v34 = vpop.eup %4475  ;;  %v6297_v13 = vmul.f32 %v6149_v19, %v4474_v9  ;;  %v6299_v42 = vpop.permute.xlu1 %2240  ;;  %7058 = vst [vmem:[#allocation12_spill] sm:$0xff] %v6304_v23 }
 0x25f   :  { %v4478_v57 = vpop.eup %4477  ;;  %v3922_v47 = vpop.f32.mrb[60].mxu0  ;;  %7060 = vst [vmem:[#allocation14_spill] sm:$0xff] %v6310_v62  ;;  %v6316_v31 = vmul.f32 %v6142_v55, %v4476_v34 }
 0x260   :  { %7057 = vst [vmem:[#allocation11_spill] sm:$0xff] %v6297_v13  ;;  %v4480_v50 = vpop.eup %4479  ;;  %v6307_v52 = vmul.f32 %v6156_v4, %v4478_v57  ;;  %v3972_v58 = vpop.f32.mrb[60].mxu1  ;;  %v1950_v57 = vmul.f32 %v6234_v35, %v6234_v35 }
 0x261   :  { %v6313_v19 = vmul.f32 %v6163_v10, %v4480_v50  ;;  %v3923_v9 = vpop.f32.mrb[61].mxu0  ;;  %7062 = vst [vmem:[#allocation16_spill] sm:$0xff] %v6316_v31  ;;  %v3973_v22 = vpop.f32.mrb[61].mxu1 }
 0x262   :  { %7059 = vst [vmem:[#allocation13_spill] sm:$0xff] %v6307_v52  ;;  %v4482_v15 = vpop.eup %4481  ;;  %v3924_v4 = vadd.f32 %v3923_v9, %v3922_v47  ;;  %v6325_v51 = vpop.permute.xlu0 %2100  ;;  %v3974_v10 = vadd.f32 %v3973_v22, %v3972_v58 }
 0x263   :  { %7061 = vst [vmem:[#allocation15_spill] sm:$0xff] %v6313_v19  ;;  %v6319_v16 = vmul.f32 %v6170_v11, %v4482_v15  ;;  %v6329_v50 = vpop.permute.xlu1 %2110  ;;  %v3925_v55 = vpop.f32.mrb[62].mxu0  ;;  %v1949_v11 = vmul.f32 %v6224_v33, %v6224_v33 }
 0x264   :  { %v1921_v34 = vadd.f32 %v3974_v10, %v3924_v4  ;;  %v3975_v15 = vpop.f32.mrb[62].mxu1  ;;  %v3926_v37 = vpop.f32.mrb[63].mxu0 }
 0x265   :  { %7063 = vst [vmem:[#allocation17_spill] sm:$0xff] %v6319_v16  ;;  %v3927_v47 = vadd.f32 %v3926_v37, %v3925_v55  ;;  %v3976_v9 = vpop.f32.mrb[63].mxu1 }
 0x266   :  { %v1955_v18 = vsub.f32 %v1921_v34, %v1949_v11  ;;  %v3977_v23 = vadd.f32 %v3976_v9, %v3975_v15  ;;  %v6333_v7 = vpop.permute.xlu0 %2222  ;;  %v1951_v15 = vmul.f32 %v6240_v24, %v6240_v24 }
 0x267   :  { %v3928_v52 = vpop.f32.mrb[64].mxu0  ;;  %v6337_v4 = vpop.permute.xlu1 %2146 }
 0x268   :  { %v1961_v58 = vadd.f32 1e-05, %v1955_v18  ;;  %v1926_v22 = vadd.f32 %v3977_v23, %v3927_v47  ;;  %v3978_v40 = vpop.f32.mrb[64].mxu1  ;;  %v3929_v13 = vpop.f32.mrb[65].mxu0 }
 0x269   :  { %v3930_v10 = vadd.f32 %v3929_v13, %v3928_v52  ;;  %v3979_v31 = vpop.f32.mrb[65].mxu1 }
 0x26a   :  { %4483 = vrsqrt.f32 %v1961_v58  ;;  %v1956_v16 = vsub.f32 %v1926_v22, %v1950_v57  ;;  %v3980_v37 = vadd.f32 %v3979_v31, %v3978_v40  ;;  %v6341_v47 = vpop.permute.xlu0 %2236  ;;  %v1952_v40 = vmul.f32 %v6244_v27, %v6244_v27 }
 0x26b   :  { %v3931_v55 = vpop.f32.mrb[66].mxu0  ;;  %v6343_v13 = vpop.permute.xlu1 %2244  ;;  %v2153_v22 = vmul.f32 %v6117_v29, %v6224_v33 }
 0x26c   :  { %v1962_v34 = vadd.f32 1e-05, %v1956_v16  ;;  %v1931_v11 = vadd.f32 %v3980_v37, %v3930_v10  ;;  %v3981_v18 = vpop.f32.mrb[66].mxu1  ;;  %v3932_v23 = vpop.f32.mrb[67].mxu0 }
 0x26d   :  { %v3933_v9 = vadd.f32 %v3932_v23, %v3931_v55  ;;  %v3982_v62 = vpop.f32.mrb[67].mxu1  ;;  %v2183_v3 = vadd.f32 %v6174_v46, %v2153_v22  ;;  %v1954_v46 = vmul.f32 %v6285_v6, %v6285_v6 }
 0x26e   :  { %4485 = vrsqrt.f32 %v1962_v34  ;;  %v1957_v19 = vsub.f32 %v1931_v11, %v1951_v15  ;;  %v3983_v30 = vadd.f32 %v3982_v62, %v3981_v18  ;;  %v2143_v11 = vpop.permute.xlu0 %2142 }
 0x26f   :  { %v3934_v52 = vpop.f32.mrb[68].mxu0 }
 0x270   :  { %v1963_v57 = vadd.f32 1e-05, %v1957_v19  ;;  %v1936_v31 = vadd.f32 %v3983_v30, %v3933_v9  ;;  %v3984_v16 = vpop.f32.mrb[68].mxu1  ;;  %v3935_v58 = vpop.f32.mrb[69].mxu0  ;;  %v1953_v30 = vmul.f32 %v6257_v54, %v6257_v54 }
 0x271   :  { %v3936_v10 = vadd.f32 %v3935_v58, %v3934_v52  ;;  %v3985_v37 = vpop.f32.mrb[69].mxu1 }
 0x272   :  { %4487 = vrsqrt.f32 %v1963_v57  ;;  %v1958_v55 = vsub.f32 %v1936_v31, %v1952_v40  ;;  %v3986_v34 = vadd.f32 %v3985_v37, %v3984_v16  ;;  %v2154_v57 = vmul.f32 %v6181_v36, %v6234_v35  ;;  %v6355_v31 = vpop.permute.xlu1 %2176 }
 0x273   :  { %v3937_v62 = vpop.f32.mrb[70].mxu0 }
 0x274   :  { %v4484_v15 = vpop.eup %4483  ;;  %v1964_v18 = vadd.f32 1e-05, %v1958_v55  ;;  %v1941_v23 = vadd.f32 %v3986_v34, %v3936_v10  ;;  %v3987_v19 = vpop.f32.mrb[70].mxu1 }
 0x275   :  { %v3938_v9 = vpop.f32.mrb[71].mxu0  ;;  %v2033_v20 = vmul.f32 %v4484_v15, %v6178_v1  ;;  %v3988_v52 = vpop.f32.mrb[71].mxu1  ;;  %v2255_v1 = vmul.f32 %v6187_v45, %v2183_v3 }
 0x276   :  { %v3939_v29 = vadd.f32 %v3938_v9, %v3937_v62  ;;  %4489 = vrsqrt.f32 %v1964_v18  ;;  %v1959_v40 = vsub.f32 %v1941_v23, %v1953_v30  ;;  %v3989_v16 = vadd.f32 %v3988_v52, %v3987_v19  ;;  %v2173_v62 = vpop.permute.xlu0 %2172  ;;  %v2151_v18 = vpop.permute.xlu1 %2150 }
 0x277   :  { %v2087_v58 = vmul.f32 %v2033_v20, %v6224_v33  ;;  %v2225_v10 = vmul.f32 %v5970_v49, %v2033_v20  ;;  %v2184_v33 = vadd.f32 %v6230_v59, %v2154_v57  ;;  %v2155_v20 = vmul.f32 %v6238_v2, %v6240_v24  ;;  %v4620_v59 = vld [vmem:[%s6882_s8 + $0x10] sm:$0xff] }
 0x278   :  { %v4486_v37 = vpop.eup %4485  ;;  %v1965_v55 = vadd.f32 1e-05, %v1959_v40  ;;  %v1946_v34 = vadd.f32 %v3989_v16, %v3939_v29  ;;  %v2156_v29 = vmul.f32 %v2143_v11, %v6244_v27 }
 0x279   :  { %v2123_v22 = vsub.f32 %v6291_v60, %v2087_v58  ;;  %3518 = vmatmul.mubr.msk.f32.vlgmr.msra.gmra.mrb[72].mxu0 %vm858_vm0, %v2225_v10  ;;  %3524 = vmatmul.mubr.msk.f32.vlgmr.msra.gmra.mrb[72].mxu1 %vm858_vm0, %v2225_v10  ;;  %v2034_v36 = vmul.f32 %v4486_v37, %v6185_v63  ;;  %v4619_v63 = vld [vmem:[%s6882_s8] sm:$0xff]  ;;  %v2256_v9 = vmul.f32 %v6341_v47, %v2184_v33 }
 0x27a   :  { %4491 = vrsqrt.f32 %v1965_v55  ;;  %v1960_v15 = vsub.f32 %v1946_v34, %v1954_v46  ;;  %2361 = vmatprep.mubr.f32.mxu0 %v7012_v43  ;;  %2462 = vmatprep.mubr.f32.mxu1 %v7012_v43  ;;  %v2116_v16 = vpop.permute.xlu0 %2115  ;;  %v2186_v58 = vadd.f32 %v2173_v62, %v2156_v29  ;;  %v2121_v10 = vpop.permute.xlu1 %2120 }
 0x27b   :  { %v2088_v45 = vmul.f32 %v2034_v36, %v6234_v35  ;;  %v2226_v3 = vmul.f32 %v5984_v56, %v2034_v36  ;;  %2512 = vmatpush1.msra.mxu0 %v4619_v63  ;;  %2613 = vmatpush1.msra.mxu1 %v4620_v59  ;;  %v2261_v2 = vmul.f32 %v5970_v49, %v2123_v22 }
 0x27c   :  { %v4488_v60 = vpop.eup %4487  ;;  %v1966_v23 = vadd.f32 1e-05, %v1960_v15  ;;  %v2185_v49 = vadd.f32 %v6272_v5, %v2155_v20  ;;  %v2258_v46 = vmul.f32 %v6343_v13, %v2186_v58 }
 0x27d   :  { %3519 = vmatmul.mubr.msk.f32.gmra.mrb[74].mxu0 %vm858_vm0, %v2226_v3  ;;  %3525 = vmatmul.mubr.msk.f32.gmra.mrb[74].mxu1 %vm858_vm0, %v2226_v3  ;;  %v2035_v35 = vmul.f32 %v4488_v60, %v6217_v38  ;;  %v6383_v30 = vadd.f32 %v2261_v2, %v2255_v1  ;;  %v2124_v19 = vsub.f32 %v6325_v51, %v2088_v45 }
 0x27e   :  { %4493 = vrsqrt.f32 %v1966_v23  ;;  %2367 = vmatprep.mubr.f32.mxu0 %v7012_v43  ;;  %2468 = vmatprep.mubr.f32.mxu1 %v7012_v43  ;;  %v2257_v37 = vmul.f32 %v6299_v42, %v2185_v49  ;;  %v2249_v1 = vpop.permute.xlu0 %2248  ;;  %v2181_v33 = vpop.permute.xlu1 %2180 }
 0x27f   :  { %v2089_v52 = vmul.f32 %v2035_v35, %v6240_v24  ;;  %v2227_v57 = vmul.f32 %v6002_v17, %v2035_v35  ;;  %v2262_v38 = vmul.f32 %v5984_v56, %v2124_v19  ;;  %v2157_v24 = vmul.f32 %v6337_v4, %v6257_v54 }
 0x280   :  { %v4490_v40 = vpop.eup %4489 }
 0x281   :  { %3520 = vmatmul.mubr.msk.f32.gmra.mrb[76].mxu0 %vm858_vm0, %v2227_v57  ;;  %3526 = vmatmul.mubr.msk.f32.gmra.mrb[76].mxu1 %vm858_vm0, %v2227_v57  ;;  %v2036_v51 = vmul.f32 %v4490_v40, %v6236_v61  ;;  %v2268_v47 = vadd.f32 %v2262_v38, %v2256_v9  ;;  %v2125_v11 = vsub.f32 %v6249_v32, %v2089_v52 }
 0x282   :  { %2373 = vmatprep.mubr.f32.mxu0 %v7012_v43  ;;  %2474 = vmatprep.mubr.f32.mxu1 %v7012_v43  ;;  %v2253_v45 = vpop.permute.xlu0 %2252 }
 0x283   :  { %v2090_v56 = vmul.f32 %v2036_v51, %v6244_v27  ;;  %v2228_v5 = vmul.f32 %v6034_v26, %v2036_v51  ;;  %v2263_v61 = vmul.f32 %v6002_v17, %v2125_v11  ;;  %v2187_v27 = vadd.f32 %v6355_v31, %v2157_v24  ;;  %v3384_v51 = vld [vmem:[%s6884_s6 + $0x10] sm:$0xff]  ;;  %v3386_v24 = vld [vmem:[%s6884_s6 + $0x20] sm:$0xff] }
 0x284   :  { %v4492_v55 = vpop.eup %4491  ;;  %v2158_v17 = vmul.f32 %v2151_v18, %v6285_v6 }
 0x285   :  { %3521 = vmatmul.mubr.msk.f32.gmra.mrb[78].mxu0 %vm858_vm0, %v2228_v5  ;;  %3527 = vmatmul.mubr.msk.f32.gmra.mrb[78].mxu1 %vm858_vm0, %v2228_v5  ;;  %v2037_v32 = vmul.f32 %v4492_v55, %v6242_v44  ;;  %v2269_v4 = vadd.f32 %v2263_v61, %v2257_v37  ;;  %v2126_v34 = vsub.f32 %v6329_v50, %v2090_v56  ;;  %v6497_v55 = vld [vmem:[%s6883_s1] sm:$0xff] }
 0x286   :  { %2379 = vmatprep.mubr.f32.mxu0 %v7012_v43  ;;  %2480 = vmatprep.mubr.f32.mxu1 %v7012_v43  ;;  %v2259_v20 = vmul.f32 %v2249_v1, %v2187_v27  ;;  %v6515_v27 = vld [vmem:[%s6883_s1 + $0x18] sm:$0xff] }
 0x287   :  { %v2091_v42 = vmul.f32 %v2037_v32, %v6257_v54  ;;  %v2229_v22 = vmul.f32 %v6080_v8, %v2037_v32  ;;  %v2264_v44 = vmul.f32 %v6034_v26, %v2126_v34  ;;  %v2188_v54 = vadd.f32 %v2181_v33, %v2158_v17 }
 0x288   :  { %v4494_v36 = vpop.eup %4493 }
 0x289   :  { %3522 = vmatmul.mubr.msk.f32.gmra.mrb[80].mxu0 %vm858_vm0, %v2229_v22  ;;  %3528 = vmatmul.mubr.msk.f32.gmra.mrb[80].mxu1 %vm858_vm0, %v2229_v22  ;;  %v2038_v50 = vmul.f32 %v4494_v36, %v6266_v39  ;;  %v2270_v13 = vadd.f32 %v2264_v44, %v2258_v46  ;;  %v2127_v31 = vsub.f32 %v2116_v16, %v2091_v42  ;;  %v3382_v16 = vld [vmem:[%s6884_s6] sm:$0xff]  ;;  %v6509_v46 = vld [vmem:[%s6883_s1 + $0x8] sm:$0xff] }
 0x28a   :  { %2385 = vmatprep.mubr.f32.mxu0 %v7012_v43  ;;  %2486 = vmatprep.mubr.f32.mxu1 %v7012_v43  ;;  %v2260_v63 = vmul.f32 %v2253_v45, %v2188_v54 }
 0x28b   :  { %v2092_v62 = vmul.f32 %v2038_v50, %v6285_v6  ;;  %v2230_v26 = vmul.f32 %v6333_v7, %v2038_v50  ;;  %v2265_v15 = vmul.f32 %v6080_v8, %v2127_v31  ;;  %3390 = vperm.xlu1 %4374, %v3382_v16  }
 0x28d   :  { %3523 = vmatmul.mubr.msk.f32.gmra.mrb[82].mxu0 %vm858_vm0, %v2230_v26  ;;  %3529 = vmatmul.mubr.msk.f32.gmra.mrb[82].mxu1 %vm858_vm0, %v2230_v26  ;;  %v2271_v39 = vadd.f32 %v2265_v15, %v2259_v20  ;;  %v2128_v3 = vsub.f32 %v2121_v10, %v2092_v62  ;;  %v6521_v20 = vld [vmem:[%s6883_s1 + $0x20] sm:$0xff]  ;;  %v6527_v62 = vld [vmem:[%s6883_s1 + $0x30] sm:$0xff] }
 0x28e   :  { %2575 = vmatprep.mubr.f32.mxu0 %v7012_v43  ;;  %2676 = vmatprep.mubr.f32.mxu1 %v7012_v43 }
 0x28f   :  { %v2266_v59 = vmul.f32 %v6333_v7, %v2128_v3  ;;  %3400 = vperm.xlu1 %4374, %v3384_v51  }
 0x291   :  { %3530 = vmatmul.mubr.msk.f32.vlgmr.msra.gmra.mrb[84].mxu0 %vm858_vm0, %v6383_v30  ;;  %3536 = vmatmul.mubr.msk.f32.vlgmr.msra.gmra.mrb[84].mxu1 %vm858_vm0, %v6383_v30  ;;  %v2272_v8 = vadd.f32 %v2266_v59, %v2260_v63  ;;  %v6539_v63 = vld [vmem:[%s6883_s1 + $0x38] sm:$0xff] }
 0x292   :  { %2581 = vmatprep.mubr.f32.mxu0 %v7012_v43  ;;  %2682 = vmatprep.mubr.f32.mxu1 %v7012_v43 }
 0x293   :  { %3410 = vperm.xlu1 %4374, %v3386_v24  }
 0x295   :  { %3531 = vmatmul.mubr.msk.f32.gmra.mrb[86].mxu0 %vm858_vm0, %v2268_v47  ;;  %3537 = vmatmul.mubr.msk.f32.gmra.mrb[86].mxu1 %vm858_vm0, %v2268_v47 }
 0x296   :  { %2587 = vmatprep.mubr.f32.mxu0 %v7012_v43  ;;  %2688 = vmatprep.mubr.f32.mxu1 %v7012_v43 }
 0x299   :  { %3532 = vmatmul.mubr.msk.f32.gmra.mrb[88].mxu0 %vm858_vm0, %v2269_v4  ;;  %3538 = vmatmul.mubr.msk.f32.gmra.mrb[88].mxu1 %vm858_vm0, %v2269_v4  ;;  %v6503_v4 = vld [vmem:[%s6883_s1 + $0x10] sm:$0xff] }
 0x29a   :  { %2593 = vmatprep.mubr.f32.mxu0 %v7012_v43  ;;  %2694 = vmatprep.mubr.f32.mxu1 %v7012_v43 }
 0x29d   :  { %3533 = vmatmul.mubr.msk.f32.gmra.mrb[90].mxu0 %vm858_vm0, %v2270_v13  ;;  %3539 = vmatmul.mubr.msk.f32.gmra.mrb[90].mxu1 %vm858_vm0, %v2270_v13 }
 0x29e   :  { %2599 = vmatprep.mubr.f32.mxu0 %v7012_v43  ;;  %2700 = vmatprep.mubr.f32.mxu1 %v7012_v43 }
 0x2a1   :  { %3534 = vmatmul.mubr.msk.f32.gmra.mrb[92].mxu0 %vm858_vm0, %v2271_v39  ;;  %3540 = vmatmul.mubr.msk.f32.gmra.mrb[92].mxu1 %vm858_vm0, %v2271_v39  ;;  %v6533_v39 = vld [vmem:[%s6883_s1 + $0x28] sm:$0xff] }
 0x2a2   :  { %2605 = vmatprep.mubr.f32.mxu0 %v7012_v43  ;;  %2706 = vmatprep.mubr.f32.mxu1 %v7012_v43 }
 0x2a5   :  { %3535 = vmatmul.mubr.msk.f32.gmra.mrb[94].mxu0 %vm858_vm0, %v2272_v8  ;;  %3541 = vmatmul.mubr.msk.f32.gmra.mrb[94].mxu1 %vm858_vm0, %v2272_v8 }
 0x2a6   :  { %3024 = vmatprep.mubr.f32.mxu0 %v7012_v43  ;;  %3125 = vmatprep.mubr.f32.mxu1 %v7012_v43 }
 0x34c   :  { %v2357_v6 = vpop.f32.mrb[72].mxu0  ;;  %v2458_v7 = vpop.f32.mrb[72].mxu1 }
 0x34d   :  { %v2359_v2 = vpop.f32.mrb[73].mxu0  ;;  %v2460_v60 = vpop.f32.mrb[73].mxu1  ;;  %v2713_v32 = vmul.f32 %v6497_v55, %v2357_v6  ;;  %v2715_v34 = vmul.f32 %v6503_v4, %v2458_v7 }
 0x34e   :  { %v2714_v1 = vmul.f32 %v6509_v46, %v2359_v2  ;;  %v2716_v17 = vmul.f32 %v6515_v27, %v2460_v60  ;;  %v6545_v60 = vld [vmem:[%s6883_s1 + $0x40] sm:$0xff] }
 0x350   :  { %v2363_v18 = vpop.f32.mrb[74].mxu0  ;;  %v2464_v23 = vpop.f32.mrb[74].mxu1 }
 0x351   :  { %v2365_v35 = vpop.f32.mrb[75].mxu0  ;;  %v2466_v30 = vpop.f32.mrb[75].mxu1  ;;  %v2717_v54 = vmul.f32 %v6521_v20, %v2363_v18  ;;  %v2719_v26 = vmul.f32 %v6527_v62, %v2464_v23 }
 0x352   :  { %v2718_v3 = vmul.f32 %v6533_v39, %v2365_v35  ;;  %v2720_v59 = vmul.f32 %v6539_v63, %v2466_v30  ;;  %v6551_v30 = vld [vmem:[%s6883_s1 + $0x50] sm:$0xff] }
 0x354   :  { %v2369_v19 = vpop.f32.mrb[76].mxu0  ;;  %v2470_v9 = vpop.f32.mrb[76].mxu1 }
 0x355   :  { %v6457_v29 = vpop.f32.mrb[77].mxu0  ;;  %v6459_v49 = vpop.f32.mrb[77].mxu1  ;;  %v2721_v18 = vmul.f32 %v6545_v60, %v2369_v19  ;;  %v2723_v24 = vmul.f32 %v6551_v30, %v2470_v9 }
 0x358   :  { %v6461_v52 = vpop.f32.mrb[78].mxu0  ;;  %v6463_v57 = vpop.f32.mrb[78].mxu1 }
 0x359   :  { %v6465_v38 = vpop.f32.mrb[79].mxu0  ;;  %v6467_v40 = vpop.f32.mrb[79].mxu1 }
 0x35c   :  { %v6475_v47 = vpop.f32.mrb[80].mxu0  ;;  %v6477_v11 = vpop.f32.mrb[80].mxu1 }
 0x35d   :  { %v6479_v58 = vpop.f32.mrb[81].mxu0  ;;  %v6481_v10 = vpop.f32.mrb[81].mxu1 }
 0x360   :  { %v6486_v56 = vpop.f32.mrb[82].mxu0  ;;  %v6488_v5 = vpop.f32.mrb[82].mxu1 }
 0x361   :  { %v6490_v37 = vpop.f32.mrb[83].mxu0  ;;  %v6492_v61 = vpop.f32.mrb[83].mxu1 }
 0x364   :  { %v2577_v42 = vpop.f32.mrb[84].mxu0  ;;  %v2678_v22 = vpop.f32.mrb[84].mxu1 }
 0x365   :  { %v2737_v44 = vadd.f32 %v2713_v32, %v2577_v42  ;;  %v2739_v36 = vadd.f32 %v2715_v34, %v2678_v22  ;;  %v2579_v33 = vpop.f32.mrb[85].mxu0  ;;  %v2680_v50 = vpop.f32.mrb[85].mxu1  ;;  %v6564_v22 = vld [vmem:[%s6883_s1 + $0x58] sm:$0xff] }
 0x366   :  { %v2738_v13 = vadd.f32 %v2714_v1, %v2579_v33  ;;  %v2740_v31 = vadd.f32 %v2716_v17, %v2680_v50  ;;  %v6557_v1 = vld [vmem:[%s6883_s1 + $0x48] sm:$0xff]  ;;  %v2724_v9 = vmul.f32 %v6564_v22, %v6459_v49 }
 0x367   :  { %v3542_v15 = vmul.f32 -1.442695, %v2737_v44  ;;  %v3544_v45 = vmul.f32 -1.442695, %v2739_v36  ;;  %v2722_v19 = vmul.f32 %v6557_v1, %v6457_v29 }
 0x368   :  { %v3543_v8 = vmul.f32 -1.442695, %v2738_v13  ;;  %v3545_v6 = vmul.f32 -1.442695, %v2740_v31  ;;  %v2583_v7 = vpop.f32.mrb[86].mxu0  ;;  %v2684_v2 = vpop.f32.mrb[86].mxu1 }
 0x369   :  { %4495 = vpow2.f32 %v3542_v15  ;;  %v2741_v23 = vadd.f32 %v2717_v54, %v2583_v7  ;;  %v2743_v35 = vadd.f32 %v2719_v26, %v2684_v2  ;;  %v2585_v16 = vpop.f32.mrb[87].mxu0  ;;  %v2686_v51 = vpop.f32.mrb[87].mxu1  ;;  %v6571_v26 = vld [vmem:[%s6883_s1 + $0x60] sm:$0xff]  ;;  %v6587_v7 = vld [vmem:[%s6883_s1 + $0x68] sm:$0xff]  ;;  %v6594_v2 = vld [vmem:[%s6883_s1 + $0x78] sm:$0xff] }
 0x36a   :  { %4497 = vpow2.f32 %v3544_v45  ;;  %v2742_v32 = vadd.f32 %v2718_v3, %v2585_v16  ;;  %v2744_v34 = vadd.f32 %v2720_v59, %v2686_v51  ;;  %v2725_v15 = vmul.f32 %v6571_v26, %v6461_v52  ;;  %v6580_v3 = vld [vmem:[%s6883_s1 + $0x70] sm:$0xff] }
 0x36b   :  { %4499 = vpow2.f32 %v3543_v8  ;;  %v3546_v17 = vmul.f32 -1.442695, %v2741_v23  ;;  %v3548_v42 = vmul.f32 -1.442695, %v2743_v35  ;;  %v2727_v59 = vmul.f32 %v6580_v3, %v6463_v57 }
 0x36c   :  { %4501 = vpow2.f32 %v3545_v6  ;;  %v3547_v44 = vmul.f32 -1.442695, %v2742_v32  ;;  %v3549_v36 = vmul.f32 -1.442695, %v2744_v34  ;;  %v2589_v33 = vpop.f32.mrb[88].mxu0  ;;  %v2690_v50 = vpop.f32.mrb[88].mxu1  ;;  %v2726_v52 = vmul.f32 %v6587_v7, %v6465_v38 }
 0x36d   :  { %4503 = vpow2.f32 %v3546_v17  ;;  %v2745_v13 = vadd.f32 %v2721_v18, %v2589_v33  ;;  %v2747_v31 = vadd.f32 %v2723_v24, %v2690_v50  ;;  %v2591_v29 = vpop.f32.mrb[89].mxu0  ;;  %v2692_v54 = vpop.f32.mrb[89].mxu1  ;;  %v2728_v18 = vmul.f32 %v6594_v2, %v6467_v40  ;;  %v6607_v40 = vld [vmem:[%s6883_s1 + $0x80] sm:$0xff]  ;;  %v6621_v33 = vld [vmem:[%s6883_s1 + $0x88] sm:$0xff] }
 0x36e   :  { %4505 = vpow2.f32 %v3548_v42  ;;  %v2746_v49 = vadd.f32 %v2722_v19, %v2591_v29  ;;  %v6575_v45 = vadd.f32 %v2724_v9, %v2692_v54  ;;  %v2729_v17 = vmul.f32 %v6607_v40, %v6475_v47  ;;  %v6614_v42 = vld [vmem:[%s6883_s1 + $0x90] sm:$0xff]  ;;  %v6628_v47 = vld [vmem:[%s6883_s1 + $0x98] sm:$0xff]  ;;  %v6635_v54 = vld [vmem:[%s6883_s1 + $0xa0] sm:$0xff] }
 0x36f   :  { %4507 = vpow2.f32 %v3547_v44  ;;  %v3550_v8 = vmul.f32 -1.442695, %v2745_v13  ;;  %v3552_v6 = vmul.f32 -1.442695, %v2747_v31  ;;  %v2731_v9 = vmul.f32 %v6614_v42, %v6477_v11 }
 0x370   :  { %4509 = vpow2.f32 %v3549_v36  ;;  %v3551_v57 = vmul.f32 -1.442695, %v2746_v49  ;;  %v2595_v23 = vpop.f32.mrb[90].mxu0  ;;  %v2696_v35 = vpop.f32.mrb[90].mxu1  ;;  %v2730_v50 = vmul.f32 %v6621_v33, %v6479_v58  ;;  %v2732_v13 = vmul.f32 %v6628_v47, %v6481_v10 }
 0x371   :  { %4511 = vpow2.f32 %v3550_v8  ;;  %v2749_v16 = vadd.f32 %v2725_v15, %v2595_v23  ;;  %v6598_v51 = vadd.f32 %v2727_v59, %v2696_v35  ;;  %v2597_v24 = vpop.f32.mrb[91].mxu0  ;;  %v2698_v32 = vpop.f32.mrb[91].mxu1  ;;  %v2733_v58 = vmul.f32 %v6635_v54, %v6486_v56  ;;  %v6642_v35 = vld [vmem:[%s6883_s1 + $0xb0] sm:$0xff] }
 0x372   :  { %4513 = vpow2.f32 %v3552_v6  ;;  %v6600_v38 = vadd.f32 %v2726_v52, %v2597_v24  ;;  %v6602_v34 = vadd.f32 %v2728_v18, %v2698_v32  ;;  %v2735_v56 = vmul.f32 %v6642_v35, %v6488_v5 }
 0x373   :  { %v4496_v19 = vpop.eup %4495  ;;  %v3554_v44 = vmul.f32 -1.442695, %v2749_v16  ;;  %4515 = vpow2.f32 %v3551_v57 }
 0x374   :  { %v4498_v36 = vpop.eup %4497  ;;  %v2833_v31 = vadd.f32 1.0, %v4496_v19  ;;  %v2601_v11 = vpop.f32.mrb[92].mxu0  ;;  %v6649_v19 = vld [vmem:[%s6883_s1 + $0xa8] sm:$0xff] }
 0x375   :  { %v4500_v29 = vpop.eup %4499  ;;  %v2835_v15 = vadd.f32 1.0, %v4498_v36  ;;  %4517 = vpow2.f32 %v3554_v44  ;;  %v2753_v49 = vadd.f32 %v2729_v17, %v2601_v11  ;;  %v2702_v59 = vpop.f32.mrb[92].mxu1  ;;  %v2734_v17 = vmul.f32 %v6649_v19, %v6490_v37 }
 0x376   :  { %v2603_v8 = vpop.f32.mrb[93].mxu0  ;;  %v4502_v6 = vpop.eup %4501  ;;  %4519 = vrcp.f32 %v2833_v31  ;;  %v2834_v10 = vadd.f32 1.0, %v4500_v29  ;;  %v2755_v52 = vadd.f32 %v2731_v9, %v2702_v59  ;;  %v6656_v9 = vld [vmem:[%s6883_s1 + $0xb8] sm:$0xff]  ;;  %v3553_v31 = vmul.f32 -1.442695, %v6575_v45 }
 0x377   :  { %v2754_v18 = vadd.f32 %v2730_v50, %v2603_v8  ;;  %v2704_v57 = vpop.f32.mrb[93].mxu1  ;;  %v4504_v23 = vpop.eup %4503  ;;  %4521 = vrcp.f32 %v2835_v15  ;;  %v2836_v16 = vadd.f32 1.0, %v4502_v6  ;;  %v2736_v5 = vmul.f32 %v6656_v9, %v6492_v61 }
 0x378   :  { %v2756_v24 = vadd.f32 %v2732_v13, %v2704_v57  ;;  %v4506_v32 = vpop.eup %4505  ;;  %4523 = vrcp.f32 %v2834_v10  ;;  %v2837_v44 = vadd.f32 1.0, %v4504_v23  ;;  %v2607_v36 = vpop.f32.mrb[94].mxu0 }
 0x379   :  { %v4508_v50 = vpop.eup %4507  ;;  %4525 = vrcp.f32 %v2836_v16  ;;  %v2839_v13 = vadd.f32 1.0, %v4506_v32  ;;  %v2757_v11 = vadd.f32 %v2733_v58, %v2607_v36  ;;  %v2708_v29 = vpop.f32.mrb[94].mxu1  ;;  %v3556_v58 = vmul.f32 -1.442695, %v6598_v51 }
 0x37a   :  { %v2609_v15 = vpop.f32.mrb[95].mxu0  ;;  %v4510_v37 = vpop.eup %4509  ;;  %4527 = vrcp.f32 %v2837_v44  ;;  %v2838_v59 = vadd.f32 1.0, %v4508_v50  ;;  %v2759_v8 = vadd.f32 %v2735_v56, %v2708_v29  ;;  %v3555_v56 = vmul.f32 -1.442695, %v6600_v38 }
 0x37b   :  { %v2758_v6 = vadd.f32 %v2734_v17, %v2609_v15  ;;  %v2710_v57 = vpop.f32.mrb[95].mxu1  ;;  %v4512_v14 = vpop.eup %4511  ;;  %4529 = vrcp.f32 %v2839_v13  ;;  %v2840_v61 = vadd.f32 1.0, %v4510_v37  ;;  %v3557_v50 = vmul.f32 -1.442695, %v6602_v34 }
 0x37c   :  { %v2760_v10 = vadd.f32 %v2736_v5, %v2710_v57  ;;  %v4514_v23 = vpop.eup %4513  ;;  %4531 = vrcp.f32 %v2838_v59  ;;  %v2841_v43 = vadd.f32 1.0, %v4512_v14  ;;  %v3558_v13 = vmul.f32 -1.442695, %v2753_v49 }
 0x37d   :  { %4533 = vrcp.f32 %v2840_v61  ;;  %v2843_v16 = vadd.f32 1.0, %v4514_v23  ;;  %v4516_v32 = vpop.eup %4515  ;;  %v3560_v29 = vmul.f32 -1.442695, %v2755_v52  ;;  %v3561_v37 = vmul.f32 -1.442695, %v2756_v24 }
 0x37e   :  { %4535 = vpow2.f32 %v3553_v31  ;;  %v3559_v31 = vmul.f32 -1.442695, %v2754_v18  ;;  %v3562_v51 = vmul.f32 -1.442695, %v2757_v11  ;;  %v3563_v34 = vmul.f32 -1.442695, %v2758_v6 }
 0x37f   :  { %v4518_v45 = vpop.eup %4517  ;;  %4537 = vrcp.f32 %v2841_v43  ;;  %v3564_v43 = vmul.f32 -1.442695, %v2759_v8  ;;  %v3565_v6 = vmul.f32 -1.442695, %v2760_v10 }
 0x380   :  { %v4520_v36 = vpop.eup %4519  ;;  %v2845_v44 = vadd.f32 1.0, %v4518_v45  ;;  %4539 = vrcp.f32 %v2843_v16 }
 0x381   :  { %v4522_v17 = vpop.eup %4521  ;;  %v2905_v38 = vmul.f32 %v6497_v55, %v4520_v36 }
 0x382   :  { %v4524_v5 = vpop.eup %4523  ;;  %4541 = vrcp.f32 %v2845_v44  ;;  %v2907_v49 = vmul.f32 %v6503_v4, %v4522_v17 }
 0x383   :  { %v4526_v14 = vpop.eup %4525  ;;  %4543 = vpow2.f32 %v3556_v58  ;;  %v2906_v18 = vmul.f32 %v6509_v46, %v4524_v5  ;;  %v2842_v58 = vadd.f32 1.0, %v4516_v32 }
 0x384   :  { %v4528_v15 = vpop.eup %4527  ;;  %4545 = vpow2.f32 %v3555_v56  ;;  %v2908_v55 = vmul.f32 %v6515_v27, %v4526_v14 }
 0x385   :  { %v4530_v59 = vpop.eup %4529  ;;  %4547 = vpow2.f32 %v3557_v50  ;;  %v2909_v57 = vmul.f32 %v6521_v20, %v4528_v15 }
 0x386   :  { %v4532_v61 = vpop.eup %4531  ;;  %4549 = vpow2.f32 %v3558_v13  ;;  %v2911_v23 = vmul.f32 %v6527_v62, %v4530_v59 }
 0x387   :  { %v4534_v52 = vpop.eup %4533  ;;  %4551 = vpow2.f32 %v3560_v29  ;;  %v2910_v24 = vmul.f32 %v6533_v39, %v4532_v61  ;;  %v4248_v11 = vpack.c.bf16 %v2909_v57, %v2905_v38 }
 0x388   :  { %v4536_v16 = vpop.eup %4535  ;;  %4553 = vpow2.f32 %v3559_v31  ;;  %v2912_v20 = vmul.f32 %v6539_v63, %v4534_v52  ;;  %v4260_v8 = vpack.c.bf16 %v2911_v23, %v2907_v49 }
 0x389   :  { %4555 = vpow2.f32 %v3561_v37  ;;  %v4246_v45 = vpack.c.bf16 %v2910_v24, %v2906_v18  ;;  %v4538_v4 = vpop.eup %4537  ;;  %v2844_v44 = vadd.f32 1.0, %v4536_v16 }
 0x38a   :  { %4557 = vpow2.f32 %v3562_v51  ;;  %v4258_v62 = vpack.c.bf16 %v2912_v20, %v2908_v55  ;;  %v4540_v36 = vpop.eup %4539  ;;  %v2913_v27 = vmul.f32 %v6545_v60, %v4538_v4 }
 0x38b   :  { %4559 = vpow2.f32 %v3564_v43  ;;  %4247 = vmatprep.subr.bf16.mxu0 %v4246_v45 }
 0x38c   :  { %v4542_v46 = vpop.eup %4541  ;;  %4561 = vpow2.f32 %v3563_v34  ;;  %4259 = vmatprep.subr.bf16.mxu1 %v4258_v62  ;;  %4249 = vmatpush1.bf16.msra.mxu0 %v4248_v11  ;;  %v2915_v11 = vmul.f32 %v6551_v30, %v4540_v36 }
 0x38d   :  { %v4544_v39 = vpop.eup %4543  ;;  %4563 = vpow2.f32 %v3565_v6  ;;  %4261 = vmatpush1.bf16.msra.mxu1 %v4260_v8  ;;  %v2917_v63 = vmul.f32 %v6571_v26, %v4542_v46 }
 0x38e   :  { %v4546_v10 = vpop.eup %4545  ;;  %4565 = vrcp.f32 %v2842_v58  ;;  %v2847_v32 = vadd.f32 1.0, %v4544_v39 }
 0x38f   :  { %v4548_v56 = vpop.eup %4547  ;;  %4567 = vrcp.f32 %v2844_v44  ;;  %v2846_v17 = vadd.f32 1.0, %v4546_v10  ;;  %v4252_v50 = vpack.c.bf16 %v2917_v63, %v2913_v27 }
 0x390   :  { %v4550_v5 = vpop.eup %4549  ;;  %4569 = vrcp.f32 %v2847_v32  ;;  %v2848_v13 = vadd.f32 1.0, %v4548_v56 }
 0x391   :  { %v4552_v14 = vpop.eup %4551  ;;  %4571 = vrcp.f32 %v2846_v17  ;;  %v2849_v29 = vadd.f32 1.0, %v4550_v5 }
 0x392   :  { %v4554_v15 = vpop.eup %4553  ;;  %4573 = vrcp.f32 %v2848_v13  ;;  %v2851_v31 = vadd.f32 1.0, %v4552_v14  ;;  %v7069_v14 = vld [vmem:[#allocation5_spill] sm:$0xff] }
 0x393   :  { %v4556_v37 = vpop.eup %4555  ;;  %4575 = vrcp.f32 %v2849_v29  ;;  %v2850_v60 = vadd.f32 1.0, %v4554_v15  ;;  %v7070_v29 = vld [vmem:[#allocation4_spill] sm:$0xff]  ;;  %v7075_v15 = vld [vmem:[#allocation6_spill] sm:$0xff] }
 0x394   :  { %v4558_v26 = vpop.eup %4557  ;;  %4577 = vrcp.f32 %v2851_v31  ;;  %v2852_v51 = vadd.f32 1.0, %v4556_v37  ;;  %v7076_v31 = vld [vmem:[#allocation7_spill] sm:$0xff] }
 0x395   :  { %v4560_v59 = vpop.eup %4559  ;;  %4579 = vrcp.f32 %v2850_v60  ;;  %v2853_v43 = vadd.f32 1.0, %v4558_v26  ;;  %v7077_v37 = vpack.c.bf16 %v7075_v15, %v7076_v31  ;;  %v7079_v60 = vld [vmem:[#allocation8_spill] sm:$0xff]  ;;  %v7082_v26 = vld [vmem:[#allocation14_spill] sm:$0xff] }
 0x396   :  { %v4562_v38 = vpop.eup %4561  ;;  %4581 = vrcp.f32 %v2852_v51  ;;  %v2855_v57 = vadd.f32 1.0, %v4560_v59  ;;  %v7084_v59 = vld [vmem:[#allocation17_spill] sm:$0xff] }
 0x397   :  { %v4564_v61 = vpop.eup %4563  ;;  %4583 = vrcp.f32 %v2853_v43  ;;  %v2854_v34 = vadd.f32 1.0, %v4562_v38  ;;  %v7085_v43 = vld [vmem:[#allocation16_spill] sm:$0xff] }
 0x398   :  { %v4566_v49 = vpop.eup %4565  ;;  %4585 = vrcp.f32 %v2855_v57  ;;  %v2856_v23 = vadd.f32 1.0, %v4564_v61  ;;  %v7086_v38 = vpack.c.bf16 %v7084_v59, %v7085_v43  ;;  %v7087_v57 = vld [vmem:[#allocation11_spill] sm:$0xff]  ;;  %v7088_v61 = vld [vmem:[#allocation10_spill] sm:$0xff] }
 0x399   :  { %v4568_v52 = vpop.eup %4567  ;;  %4587 = vrcp.f32 %v2854_v34  ;;  %v2914_v20 = vmul.f32 %v6557_v1, %v4566_v49  ;;  %v7089_v34 = vpack.c.bf16 %v7087_v57, %v7088_v61  ;;  %v2938_v49 = vld [vmem:[%s6885_s5 + $0x18] sm:$0xff] }
 0x39a   :  { %v4570_v18 = vpop.eup %4569  ;;  %4589 = vrcp.f32 %v2856_v23  ;;  %v2916_v45 = vmul.f32 %v6564_v22, %v4568_v52  ;;  %v7090_v23 = vld [vmem:[#allocation13_spill] sm:$0xff]  ;;  %v7091_v52 = vld [vmem:[#allocation12_spill] sm:$0xff] }
 0x39b   :  { %v4572_v24 = vpop.eup %4571  ;;  %v2919_v16 = vmul.f32 %v6580_v3, %v4570_v18  ;;  %v7092_v18 = vpack.c.bf16 %v7090_v23, %v7091_v52 }
 0x39c   :  { %v4574_v55 = vpop.eup %4573  ;;  %v2918_v8 = vmul.f32 %v6587_v7, %v4572_v24  ;;  %v2939_v24 = vld [vmem:[%s6885_s5 + $0x20] sm:$0xff] }
 0x39d   :  { %v4576_v6 = vpop.eup %4575  ;;  %v2920_v4 = vmul.f32 %v6594_v2, %v4574_v55  ;;  %v4264_v58 = vpack.c.bf16 %v2919_v16, %v2915_v11  ;;  %v2940_v11 = vld [vmem:[%s6885_s5 + $0x28] sm:$0xff]  ;;  %v2929_v16 = vld [vmem:[%s6886_s4] sm:$0xff] }
 0x39e   :  { %v4578_v62 = vpop.eup %4577  ;;  %v4250_v44 = vpack.c.bf16 %v2918_v8, %v2914_v20  ;;  %v2921_v1 = vmul.f32 %v6607_v40, %v4576_v6  ;;  %v2930_v55 = vld [vmem:[%s6886_s4 + $0x8] sm:$0xff]  ;;  %v2931_v20 = vld [vmem:[%s6886_s4 + $0x10] sm:$0xff]  ;;  %v2932_v8 = vld [vmem:[%s6886_s4 + $0x18] sm:$0xff] }
 0x39f   :  { %v4580_v46 = vpop.eup %4579  ;;  %v4262_v39 = vpack.c.bf16 %v2920_v4, %v2916_v45  ;;  %v2923_v22 = vmul.f32 %v6614_v42, %v4578_v62  ;;  %v2935_v42 = vld [vmem:[%s6885_s5] sm:$0xff]  ;;  %v2934_v45 = vld [vmem:[%s6886_s4 + $0x28] sm:$0xff]  ;;  %v3391_v4 = vpop.permute.xlu1 %3390 }
 0x3a0   :  { %v4582_v27 = vpop.eup %4581  ;;  %4251 = vmatprep.subr.bf16.mxu0 %v4250_v44  ;;  %v2922_v10 = vmul.f32 %v6621_v33, %v4580_v46  ;;  %v7064_v33 = vpack.c.bf16 %v6208_v21, %v6199_v12  ;;  %v7071_v12 = vpack.c.bf16 %v7069_v14, %v7070_v29  ;;  %v7073_v21 = vpack.c.bf16 %v6281_v28, %v6278_v48  ;;  %v7081_v28 = vld [vmem:[#allocation15_spill] sm:$0xff]  ;;  %v2933_v6 = vld [vmem:[%s6886_s4 + $0x20] sm:$0xff] }
 0x3a1   :  { %v4584_v30 = vpop.eup %4583  ;;  %4263 = vmatprep.subr.bf16.mxu1 %v4262_v39  ;;  %4253 = vmatpush1.bf16.msra.mxu0 %v4252_v50  ;;  %v2924_v17 = vmul.f32 %v6628_v47, %v4582_v27  ;;  %v7065_v47 = vpack.c.bf16 %v6213_v25, %v6202_v41  ;;  %v7072_v41 = vpack.c.bf16 %v6275_v0, %v6270_v53  ;;  %v7074_v25 = vmov 0.0   ;;  %v2937_v53 = vld [vmem:[%s6885_s5 + $0x10] sm:$0xff]  ;;  %v7078_v0 = vld [vmem:[#allocation9_spill] sm:$0xff] }
 0x3a2   :  { %v4586_v3 = vpop.eup %4585  ;;  %4265 = vmatpush1.bf16.msra.mxu1 %v4264_v58  ;;  %v2925_v7 = vmul.f32 %v6635_v54, %v4584_v30  ;;  %v7066_v54 = vld [vmem:[#allocation3_spill] sm:$0xff]  ;;  %v7080_v48 = vpack.c.bf16 %v7078_v0, %v7079_v60  ;;  %v7083_v51 = vpack.c.bf16 %v7081_v28, %v7082_v26 }
 0x3a3   :  { %v4588_v36 = vpop.eup %4587  ;;  %v2927_v2 = vmul.f32 %v6642_v35, %v4586_v3  ;;  %v7067_v35 = vld [vmem:[#allocation2_spill] sm:$0xff] }
 0x3a4   :  { %v4590_v63 = vpop.eup %4589  ;;  %v2926_v32 = vmul.f32 %v6649_v19, %v4588_v36  ;;  %v4256_v56 = vpack.c.bf16 %v2925_v7, %v2921_v1  ;;  %v7068_v19 = vpack.c.bf16 %v7066_v54, %v7067_v35  ;;  %v3396_v1 = vpop.permute.xlu0 %3395 }
 0x3a5   :  { %v2928_v50 = vmul.f32 %v6656_v9, %v4590_v63  ;;  %v4268_v5 = vpack.c.bf16 %v2927_v2, %v2923_v22  ;;  %v2936_v9 = vld [vmem:[%s6885_s5 + $0x8] sm:$0xff] }
 0x3a6   :  { %v4254_v13 = vpack.c.bf16 %v2926_v32, %v2922_v10 }
 0x3a7   :  { %v4266_v40 = vpack.c.bf16 %v2928_v50, %v2924_v17 }
 0x3a8   :  { %4255 = vmatprep.subr.bf16.mxu0 %v4254_v13  ;;  %v3406_v35 = vpop.permute.xlu0 %3405 }
 0x3a9   :  { %4267 = vmatprep.subr.bf16.mxu1 %v4266_v40  ;;  %4257 = vmatpush1.bf16.msra.mxu0 %v4256_v56  ;;  %v3401_v56 = vpop.permute.xlu1 %3400 }
 0x3aa   :  { %4269 = vmatpush1.bf16.msra.mxu1 %v4268_v5  ;;  %4271 = vmatprep.subr.bf16.mxu0 %v7064_v33 }
 0x3ab   :  { %4283 = vmatprep.subr.bf16.mxu1 %v7065_v47 }
 0x3ac   :  { %3566 = vmatmul.mubr.msk.f32.vlgmr.msra.gmra.mrb[96].mxu0 %vm2941_vm1, %v2935_v42 }
 0x3ad   :  { %3572 = vmatmul.mubr.msk.f32.vlgmr.msra.gmra.mrb[96].mxu1 %vm2941_vm1, %v2935_v42  ;;  %4273 = vmatpush1.bf16.msra.mxu0 %v7068_v19  ;;  %v3411_v15 = vpop.permute.xlu1 %3410 }
 0x3ae   :  { %4285 = vmatpush1.bf16.msra.mxu1 %v7071_v12  ;;  %4275 = vmatprep.subr.bf16.mxu0 %v7072_v41 }
 0x3af   :  { %4287 = vmatprep.subr.bf16.mxu1 %v7073_v21  ;;  %3030 = vmatprep.mubr.f32.mxu0 %v7074_v25 }
 0x3b0   :  { %3131 = vmatprep.mubr.f32.mxu1 %v7074_v25  ;;  %3567 = vmatmul.mubr.msk.f32.gmra.mrb[98].mxu0 %vm2941_vm1, %v2936_v9 }
 0x3b1   :  { %3573 = vmatmul.mubr.msk.f32.gmra.mrb[98].mxu1 %vm2941_vm1, %v2936_v9  ;;  %4277 = vmatpush1.bf16.msra.mxu0 %v7077_v37 }
 0x3b2   :  { %4289 = vmatpush1.bf16.msra.mxu1 %v7080_v48  ;;  %4279 = vmatprep.subr.bf16.mxu0 %v7083_v51  ;;  %v3416_v51 = vpop.permute.xlu0 %3415 }
 0x3b3   :  { %4291 = vmatprep.subr.bf16.mxu1 %v7086_v38  ;;  %3036 = vmatprep.mubr.f32.mxu0 %v7074_v25 }
 0x3b4   :  { %3137 = vmatprep.mubr.f32.mxu1 %v7074_v25  ;;  %3568 = vmatmul.mubr.msk.f32.gmra.mrb[100].mxu0 %vm2941_vm1, %v2937_v53 }
 0x3b5   :  { %3574 = vmatmul.mubr.msk.f32.gmra.mrb[100].mxu1 %vm2941_vm1, %v2937_v53  ;;  %4281 = vmatpush1.bf16.msra.mxu0 %v7089_v34 }
 0x3b6   :  { %4293 = vmatpush1.bf16.msra.mxu1 %v7092_v18  ;;  %3042 = vmatprep.mubr.f32.mxu0 %v7074_v25 }
 0x3b7   :  { %3143 = vmatprep.mubr.f32.mxu1 %v7074_v25 }
 0x3b8   :  { %3569 = vmatmul.mubr.msk.f32.gmra.mrb[102].mxu0 %vm2941_vm1, %v2938_v49 }
 0x3b9   :  { %3575 = vmatmul.mubr.msk.f32.gmra.mrb[102].mxu1 %vm2941_vm1, %v2938_v49  ;;  %3048 = vmatprep.mubr.f32.mxu0 %v7074_v25 }
 0x3ba   :  { %3149 = vmatprep.mubr.f32.mxu1 %v7074_v25 }
 0x3bc   :  { %3570 = vmatmul.mubr.msk.f32.gmra.mrb[104].mxu0 %vm2941_vm1, %v2939_v24 }
 0x3bd   :  { %3576 = vmatmul.mubr.msk.f32.gmra.mrb[104].mxu1 %vm2941_vm1, %v2939_v24  ;;  %3054 = vmatprep.mubr.f32.mxu0 %v7074_v25 }
 0x3be   :  { %3155 = vmatprep.mubr.f32.mxu1 %v7074_v25 }
 0x3c0   :  { %3571 = vmatmul.mubr.msk.f32.gmra.mrb[106].mxu0 %vm2941_vm1, %v2940_v11 }
 0x3c1   :  { %3577 = vmatmul.mubr.msk.f32.gmra.mrb[106].mxu1 %vm2941_vm1, %v2940_v11  ;;  %3244 = vmatprep.mubr.f32.mxu0 %v7074_v25 }
 0x3c2   :  { %3345 = vmatprep.mubr.f32.mxu1 %v7074_v25 }
 0x3c4   :  { %3578 = vmatmul.mubr.msk.f32.vlgmr.msra.gmra.mrb[96].mxu0 %vm2941_vm1, %v2929_v16 }
 0x3c5   :  { %3584 = vmatmul.mubr.msk.f32.vlgmr.msra.gmra.mrb[96].mxu1 %vm2941_vm1, %v2929_v16  ;;  %3250 = vmatprep.mubr.f32.mxu0 %v7074_v25 }
 0x3c6   :  { %3351 = vmatprep.mubr.f32.mxu1 %v7074_v25 }
 0x3c8   :  { %3579 = vmatmul.mubr.msk.f32.gmra.mrb[98].mxu0 %vm2941_vm1, %v2930_v55 }
 0x3c9   :  { %3585 = vmatmul.mubr.msk.f32.gmra.mrb[98].mxu1 %vm2941_vm1, %v2930_v55  ;;  %3256 = vmatprep.mubr.f32.mxu0 %v7074_v25 }
 0x3ca   :  { %3357 = vmatprep.mubr.f32.mxu1 %v7074_v25 }
 0x3cc   :  { %3580 = vmatmul.mubr.msk.f32.gmra.mrb[100].mxu0 %vm2941_vm1, %v2931_v20 }
 0x3cd   :  { %3586 = vmatmul.mubr.msk.f32.gmra.mrb[100].mxu1 %vm2941_vm1, %v2931_v20  ;;  %3262 = vmatprep.mubr.f32.mxu0 %v7074_v25 }
 0x3ce   :  { %3363 = vmatprep.mubr.f32.mxu1 %v7074_v25 }
 0x3d0   :  { %3581 = vmatmul.mubr.msk.f32.gmra.mrb[102].mxu0 %vm2941_vm1, %v2932_v8 }
 0x3d1   :  { %3587 = vmatmul.mubr.msk.f32.gmra.mrb[102].mxu1 %vm2941_vm1, %v2932_v8  ;;  %3268 = vmatprep.mubr.f32.mxu0 %v7074_v25 }
 0x3d2   :  { %3369 = vmatprep.mubr.f32.mxu1 %v7074_v25 }
 0x3d4   :  { %3582 = vmatmul.mubr.msk.f32.gmra.mrb[104].mxu0 %vm2941_vm1, %v2933_v6 }
 0x3d5   :  { %3588 = vmatmul.mubr.msk.f32.gmra.mrb[104].mxu1 %vm2941_vm1, %v2933_v6  ;;  %3274 = vmatprep.mubr.f32.mxu0 %v7074_v25 }
 0x3d6   :  { %3375 = vmatprep.mubr.f32.mxu1 %v7074_v25 }
 0x3d8   :  { %3583 = vmatmul.mubr.msk.f32.gmra.mrb[106].mxu0 %vm2941_vm1, %v2934_v45 }
 0x3d9   :  { %3589 = vmatmul.mubr.msk.f32.gmra.mrb[106].mxu1 %vm2941_vm1, %v2934_v45 }
 0x497   :  { %v3246_v58 = vpop.f32.mrb[96].mxu0 }
 0x498   :  { %v3418_v62 = vadd.f32 %v3391_v4, %v3246_v58  ;;  %v3347_v44 = vpop.f32.mrb[96].mxu1  ;;  %v3248_v46 = vpop.f32.mrb[97].mxu0 }
 0x499   :  { %v3420_v39 = vadd.f32 %v3391_v4, %v3347_v44  ;;  %v3419_v27 = vadd.f32 %v3391_v4, %v3248_v46  ;;  %v3349_v30 = vpop.f32.mrb[97].mxu1 }
 0x49a   :  { %3442 = vst [vmem:[%s6887_s9] sm:$0xff] %v3418_v62  ;;  %v3421_v3 = vadd.f32 %v3391_v4, %v3349_v30 }
 0x49b   :  { %3444 = vst [vmem:[%s6887_s9 + $0x10] sm:$0xff] %v3420_v39  ;;  %3443 = vst [vmem:[%s6887_s9 + $0x8] sm:$0xff] %v3419_v27  ;;  %v3252_v7 = vpop.f32.mrb[98].mxu0 }
 0x49c   :  { %3445 = vst [vmem:[%s6887_s9 + $0x18] sm:$0xff] %v3421_v3  ;;  %v3422_v36 = vadd.f32 %v3396_v1, %v3252_v7  ;;  %v3353_v22 = vpop.f32.mrb[98].mxu1  ;;  %v3254_v2 = vpop.f32.mrb[99].mxu0 }
 0x49d   :  { %v3424_v63 = vadd.f32 %v3396_v1, %v3353_v22  ;;  %v3423_v10 = vadd.f32 %v3396_v1, %v3254_v2  ;;  %v3355_v32 = vpop.f32.mrb[99].mxu1 }
 0x49e   :  { %3446 = vst [vmem:[%s6887_s9 + $0x20] sm:$0xff] %v3422_v36  ;;  %v3425_v17 = vadd.f32 %v3396_v1, %v3355_v32 }
 0x49f   :  { %3448 = vst [vmem:[%s6887_s9 + $0x30] sm:$0xff] %v3424_v63  ;;  %3447 = vst [vmem:[%s6887_s9 + $0x28] sm:$0xff] %v3423_v10  ;;  %v3258_v50 = vpop.f32.mrb[100].mxu0 }
 0x4a0   :  { %3449 = vst [vmem:[%s6887_s9 + $0x38] sm:$0xff] %v3425_v17  ;;  %v3426_v5 = vadd.f32 %v3401_v56, %v3258_v50  ;;  %v3359_v13 = vpop.f32.mrb[100].mxu1  ;;  %v3260_v40 = vpop.f32.mrb[101].mxu0 }
 0x4a1   :  { %v3428_v42 = vadd.f32 %v3401_v56, %v3359_v13  ;;  %v3427_v33 = vadd.f32 %v3401_v56, %v3260_v40  ;;  %v3361_v47 = vpop.f32.mrb[101].mxu1 }
 0x4a2   :  { %3450 = vst [vmem:[%s6887_s9 + $0x40] sm:$0xff] %v3426_v5  ;;  %v3429_v54 = vadd.f32 %v3401_v56, %v3361_v47 }
 0x4a3   :  { %3452 = vst [vmem:[%s6887_s9 + $0x50] sm:$0xff] %v3428_v42  ;;  %3451 = vst [vmem:[%s6887_s9 + $0x48] sm:$0xff] %v3427_v33  ;;  %v3264_v19 = vpop.f32.mrb[102].mxu0 }
 0x4a4   :  { %3453 = vst [vmem:[%s6887_s9 + $0x58] sm:$0xff] %v3429_v54  ;;  %v3430_v9 = vadd.f32 %v3406_v35, %v3264_v19  ;;  %v3365_v14 = vpop.f32.mrb[102].mxu1  ;;  %v3266_v29 = vpop.f32.mrb[103].mxu0 }
 0x4a5   :  { %v3432_v12 = vadd.f32 %v3406_v35, %v3365_v14  ;;  %v3431_v41 = vadd.f32 %v3406_v35, %v3266_v29  ;;  %v3367_v21 = vpop.f32.mrb[103].mxu1 }
 0x4a6   :  { %3454 = vst [vmem:[%s6887_s9 + $0x60] sm:$0xff] %v3430_v9  ;;  %v3433_v25 = vadd.f32 %v3406_v35, %v3367_v21 }
 0x4a7   :  { %3456 = vst [vmem:[%s6887_s9 + $0x70] sm:$0xff] %v3432_v12  ;;  %3455 = vst [vmem:[%s6887_s9 + $0x68] sm:$0xff] %v3431_v41  ;;  %v3270_v31 = vpop.f32.mrb[104].mxu0 }
 0x4a8   :  { %3457 = vst [vmem:[%s6887_s9 + $0x78] sm:$0xff] %v3433_v25  ;;  %v3434_v37 = vadd.f32 %v3411_v15, %v3270_v31  ;;  %v3371_v53 = vpop.f32.mrb[104].mxu1  ;;  %v3272_v0 = vpop.f32.mrb[105].mxu0 }
 0x4a9   :  { %v3436_v60 = vadd.f32 %v3411_v15, %v3371_v53  ;;  %v3435_v48 = vadd.f32 %v3411_v15, %v3272_v0  ;;  %v3373_v28 = vpop.f32.mrb[105].mxu1 }
 0x4aa   :  { %3458 = vst [vmem:[%s6887_s9 + $0x80] sm:$0xff] %v3434_v37  ;;  %v3437_v26 = vadd.f32 %v3411_v15, %v3373_v28 }
 0x4ab   :  { %3460 = vst [vmem:[%s6887_s9 + $0x90] sm:$0xff] %v3436_v60  ;;  %3459 = vst [vmem:[%s6887_s9 + $0x88] sm:$0xff] %v3435_v48  ;;  %v3276_v59 = vpop.f32.mrb[106].mxu0 }
 0x4ac   :  { %3461 = vst [vmem:[%s6887_s9 + $0x98] sm:$0xff] %v3437_v26  ;;  %v3438_v43 = vadd.f32 %v3416_v51, %v3276_v59  ;;  %v3377_v38 = vpop.f32.mrb[106].mxu1  ;;  %v3278_v57 = vpop.f32.mrb[107].mxu0 }
 0x4ad   :  { %v3440_v61 = vadd.f32 %v3416_v51, %v3377_v38  ;;  %v3439_v34 = vadd.f32 %v3416_v51, %v3278_v57  ;;  %v3379_v49 = vpop.f32.mrb[107].mxu1 }
 0x4ae   :  { %3462 = vst [vmem:[%s6887_s9 + $0xa0] sm:$0xff] %v3438_v43  ;;  %v3441_v23 = vadd.f32 %v3416_v51, %v3379_v49 }
 0x4af   :  { %3464 = vst [vmem:[%s6887_s9 + $0xb0] sm:$0xff] %v3440_v61  ;;  %3463 = vst [vmem:[%s6887_s9 + $0xa8] sm:$0xff] %v3439_v34 }
 0x4b0   :  { %3465 = vst [vmem:[%s6887_s9 + $0xb8] sm:$0xff] %v3441_v23 }

</bundles_post_ra>
